<compile_context>
chip_gen: v7x
topology: tpu7x:2x2x1
jax: 0.10.0
libtpu: 0.0.40
codegen_flags: <defaults>
</compile_context>

<pallas_src>
import functools

import jax
import jax.numpy as jnp
from jax.experimental import pallas as pl
from jax.experimental.pallas import tpu as pltpu

IN_CHANNELS = 64
OUT_CHANNELS = 16
HIDDEN = (2048, 512, 128)


def mlp_kernel(x_ref, w1_ref, b1_ref, w2_ref, b2_ref, w3_ref, b3_ref,
               w4_ref, b4_ref, o_ref):
    """Fused fc1->relu->fc2->relu->fc3->relu->fc4 on one row-tile of x.

    Weights are bf16, biases f32; every dot accumulates in f32 on the MXU,
    bias-add + ReLU run in f32 on the VPU, then cast back to bf16 for the next dot.
    """
    x = x_ref[...].astype(jnp.bfloat16)
    h = jnp.dot(x, w1_ref[...], preferred_element_type=jnp.float32) + b1_ref[...]
    h = jnp.maximum(h, 0.0).astype(jnp.bfloat16)      # ReLU (dropout = identity in eval)
    h = jnp.dot(h, w2_ref[...], preferred_element_type=jnp.float32) + b2_ref[...]
    h = jnp.maximum(h, 0.0).astype(jnp.bfloat16)
    h = jnp.dot(h, w3_ref[...], preferred_element_type=jnp.float32) + b3_ref[...]
    h = jnp.maximum(h, 0.0).astype(jnp.bfloat16)
    out = jnp.dot(h, w4_ref[...], preferred_element_type=jnp.float32) + b4_ref[...]
    o_ref[...] = out.astype(o_ref.dtype)


def _cdiv(a, b):
    return -(-a // b)


def _round_up(a, b):
    return _cdiv(a, b) * b


def _choose_tiling(M, tm, min_steps=2):
    """Balanced row tiling.

    - at most `tm` rows per tile,
    - at least `min_steps` grid steps whenever M >= min_steps*8 rows (v7x megacore),
    - tiles balanced so the last step is not mostly padding.
    """
    ntiles = max(_cdiv(M, tm), min(min_steps, _cdiv(M, 8)))
    tm_eff = _round_up(_cdiv(M, ntiles), 8)
    M_pad = ntiles * tm_eff
    return tm_eff, M_pad, ntiles


def _vmem_limit_bytes(tm_eff, weight_bytes):
    """Scoped-VMEM limit sized from the actual per-step footprint + 50% headroom."""
    # f32 accumulator + bf16 copy of every intermediate activation of this tile.
    act_bytes = sum(tm_eff * d * (4 + 2) for d in HIDDEN + (OUT_CHANNELS,))
    x_bytes = 2 * tm_eff * IN_CHANNELS * 4       # double-buffered f32 input tile
    o_bytes = 2 * tm_eff * OUT_CHANNELS * 4      # double-buffered f32 output tile
    total = weight_bytes + act_bytes + x_bytes + o_bytes
    return int(min(max(total * 3 // 2, 16 << 20), 48 << 20))


def three_d_net_forward(x, params, *, tm=1024):
    """x: any shape reshapable to (-1, IN_CHANNELS), mirroring x.view(-1, C)."""
    w1, b1, w2, b2, w3, b3, w4, b4 = params
    x2d = x.reshape(-1, IN_CHANNELS)
    M = x2d.shape[0]

    tm_eff, M_pad, ntiles = _choose_tiling(M, tm)
    if M_pad != M:
        x2d = jnp.pad(x2d, ((0, M_pad - M), (0, 0)))
    grid = (ntiles,)

    # Weights / biases are small (bf16 weights ~2.4 MiB total) and have a constant
    # index_map -> keep them fully resident in VMEM, single-buffered.
    def full(arr):
        return pl.BlockSpec(arr.shape,
                            lambda i: tuple(0 for _ in arr.shape),
                            pipeline_mode=pl.Buffered(1))

    weights_and_biases = (w1, b1, w2, b2, w3, b3, w4, b4)
    weight_bytes = sum(int(w.size) * w.dtype.itemsize for w in weights_and_biases)

    dims = (IN_CHANNELS,) + HIDDEN + (OUT_CHANNELS,)
    flops = 2 * M_pad * sum(dims[i] * dims[i + 1] for i in range(len(dims) - 1))
    bytes_accessed = weight_bytes + M_pad * (IN_CHANNELS + OUT_CHANNELS) * 4

    out = pl.pallas_call(
        mlp_kernel,
        out_shape=jax.ShapeDtypeStruct((M_pad, OUT_CHANNELS), jnp.float32),
        grid_spec=pltpu.PrefetchScalarGridSpec(
            num_scalar_prefetch=0,
            grid=grid,
            in_specs=[
                pl.BlockSpec((tm_eff, IN_CHANNELS), lambda i: (i, 0)),
                full(w1), full(b1),
                full(w2), full(b2),
                full(w3), full(b3),
                full(w4), full(b4),
            ],
            out_specs=pl.BlockSpec((tm_eff, OUT_CHANNELS), lambda i: (i, 0)),
        ),
        compiler_params=pltpu.CompilerParams(
            dimension_semantics=("parallel",),
            vmem_limit_bytes=_vmem_limit_bytes(tm_eff, weight_bytes),
        ),
        cost_estimate=pl.CostEstimate(
            flops=flops, transcendentals=0, bytes_accessed=bytes_accessed),
    )(x2d, *weights_and_biases)
    return out[:M]


def init_params(key):
    """Deterministic parameter init (shapes match nn.Linear, weights transposed to
    [in_features, out_features]).  Weights bf16, biases f32."""
    dims = (IN_CHANNELS,) + HIDDEN + (OUT_CHANNELS,)
    params = []
    keys = jax.random.split(key, 2 * (len(dims) - 1))
    for li in range(len(dims) - 1):
        fan_in, fan_out = dims[li], dims[li + 1]
        bound = 1.0 / jnp.sqrt(fan_in)
        w = jax.random.uniform(keys[2 * li], (fan_in, fan_out),
                               minval=-bound, maxval=bound,
                               dtype=jnp.float32).astype(jnp.bfloat16)
        b = jax.random.uniform(keys[2 * li + 1], (1, fan_out),
                               minval=-bound, maxval=bound, dtype=jnp.float32)
        params += [w, b]
    return tuple(params)


def reference_forward(x, params):
    """Pure-JAX reference using the same bf16-weight / f32-accumulate recipe."""
    w1, b1, w2, b2, w3, b3, w4, b4 = params
    h = x.reshape(-1, IN_CHANNELS).astype(jnp.bfloat16)
    h = jnp.maximum(jnp.dot(h, w1, preferred_element_type=jnp.float32) + b1, 0.0)
    h = h.astype(jnp.bfloat16)
    h = jnp.maximum(jnp.dot(h, w2, preferred_element_type=jnp.float32) + b2, 0.0)
    h = h.astype(jnp.bfloat16)
    h = jnp.maximum(jnp.dot(h, w3, preferred_element_type=jnp.float32) + b3, 0.0)
    h = h.astype(jnp.bfloat16)
    return jnp.dot(h, w4, preferred_element_type=jnp.float32) + b4


if __name__ == "__main__":
    key = jax.random.PRNGKey(0)
    pkey, xkey = jax.random.split(key)
    params = init_params(pkey)

    # NCHW input [2, 4, 16, 16]; 2*4*16*16 = 2048 elems -> view(-1, 64) = (32, 64) rows.
    x = jax.random.normal(xkey, (2, 4, 16, 16), dtype=jnp.float32)

    fwd = jax.jit(functools.partial(three_d_net_forward, tm=1024))
    out = fwd(x, params)
    jax.block_until_ready(out)

    ref = reference_forward(x, params)
    assert out.shape == (32, OUT_CHANNELS)
    assert jnp.allclose(out, ref, atol=2e-3, rtol=2e-3), "mismatch vs JAX reference"

    print("KERNEL_OK")
</pallas_src>

<mosaic_0001>
module attributes {stable_mosaic.version = 11 : i64} {
  func.func @mlp_kernel(%arg0: i32, %arg1: memref<16x64xf32, #tpu.memory_space<vmem>>, %arg2: memref<64x2048xbf16, #tpu.memory_space<vmem>>, %arg3: memref<1x2048xf32, #tpu.memory_space<vmem>>, %arg4: memref<2048x512xbf16, #tpu.memory_space<vmem>>, %arg5: memref<1x512xf32, #tpu.memory_space<vmem>>, %arg6: memref<512x128xbf16, #tpu.memory_space<vmem>>, %arg7: memref<1x128xf32, #tpu.memory_space<vmem>>, %arg8: memref<128x16xbf16, #tpu.memory_space<vmem>>, %arg9: memref<1x16xf32, #tpu.memory_space<vmem>>, %arg10: memref<16x16xf32, #tpu.memory_space<vmem>>) attributes {dimension_semantics = [#tpu.dimension_semantics<parallel>], iteration_bounds = array<i64: 2>, scalar_prefetch = 0 : i64, scratch_operands = 0 : i64, tpu.core_type = #tpu.core_type<tc>, window_params = [{transform_indices = @transform_0, window_bounds = array<i64: 16, 64>}, {pipeline_mode = #tpu.pipeline_mode<synchronous>, transform_indices = @transform_1, window_bounds = array<i64: 64, 2048>}, {pipeline_mode = #tpu.pipeline_mode<synchronous>, transform_indices = @transform_2, window_bounds = array<i64: 1, 2048>}, {pipeline_mode = #tpu.pipeline_mode<synchronous>, transform_indices = @transform_3, window_bounds = array<i64: 2048, 512>}, {pipeline_mode = #tpu.pipeline_mode<synchronous>, transform_indices = @transform_4, window_bounds = array<i64: 1, 512>}, {pipeline_mode = #tpu.pipeline_mode<synchronous>, transform_indices = @transform_5, window_bounds = array<i64: 512, 128>}, {pipeline_mode = #tpu.pipeline_mode<synchronous>, transform_indices = @transform_6, window_bounds = array<i64: 1, 128>}, {pipeline_mode = #tpu.pipeline_mode<synchronous>, transform_indices = @transform_7, window_bounds = array<i64: 128, 16>}, {pipeline_mode = #tpu.pipeline_mode<synchronous>, transform_indices = @transform_8, window_bounds = array<i64: 1, 16>}, {transform_indices = @transform_9, window_bounds = array<i64: 16, 16>}]} {
    %c0 = arith.constant 0 : index
    %c0_0 = arith.constant 0 : index
    %0 = vector.load %arg1[%c0, %c0_0] : memref<16x64xf32, #tpu.memory_space<vmem>>, vector<16x64xf32>
    %1 = arith.truncf %0 : vector<16x64xf32> to vector<16x64xbf16>
    %c0_1 = arith.constant 0 : index
    %c0_2 = arith.constant 0 : index
    %2 = vector.load %arg2[%c0_1, %c0_2] : memref<64x2048xbf16, #tpu.memory_space<vmem>>, vector<64x2048xbf16>
    %cst = arith.constant dense<0.000000e+00> : vector<16x2048xf32>
    %3 = tpu.matmul %1, %2, %cst {dimension_numbers = #tpu.dot_dimension_numbers<[1], [0], [0], [1], [0, 0, 1, 1], [], []>} : vector<16x64xbf16>, vector<64x2048xbf16>, vector<16x2048xf32> -> vector<16x2048xf32>
    %c0_3 = arith.constant 0 : index
    %c0_4 = arith.constant 0 : index
    %4 = vector.load %arg3[%c0_3, %c0_4] : memref<1x2048xf32, #tpu.memory_space<vmem>>, vector<1x2048xf32>
    %5 = vector.broadcast %4 : vector<1x2048xf32> to vector<16x2048xf32>
    %6 = arith.addf %3, %5 : vector<16x2048xf32>
    %cst_5 = arith.constant 0.000000e+00 : f32
    %7 = vector.broadcast %cst_5 : f32 to vector<16x2048xf32>
    %8 = arith.maximumf %6, %7 : vector<16x2048xf32>
    %9 = arith.truncf %8 : vector<16x2048xf32> to vector<16x2048xbf16>
    %c0_6 = arith.constant 0 : index
    %c0_7 = arith.constant 0 : index
    %10 = vector.load %arg4[%c0_6, %c0_7] : memref<2048x512xbf16, #tpu.memory_space<vmem>>, vector<2048x512xbf16>
    %cst_8 = arith.constant dense<0.000000e+00> : vector<16x512xf32>
    %11 = tpu.matmul %9, %10, %cst_8 {dimension_numbers = #tpu.dot_dimension_numbers<[1], [0], [0], [1], [0, 0, 1, 1], [], []>} : vector<16x2048xbf16>, vector<2048x512xbf16>, vector<16x512xf32> -> vector<16x512xf32>
    %c0_9 = arith.constant 0 : index
    %c0_10 = arith.constant 0 : index
    %12 = vector.load %arg5[%c0_9, %c0_10] : memref<1x512xf32, #tpu.memory_space<vmem>>, vector<1x512xf32>
    %13 = vector.broadcast %12 : vector<1x512xf32> to vector<16x512xf32>
    %14 = arith.addf %11, %13 : vector<16x512xf32>
    %cst_11 = arith.constant 0.000000e+00 : f32
    %15 = vector.broadcast %cst_11 : f32 to vector<16x512xf32>
    %16 = arith.maximumf %14, %15 : vector<16x512xf32>
    %17 = arith.truncf %16 : vector<16x512xf32> to vector<16x512xbf16>
    %c0_12 = arith.constant 0 : index
    %c0_13 = arith.constant 0 : index
    %18 = vector.load %arg6[%c0_12, %c0_13] : memref<512x128xbf16, #tpu.memory_space<vmem>>, vector<512x128xbf16>
    %cst_14 = arith.constant dense<0.000000e+00> : vector<16x128xf32>
    %19 = tpu.matmul %17, %18, %cst_14 {dimension_numbers = #tpu.dot_dimension_numbers<[1], [0], [0], [1], [0, 0, 1, 1], [], []>} : vector<16x512xbf16>, vector<512x128xbf16>, vector<16x128xf32> -> vector<16x128xf32>
    %c0_15 = arith.constant 0 : index
    %c0_16 = arith.constant 0 : index
    %20 = vector.load %arg7[%c0_15, %c0_16] : memref<1x128xf32, #tpu.memory_space<vmem>>, vector<1x128xf32>
    %21 = vector.broadcast %20 : vector<1x128xf32> to vector<16x128xf32>
    %22 = arith.addf %19, %21 : vector<16x128xf32>
    %cst_17 = arith.constant 0.000000e+00 : f32
    %23 = vector.broadcast %cst_17 : f32 to vector<16x128xf32>
    %24 = arith.maximumf %22, %23 : vector<16x128xf32>
    %25 = arith.truncf %24 : vector<16x128xf32> to vector<16x128xbf16>
    %c0_18 = arith.constant 0 : index
    %c0_19 = arith.constant 0 : index
    %26 = vector.load %arg8[%c0_18, %c0_19] : memref<128x16xbf16, #tpu.memory_space<vmem>>, vector<128x16xbf16>
    %cst_20 = arith.constant dense<0.000000e+00> : vector<16x16xf32>
    %27 = tpu.matmul %25, %26, %cst_20 {dimension_numbers = #tpu.dot_dimension_numbers<[1], [0], [0], [1], [0, 0, 1, 1], [], []>} : vector<16x128xbf16>, vector<128x16xbf16>, vector<16x16xf32> -> vector<16x16xf32>
    %c0_21 = arith.constant 0 : index
    %c0_22 = arith.constant 0 : index
    %28 = vector.load %arg9[%c0_21, %c0_22] : memref<1x16xf32, #tpu.memory_space<vmem>>, vector<1x16xf32>
    %29 = vector.broadcast %28 : vector<1x16xf32> to vector<16x16xf32>
    %30 = arith.addf %27, %29 : vector<16x16xf32>
    %c0_23 = arith.constant 0 : index
    %c0_24 = arith.constant 0 : index
    %31 = vector.load %arg10[%c0_23, %c0_24] : memref<16x16xf32, #tpu.memory_space<vmem>>, vector<16x16xf32>
    tpu.vector_store %arg10[%c0_23, %c0_24], %30 {strides = array<i32>} : memref<16x16xf32, #tpu.memory_space<vmem>>, vector<16x16xf32>,
    return
  }
  func.func @transform_0(%arg0: i32) -> (i32, i32) {
    %c0_i32 = arith.constant 0 : i32
    %c0_i32_0 = arith.constant 0 : i32
    return %arg0, %c0_i32 : i32, i32
  }
  func.func @transform_1(%arg0: i32) -> (i32, i32) {
    %c0_i32 = arith.constant 0 : i32
    %c0_i32_0 = arith.constant 0 : i32
    %c0_i32_1 = arith.constant 0 : i32
    return %c0_i32, %c0_i32_0 : i32, i32
  }
  func.func @transform_2(%arg0: i32) -> (i32, i32) {
    %c0_i32 = arith.constant 0 : i32
    %c0_i32_0 = arith.constant 0 : i32
    %c0_i32_1 = arith.constant 0 : i32
    return %c0_i32, %c0_i32_0 : i32, i32
  }
  func.func @transform_3(%arg0: i32) -> (i32, i32) {
    %c0_i32 = arith.constant 0 : i32
    %c0_i32_0 = arith.constant 0 : i32
    %c0_i32_1 = arith.constant 0 : i32
    return %c0_i32, %c0_i32_0 : i32, i32
  }
  func.func @transform_4(%arg0: i32) -> (i32, i32) {
    %c0_i32 = arith.constant 0 : i32
    %c0_i32_0 = arith.constant 0 : i32
    %c0_i32_1 = arith.constant 0 : i32
    return %c0_i32, %c0_i32_0 : i32, i32
  }
  func.func @transform_5(%arg0: i32) -> (i32, i32) {
    %c0_i32 = arith.constant 0 : i32
    %c0_i32_0 = arith.constant 0 : i32
    %c0_i32_1 = arith.constant 0 : i32
    return %c0_i32, %c0_i32_0 : i32, i32
  }
  func.func @transform_6(%arg0: i32) -> (i32, i32) {
    %c0_i32 = arith.constant 0 : i32
    %c0_i32_0 = arith.constant 0 : i32
    %c0_i32_1 = arith.constant 0 : i32
    return %c0_i32, %c0_i32_0 : i32, i32
  }
  func.func @transform_7(%arg0: i32) -> (i32, i32) {
    %c0_i32 = arith.constant 0 : i32
    %c0_i32_0 = arith.constant 0 : i32
    %c0_i32_1 = arith.constant 0 : i32
    return %c0_i32, %c0_i32_0 : i32, i32
  }
  func.func @transform_8(%arg0: i32) -> (i32, i32) {
    %c0_i32 = arith.constant 0 : i32
    %c0_i32_0 = arith.constant 0 : i32
    %c0_i32_1 = arith.constant 0 : i32
    return %c0_i32, %c0_i32_0 : i32, i32
  }
  func.func @transform_9(%arg0: i32) -> (i32, i32) {
    %c0_i32 = arith.constant 0 : i32
    %c0_i32_0 = arith.constant 0 : i32
    return %arg0, %c0_i32 : i32, i32
  }
}

</mosaic_0001>

<bundles_post_ra>
// kernel: three_d_net_forward.1
= control target key start
LH: loop header
LB: loop body
LE: loop exit
PB: predicated region body
PF: predicated region fallthrough
CT: control target
= control target key end

     0   :  { %14 = vsyncpa [#allocation3], 0  ;;  %s8051_s0 = inlined_call_operand.vmem [shape: f32[32,64], index: 0, kind: input, shape index: {}]   ;;  %s8052_s1 = inlined_call_operand.hbm [shape: bf16[64,2048], index: 1, kind: input, shape index: {}]   ;;  %s8053_s2 = inlined_call_operand.hbm [shape: f32[1,2048], index: 2, kind: input, shape index: {}]   ;;  %s8054_s3 = inlined_call_operand.hbm [shape: bf16[2048,512], index: 3, kind: input, shape index: {}]   ;;  %s8055_s4 = inlined_call_operand.hbm [shape: f32[1,512], index: 4, kind: input, shape index: {}]   ;;  %s8056_s5 = inlined_call_operand.hbm [shape: bf16[512,128], index: 5, kind: input, shape index: {}]   ;;  %s8057_s6 = inlined_call_operand.hbm [shape: f32[1,128], index: 6, kind: input, shape index: {}]   ;;  %s8058_s7 = inlined_call_operand.vmem [shape: bf16[128,16], index: 7, kind: input, shape index: {}]   ;;  %s8059_s8 = inlined_call_operand.hbm [shape: f32[1,16], index: 8, kind: input, shape index: {}]   ;;  %s8060_s9 = inlined_call_operand.vmem [shape: f32[32,16], index: 9, kind: output, shape index: {}]  }
   0x1   :  { %15 = vsyncpa [#allocation5], 0 }
   0x2   :  { %16 = vsyncpa [#allocation8], 0 }
   0x3   :  { %17 = vsyncpa [#allocation11], 0  ;;  %s7648_s30 = smov 0  }
   0x4 LB: > { %s7583_s10 = smov [#allocation4]   ;;  %s8064_s12 = sadd.s32 4294967295, %s7581_s30   ;;  %s7581_s30 = sphi %s7648_s30, %s23_s30  }
   0x5   : > { %s274_s11 = sshll.u32 %s7583_s10, 4  ;;  %p5682_p0 = scmp.ge.s32.totalorder %s7581_s30, 1  ;;  %s7662_s11 = int_to_ptr.vmem [resolvable:$true] %s274_s11 }
   0x6   : > { %p248_p1 = scmp.lt.s32.totalorder %s7581_s30, 3  ;;  %p7658_p2 = scmp.eq.s32.totalorder %s8064_s12, 0 }
   0x7   : > { %s7584_s15 = smov [#allocation7]   ;;  %s7585_s17 = smov [#allocation10]  }
   0x8   : > { %s8066_s13 = scalar_select %p7658_p2, 1, 0 }
   0x9   : > { %p7664_p3 = pnand %p5682_p0, %p248_p1  ;;  %s298_s16 = sshll.u32 %s7584_s15, 4  ;;  %s7670_s16 = int_to_ptr.vmem [resolvable:$true] %s298_s16 }
   0xa   : > { %s322_s18 = sshll.u32 %s7585_s17, 4  ;;  %s7586_s20 = smov [#allocation2]   ;;  %s7678_s18 = int_to_ptr.vmem [resolvable:$true] %s322_s18 }
   0xb   : > { %s8067_s14 = scalar_select %p7664_p3, 1, 0 }
   0xc   : > { %p6496_p4 = pneg %p7664_p3  ;;  %s260_s21 = sshll.u32 %s7586_s20, 4  ;;  %s7680_s21 = int_to_ptr.vmem [resolvable:$true] %s260_s21 }
   0xd   : > { %s7363_s24 = scalar_lea.hbm %s8053_s2, 256 }
   0xe   : > { %p7674_p5 = pnand %p7658_p2, %p6496_p4  ;;  %p7364_p6 = scmp.ne.s32.totalorder %s8053_s2, %s7363_s24 }
   0xf   : > { %p7370_p10 = scmp.lt.u32.totalorder %s7363_s24, %s8053_s2 }
  0x10   : > { %p7690_p7 = pneg %p7674_p5 }
  0x12   : > { %p7366_p8 = pnand %p7690_p7, %p7364_p6 }
  0x14   : > { %p7367_p9 = pneg %p7366_p8 }
  0x16   : > { %p7372_p11 = pnand %p7370_p10, %p7367_p9 }
  0x18   : > { %7375 = shalt.err (!%p7372_p11)
}
  0x19   : > { %s7376_s10 = scalar_lea.vmem %s7662_s11, 256  ;;  %p7384_p1 = scmp.lt.s32.totalorder %s7662_s11, %s7662_s11 }
  0x1a   : > { %p7377_p12 = scmp.ne.s32.totalorder %s7662_s11, %s7376_s10  ;;  %p7385_p4 = scmp.lt.s32.totalorder %s7376_s10, %s7376_s10 }
  0x1c   : > { %p7379_p13 = pnand %p7377_p12, %p7690_p7  ;;  %p7386_p6 = por %p7385_p4, %p7384_p1 }
  0x1e   : > { %p7380_p0 = pneg %p7379_p13 }
  0x20   : > { %p7387_p8 = pnand %p7386_p6, %p7380_p0 }
  0x22   : > { %7390 = shalt.err (!%p7387_p8)
}
  0x23   : > { %6502 = dma.hbm_to_vmem [thread:$0]  (!%p7674_p5), %s8053_s2, 256, %s7662_s11, [#allocation5]  }
  0x24   : > { %s7391_s23 = scalar_lea.hbm %s8055_s4, 64 }
  0x25   : > { %p7392_p9 = scmp.ne.s32.totalorder %s8055_s4, %s7391_s23  ;;  %p7398_p12 = scmp.lt.u32.totalorder %s7391_s23, %s8055_s4 }
  0x27   : > { %p7394_p10 = pnand %p7392_p9, %p7690_p7 }
  0x29   : > { %p7395_p11 = pneg %p7394_p10 }
  0x2b   : > { %p7400_p13 = pnand %p7398_p12, %p7395_p11 }
  0x2d   : > { %7403 = shalt.err (!%p7400_p13)
}
  0x2e   : > { %s7404_s11 = scalar_lea.vmem %s7670_s16, 64  ;;  %p7412_p6 = scmp.lt.s32.totalorder %s7670_s16, %s7670_s16 }
  0x2f   : > { %p7405_p0 = scmp.ne.s32.totalorder %s7670_s16, %s7404_s11  ;;  %p7413_p8 = scmp.lt.s32.totalorder %s7404_s11, %s7404_s11 }
  0x31   : > { %p7407_p1 = pnand %p7405_p0, %p7690_p7  ;;  %p7414_p9 = por %p7413_p8, %p7412_p6 }
  0x33   : > { %p7408_p4 = pneg %p7407_p1 }
  0x35   : > { %p7415_p10 = pnand %p7414_p9, %p7408_p4 }
  0x37   : > { %7418 = shalt.err (!%p7415_p10)
}
  0x38   : > { %6508 = dma.hbm_to_vmem [thread:$0]  (!%p7674_p5), %s8055_s4, 64, %s7670_s16, [#allocation8]  }
  0x39   : > { %s7419_s20 = scalar_lea.hbm %s8057_s6, 16 }
  0x3a   : > { %p7420_p11 = scmp.ne.s32.totalorder %s8057_s6, %s7419_s20  ;;  %p7426_p0 = scmp.lt.u32.totalorder %s7419_s20, %s8057_s6 }
  0x3c   : > { %p7422_p12 = pnand %p7420_p11, %p7690_p7 }
  0x3e   : > { %p7423_p13 = pneg %p7422_p12 }
  0x40   : > { %p7428_p1 = pnand %p7426_p0, %p7423_p13 }
  0x42   : > { %7431 = shalt.err (!%p7428_p1)
}
  0x43   : > { %s7432_s16 = scalar_lea.vmem %s7678_s18, 16  ;;  %s7439_s26 = scalar_lea.vmem %s7678_s18, 32 }
  0x44   : > { %p7433_p4 = scmp.ne.s32.totalorder %s7678_s18, %s7432_s16  ;;  %p7440_p9 = scmp.lt.s32.totalorder %s7678_s18, %s7678_s18 }
  0x45   : > { %p7441_p10 = scmp.lt.s32.totalorder %s7439_s26, %s7432_s16 }
  0x46   : > { %p7435_p6 = pnand %p7433_p4, %p7690_p7 }
  0x47   : > { %p7442_p11 = por %p7441_p10, %p7440_p9 }
  0x48   : > { %p7436_p8 = pneg %p7435_p6 }
  0x4a   : > { %p7443_p12 = pnand %p7442_p11, %p7436_p8 }
  0x4c   : > { %7446 = shalt.err (!%p7443_p12)
}
  0x4d   : > { %6514 = dma.hbm_to_vmem [thread:$0]  (!%p7674_p5), %s8057_s6, 16, %s7678_s18, [#allocation11]  }
  0x4e   : > { %s7447_s15 = scalar_lea.hbm %s8052_s1, 8192 }
  0x4f   : > { %p7448_p13 = scmp.ne.s32.totalorder %s8052_s1, %s7447_s15  ;;  %p7454_p4 = scmp.lt.u32.totalorder %s7447_s15, %s8052_s1 }
  0x51   : > { %p7450_p0 = pnand %p7448_p13, %p7690_p7 }
  0x53   : > { %p7451_p1 = pneg %p7450_p0 }
  0x55   : > { %p7456_p6 = pnand %p7454_p4, %p7451_p1 }
  0x57   : > { %7459 = shalt.err (!%p7456_p6)
}
  0x58   : > { %s7460_s18 = scalar_lea.vmem %s7680_s21, 8192  ;;  %p7468_p11 = scmp.lt.s32.totalorder %s7680_s21, %s7680_s21 }
  0x59   : > { %p7461_p8 = scmp.ne.s32.totalorder %s7680_s21, %s7460_s18  ;;  %p7469_p12 = scmp.lt.s32.totalorder %s7460_s18, %s7460_s18 }
  0x5b   : > { %p7463_p9 = pnand %p7461_p8, %p7690_p7  ;;  %p7470_p13 = por %p7469_p12, %p7468_p11 }
  0x5d   : > { %p7464_p10 = pneg %p7463_p9 }
  0x5f   : > { %p7471_p0 = pnand %p7470_p13, %p7464_p10 }
  0x61   : > { %7474 = shalt.err (!%p7471_p0)
}
  0x62   : > { %s7587_s24 = smov 1024   ;;  %s8065_s25 = smov 64  }
  0x63   : > { %6499 = dma.hbm_to_vmem [thread:$0]  (!%p7674_p5), %s8052_s1, 8192, %s7680_s21, [#allocation3], %s7587_s24, %s7587_s24, %s8065_s25  }
  0x64   : > { %s7589_s28 = smov [#allocation6]   ;;  %s7475_s15 = scalar_lea.hbm %s8054_s3, 65536 }
  0x65   : > { %s284_s11 = sshll.u32 %s7589_s28, 4  ;;  %p7476_p1 = scmp.ne.s32.totalorder %s8054_s3, %s7475_s15  ;;  %s285_s11 = int_to_ptr.vmem [resolvable:$true] %s284_s11 }
  0x66   : > { %p7482_p8 = scmp.lt.u32.totalorder %s7475_s15, %s8054_s3 }
  0x67   : > { %p7478_p4 = pnand %p7476_p1, %p7690_p7 }
  0x69   : > { %p7479_p6 = pneg %p7478_p4 }
  0x6b   : > { %p7484_p9 = pnand %p7482_p8, %p7479_p6 }
  0x6d   : > { %7487 = shalt.err (!%p7484_p9)
}
  0x6e   : > { %s7488_s21 = scalar_lea.vmem %s285_s11, 65536  ;;  %p7496_p13 = scmp.lt.s32.totalorder %s285_s11, %s285_s11 }
  0x6f   : > { %p7489_p10 = scmp.ne.s32.totalorder %s285_s11, %s7488_s21  ;;  %p7497_p0 = scmp.lt.s32.totalorder %s7488_s21, %s7488_s21 }
  0x71   : > { %p7491_p11 = pnand %p7489_p10, %p7690_p7  ;;  %p7498_p2 = por %p7497_p0, %p7496_p13 }
  0x73   : > { %p7492_p12 = pneg %p7491_p11 }
  0x75   : > { %p7499_p3 = pnand %p7498_p2, %p7492_p12 }
  0x77   : > { %7502 = shalt.err (!%p7499_p3)
}
  0x78   : > { %s7590_s18 = smov 256   ;;  %s7591_s24 = smov 16  }
  0x79   : > { %6505 = dma.hbm_to_vmem [thread:$0]  (!%p7674_p5), %s8054_s3, 65536, %s285_s11, [#allocation5], %s7590_s18, %s7590_s18, %s7591_s24  }
  0x7a   : > { %s7592_s28 = smov [#allocation9]   ;;  %s7593_s10 = smov [#allocation12]  }
  0x7b   : > { %s308_s29 = sshll.u32 %s7592_s28, 4  ;;  %s336_s15 = sshll.u32 %s7593_s10, 4  ;;  %s309_s29 = int_to_ptr.vmem [resolvable:$true] %s308_s29  ;;  %s337_s15 = int_to_ptr.vmem [resolvable:$true] %s336_s15 }
  0x7c   : > { %s7503_s22 = scalar_lea.hbm %s8056_s5, 4096 }
  0x7d   : > { %p7504_p2 = scmp.ne.s32.totalorder %s8056_s5, %s7503_s22  ;;  %p7510_p4 = scmp.lt.u32.totalorder %s7503_s22, %s8056_s5 }
  0x7f   : > { %p7506_p3 = pnand %p7504_p2, %p7690_p7 }
  0x81   : > { %p7507_p1 = pneg %p7506_p3 }
  0x83   : > { %p7512_p6 = pnand %p7510_p4, %p7507_p1 }
  0x85   : > { %7515 = shalt.err (!%p7512_p6)
}
  0x86   : > { %s7516_s11 = scalar_lea.vmem %s309_s29, 4096  ;;  %p7524_p11 = scmp.lt.s32.totalorder %s309_s29, %s309_s29 }
  0x87   : > { %p7517_p8 = scmp.ne.s32.totalorder %s309_s29, %s7516_s11  ;;  %p7525_p12 = scmp.lt.s32.totalorder %s7516_s11, %s7516_s11 }
  0x89   : > { %p7519_p9 = pnand %p7517_p8, %p7690_p7  ;;  %p7526_p13 = por %p7525_p12, %p7524_p11 }
  0x8b   : > { %p7520_p10 = pneg %p7519_p9 }
  0x8d   : > { %p7527_p0 = pnand %p7526_p13, %p7520_p10 }
  0x8f   : > { %7530 = shalt.err (!%p7527_p0)
}
  0x90   : > { %s7594_s18 = smov 4   ;;  %s8070_s24 = smov 64  }
  0x91   : > { %6511 = dma.hbm_to_vmem [thread:$0]  (!%p7674_p5), %s8056_s5, 4096, %s309_s29, [#allocation8], %s8070_s24, %s8070_s24, %s7594_s18  }
  0x92   : > { %s7531_s28 = scalar_lea.hbm %s8059_s8, 16 }
  0x93   : > { %p7532_p2 = scmp.ne.s32.totalorder %s8059_s8, %s7531_s28  ;;  %p7538_p4 = scmp.lt.u32.totalorder %s7531_s28, %s8059_s8 }
  0x95   : > { %p7534_p3 = pnand %p7532_p2, %p7690_p7 }
  0x97   : > { %p7535_p1 = pneg %p7534_p3 }
  0x99   : > { %p7540_p6 = pnand %p7538_p4, %p7535_p1 }
  0x9b   : > { %7543 = shalt.err (!%p7540_p6)
}
  0x9c   : > { %s7544_s23 = scalar_lea.vmem %s337_s15, 16  ;;  %s7551_s29 = scalar_lea.vmem %s337_s15, 32 }
  0x9d   : > { %p7545_p8 = scmp.ne.s32.totalorder %s337_s15, %s7544_s23  ;;  %p7552_p11 = scmp.lt.s32.totalorder %s337_s15, %s337_s15 }
  0x9e   : > { %p7553_p12 = scmp.lt.s32.totalorder %s7551_s29, %s7544_s23 }
  0x9f   : > { %p7547_p9 = pnand %p7545_p8, %p7690_p7 }
  0xa0   : > { %p7554_p13 = por %p7553_p12, %p7552_p11 }
  0xa1   : > { %p7548_p10 = pneg %p7547_p9 }
  0xa3   : > { %p7555_p0 = pnand %p7554_p13, %p7548_p10 }
  0xa5   : > { %7558 = shalt.err (!%p7555_p0)
}
  0xa6   : > { %6517 = dma.hbm_to_vmem [thread:$0]  (!%p7674_p5), %s8059_s8, 16, %s337_s15, [#allocation11]  }
  0xa7   : > { %p8071_p2 = scmp.ne.s32.totalorder %s8067_s14, 0 }
  0xa8   : > { %p8072_p3 = scmp.ne.s32.totalorder (!%p8071_p2), %s8066_s13, 0 }
  0xa9   : > { %358 = sbr.rel (%p8071_p2) target bundleno = 1537 (0x601), region = 56 }
  0xb0   : > { %7564 = dma.done.wait (%p8072_p3), [#allocation3], 8192  }
  0xb1   : > { %7566 = vsyncadd (%p8072_p3), [#allocation3], 4294959104 }
  0xb2   : > { %7568 = dma.done.wait (%p8072_p3), [#allocation5], 65792  }
  0xb3   : > { %7570 = vsyncadd (%p8072_p3), [#allocation5], 4294901504 }
  0xb4   : > { %7572 = dma.done.wait (%p8072_p3), [#allocation8], 4160  }
  0xb5   : > { %7574 = vsyncadd (%p8072_p3), [#allocation8], 4294963136 }
  0xb6   : > { %7576 = dma.done.wait (%p8072_p3), [#allocation11], 32  }
  0xb7   : > { %7578 = vsyncadd (%p8072_p3), [#allocation11], 4294967264  ;;  %v7595_v0 = vmov 0   ;;  %s8073_s14 = sadd.s32 4294967295, %s7581_s30   ;;  %v434_v1 = vld [vmem:[#allocation2] sm:$0xff]  ;;  %v436_v14 = vld [vmem:[#allocation2 + $0x10] sm:$0xff] }
  0xb8   : > { %938 = vmatprep.mubr.bf16.mxu1 %v7595_v0  ;;  %s5699_s19 = sshll.u32 %s8073_s14, 1  ;;  %1024 = vmatprep.mubr.bf16.mxu0 %v7595_v0  ;;  %v442_v2 = vld [vmem:[#allocation2 + $0x40] sm:$0xff]  ;;  %v444_v15 = vld [vmem:[#allocation2 + $0x50] sm:$0xff]  ;;  %v435_v25 = vld [vmem:[#allocation2 + $0x8] sm:$0xff]  ;;  %vm902_vm0 = vcmask 523264   ;;  %vm7597_vm1 = vmmov 0  }
  0xb9   : > { %p419_p5 = scmp.lt.s32.totalorder %s5699_s19, 3  ;;  %v450_v3 = vld [vmem:[#allocation2 + $0x80] sm:$0xff]  ;;  %v5704_v4 = vcombine.high %v434_v1, %v442_v2  ;;  %v5703_v5 = vcombine.low %v434_v1, %v442_v2  ;;  %v5708_v16 = vcombine.high %v436_v14, %v444_v15  ;;  %v5707_v17 = vcombine.low %v436_v14, %v444_v15  ;;  %v452_v18 = vld [vmem:[#allocation2 + $0x90] sm:$0xff]  ;;  %v443_v26 = vld [vmem:[#allocation2 + $0x48] sm:$0xff] }
  0xba   : > { %v458_v6 = vld [vmem:[#allocation2 + $0xc0] sm:$0xff]  ;;  %v460_v19 = vld [vmem:[#allocation2 + $0xd0] sm:$0xff]  ;;  %v5706_v34 = vcombine.high %v435_v25, %v443_v26  ;;  %v451_v35 = vld [vmem:[#allocation2 + $0x88] sm:$0xff]  ;;  %v5705_v40 = vcombine.low %v435_v25, %v443_v26  ;;  %vm5552_vm2 = vcmask 130048  }
  0xbb   : > { %s8075_s19 = smov (!%p419_p5, %s5699_s19), 3  ;;  %v5720_v7 = vcombine.high %v450_v3, %v458_v6  ;;  %v466_v8 = vld [vmem:[#allocation2 + $0x100] sm:$0xff]  ;;  %906 = vmatprep.subr.bf16.mxu1 %v5704_v4  ;;  %v5719_v10 = vcombine.low %v450_v3, %v458_v6  ;;  %v5724_v21 = vcombine.high %v452_v18, %v460_v19  ;;  %v468_v22 = vld [vmem:[#allocation2 + $0x110] sm:$0xff]  ;;  %992 = vmatprep.subr.bf16.mxu0 %v5708_v16  ;;  %v459_v36 = vld [vmem:[#allocation2 + $0xc8] sm:$0xff] }
  0xbc   : > { %v474_v9 = vld [vmem:[#allocation2 + $0x140] sm:$0xff]  ;;  %907 = vmatpush1.bf16.msra.mxu1 %v5703_v5  ;;  %s5700_s13 = sshll.u32 %s8075_s19, 3  ;;  %v476_v24 = vld [vmem:[#allocation2 + $0x150] sm:$0xff]  ;;  %993 = vmatpush1.bf16.msra.mxu0 %v5707_v17  ;;  %v5723_v27 = vcombine.low %v452_v18, %v460_v19  ;;  %v5722_v43 = vcombine.high %v451_v35, %v459_v36  ;;  %v467_v44 = vld [vmem:[#allocation2 + $0x108] sm:$0xff]  ;;  %v5721_v48 = vcombine.low %v451_v35, %v459_v36 }
  0xbd   : > { %908 = vmatprep.subr.bf16.mxu1 %v5720_v7  ;;  %v5736_v11 = vcombine.high %v466_v8, %v474_v9  ;;  %v482_v12 = vld [vmem:[#allocation2 + $0x180] sm:$0xff]  ;;  %v5735_v20 = vcombine.low %v466_v8, %v474_v9  ;;  %s422_s18 = scalar_lea.vmem %s8051_s0, %s5700_s13  ;;  %994 = vmatprep.subr.bf16.mxu0 %v5724_v21  ;;  %v5740_v29 = vcombine.high %v468_v22, %v476_v24  ;;  %v484_v32 = vld [vmem:[#allocation2 + $0x190] sm:$0xff]  ;;  %v475_v45 = vld [vmem:[#allocation2 + $0x148] sm:$0xff]  ;;  %s428_s24 = scalar_lea.vmem %s8060_s9, %s5700_s13 }
  0xbe   : > { %v490_v13 = vld [vmem:[#allocation2 + $0x1c0] sm:$0xff]  ;;  %v432_v31 = vld [vmem:[%s422_s18 + $0x8] sm:$0xff]  ;;  %v492_v33 = vld [vmem:[#allocation2 + $0x1d0] sm:$0xff]  ;;  %v5739_v37 = vcombine.low %v468_v22, %v476_v24  ;;  %v5738_v51 = vcombine.high %v467_v44, %v475_v45  ;;  %v5737_v56 = vcombine.low %v467_v44, %v475_v45 }
  0xbf   : > { %v5752_v23 = vcombine.high %v482_v12, %v490_v13  ;;  %v431_v28 = vld [vmem:[%s422_s18] sm:$0xff]  ;;  %v5751_v30 = vcombine.low %v482_v12, %v490_v13  ;;  %v5756_v39 = vcombine.high %v484_v32, %v492_v33  ;;  %v5755_v46 = vcombine.low %v484_v32, %v492_v33  ;;  %v483_v52 = vld [vmem:[#allocation2 + $0x188] sm:$0xff]  ;;  %v437_v60 = vld [vmem:[#allocation2 + $0x18] sm:$0xff] }
  0xc0   : > { %909 = vmatpush1.bf16.msra.mxu1 %v5719_v10  ;;  %995 = vmatpush1.bf16.msra.mxu0 %v5723_v27  ;;  %v7868_v38 = vpack.c.bf16 %v432_v31, %v431_v28  ;;  %v438_v41 = vld [vmem:[#allocation2 + $0x20] sm:$0xff]  ;;  %v491_v53 = vld [vmem:[#allocation2 + $0x1c8] sm:$0xff]  ;;  %v445_v61 = vld [vmem:[#allocation2 + $0x58] sm:$0xff] }
  0xc1   : > { %910 = vmatprep.subr.bf16.mxu1 %v5736_v11  ;;  %996 = vmatprep.subr.bf16.mxu0 %v5740_v29  ;;  %v446_v42 = vld [vmem:[#allocation2 + $0x60] sm:$0xff]  ;;  %v5754_v59 = vcombine.high %v483_v52, %v491_v53  ;;  %v5753_v1 = vcombine.low %v483_v52, %v491_v53  ;;  %v5710_v4 = vcombine.high %v437_v60, %v445_v61  ;;  %v453_v5 = vld [vmem:[#allocation2 + $0x98] sm:$0xff]  ;;  %v440_v10 = vld [vmem:[#allocation2 + $0x30] sm:$0xff] }
  0xc2   : > { %v5712_v47 = vcombine.high %v438_v41, %v446_v42  ;;  %v454_v49 = vld [vmem:[#allocation2 + $0xa0] sm:$0xff]  ;;  %v5711_v54 = vcombine.low %v438_v41, %v446_v42  ;;  %v461_v6 = vld [vmem:[#allocation2 + $0xd8] sm:$0xff]  ;;  %v5709_v9 = vcombine.low %v437_v60, %v445_v61  ;;  %v448_v11 = vld [vmem:[#allocation2 + $0x70] sm:$0xff] }
  0xc3   : > { %v462_v50 = vld [vmem:[#allocation2 + $0xe0] sm:$0xff]  ;;  %v5726_v12 = vcombine.high %v453_v5, %v461_v6  ;;  %v469_v13 = vld [vmem:[#allocation2 + $0x118] sm:$0xff]  ;;  %v5716_v16 = vcombine.high %v440_v10, %v448_v11  ;;  %v5725_v17 = vcombine.low %v453_v5, %v461_v6  ;;  %v456_v18 = vld [vmem:[#allocation2 + $0xb0] sm:$0xff] }
  0xc4   : > { %911 = vmatpush1.bf16.msra.mxu1 %v5735_v20  ;;  %997 = vmatpush1.bf16.msra.mxu0 %v5739_v37  ;;  %v5728_v55 = vcombine.high %v454_v49, %v462_v50  ;;  %v470_v57 = vld [vmem:[#allocation2 + $0x120] sm:$0xff]  ;;  %v5727_v62 = vcombine.low %v454_v49, %v462_v50  ;;  %v477_v14 = vld [vmem:[#allocation2 + $0x158] sm:$0xff]  ;;  %v464_v19 = vld [vmem:[#allocation2 + $0xf0] sm:$0xff] }
  0xc5   : > { %912 = vmatprep.subr.bf16.mxu1 %v5752_v23  ;;  %998 = vmatprep.subr.bf16.mxu0 %v5756_v39  ;;  %v478_v58 = vld [vmem:[#allocation2 + $0x160] sm:$0xff]  ;;  %v5742_v20 = vcombine.high %v469_v13, %v477_v14  ;;  %v485_v21 = vld [vmem:[#allocation2 + $0x198] sm:$0xff]  ;;  %v5715_v23 = vcombine.low %v440_v10, %v448_v11  ;;  %v5732_v24 = vcombine.high %v456_v18, %v464_v19  ;;  %v472_v26 = vld [vmem:[#allocation2 + $0x130] sm:$0xff] }
  0xc6   : > { %v5744_v63 = vcombine.high %v470_v57, %v478_v58  ;;  %v486_v2 = vld [vmem:[#allocation2 + $0x1a0] sm:$0xff]  ;;  %v5743_v7 = vcombine.low %v470_v57, %v478_v58  ;;  %v493_v22 = vld [vmem:[#allocation2 + $0x1d8] sm:$0xff]  ;;  %v5741_v25 = vcombine.low %v469_v13, %v477_v14  ;;  %v480_v27 = vld [vmem:[#allocation2 + $0x170] sm:$0xff]  ;;  %v5731_v31 = vcombine.low %v456_v18, %v464_v19 }
  0xc7   : > { %v494_v3 = vld [vmem:[#allocation2 + $0x1e0] sm:$0xff]  ;;  %v5758_v28 = vcombine.high %v485_v21, %v493_v22  ;;  %v439_v29 = vld [vmem:[#allocation2 + $0x28] sm:$0xff]  ;;  %v5748_v32 = vcombine.high %v472_v26, %v480_v27  ;;  %v5757_v33 = vcombine.low %v485_v21, %v493_v22  ;;  %v496_v35 = vld [vmem:[#allocation2 + $0x1f0] sm:$0xff] }
  0xc8   : > { %913 = vmatpush1.bf16.msra.mxu1 %v5751_v30  ;;  %999 = vmatpush1.bf16.msra.mxu0 %v5755_v46  ;;  %v5760_v8 = vcombine.high %v486_v2, %v494_v3  ;;  %v5759_v15 = vcombine.low %v486_v2, %v494_v3  ;;  %v447_v30 = vld [vmem:[#allocation2 + $0x68] sm:$0xff]  ;;  %v6555_v52 = vld [vmem:[#allocation6] ss:$16 sps:$4 sm:$0xff]   ;;  %v6563_v53 = vld [vmem:[#allocation6 + $0x24] ss:$16 sps:$4 sm:$0xff]  }
  0xc9   : > { %949 = vmatprep.subr.bf16.mxu1 %v5706_v34  ;;  %1078 = vmatprep.subr.bf16.mxu0 %v5712_v47  ;;  %v488_v34 = vld [vmem:[#allocation2 + $0x1b0] sm:$0xff]  ;;  %v5714_v36 = vcombine.high %v439_v29, %v447_v30  ;;  %v455_v37 = vld [vmem:[#allocation2 + $0xa8] sm:$0xff]  ;;  %v5713_v42 = vcombine.low %v439_v29, %v447_v30  ;;  %v449_v57 = vld [vmem:[#allocation2 + $0x78] sm:$0xff] }
  0xca   : > { %v463_v39 = vld [vmem:[#allocation2 + $0xe8] sm:$0xff]  ;;  %v5764_v41 = vcombine.high %v488_v34, %v496_v35  ;;  %v5763_v46 = vcombine.low %v488_v34, %v496_v35  ;;  %v6557_v47 = vld [vmem:[#allocation6 + $0x4] ss:$16 sps:$4 sm:$0xff]   ;;  %v6561_v58 = vld [vmem:[#allocation6 + $0x20] ss:$16 sps:$4 sm:$0xff]  }
  0xcb   : > { %5767 = vmatmul.mubr.msk.bf16.vlgmr.msra.gmra.mrb[0].mxu1 %vm902_vm0, %v7868_v38  ;;  %5769 = vmatmul.mubr.msk.bf16.vlgmr.msra.gmra.mrb[0].mxu0 %vm902_vm0, %v7868_v38  ;;  %v471_v44 = vld [vmem:[#allocation2 + $0x128] sm:$0xff]  ;;  %v457_v61 = vld [vmem:[#allocation2 + $0xb8] sm:$0xff]  ;;  %v6575_v2 = vld [vmem:[#allocation6 + $0x64] ss:$16 sps:$4 sm:$0xff]  }
  0xcc   : > { %950 = vmatpush1.bf16.msra.mxu1 %v5705_v40  ;;  %981 = vmatprep.mubr.bf16.mxu1 %v7595_v0  ;;  %v5747_v40 = vcombine.low %v472_v26, %v480_v27  ;;  %v479_v45 = vld [vmem:[#allocation2 + $0x168] sm:$0xff]  ;;  %v481_v5 = vld [vmem:[#allocation2 + $0x178] sm:$0xff]  ;;  %v6573_v6 = vld [vmem:[#allocation6 + $0x60] ss:$16 sps:$4 sm:$0xff]  }
  0xcd   : > { %951 = vmatprep.subr.bf16.mxu1 %v5722_v43  ;;  %1079 = vmatpush1.bf16.msra.mxu0 %v5711_v54  ;;  %v5730_v43 = vcombine.high %v455_v37, %v463_v39  ;;  %v5746_v49 = vcombine.high %v471_v44, %v479_v45  ;;  %v487_v50 = vld [vmem:[#allocation2 + $0x1a8] sm:$0xff]  ;;  %v5745_v54 = vcombine.low %v471_v44, %v479_v45  ;;  %v489_v10 = vld [vmem:[#allocation2 + $0x1b8] sm:$0xff]  ;;  %v6587_v14 = vld [vmem:[#allocation6 + $0xa4] ss:$16 sps:$4 sm:$0xff]  }
  0xce   : > { %1110 = vmatprep.mubr.bf16.mxu0 %v7595_v0  ;;  %1080 = vmatprep.subr.bf16.mxu0 %v5728_v55  ;;  %v497_v11 = vld [vmem:[#allocation2 + $0x1f8] sm:$0xff]  ;;  %v6593_v18 = vld [vmem:[#allocation6 + $0xc4] ss:$16 sps:$4 sm:$0xff]   ;;  %v6591_v21 = vld [vmem:[#allocation6 + $0xc0] ss:$16 sps:$4 sm:$0xff]  }
  0xcf   : > { %v6560_v19 = vld [vmem:[#allocation6 + $0xc] ss:$16 sps:$4 sm:$0xff]   ;;  %v6558_v22 = vld [vmem:[#allocation6 + $0x8] ss:$16 sps:$4 sm:$0xff]   ;;  %v6611_v29 = vld [vmem:[#allocation6 + $0x124] ss:$16 sps:$4 sm:$0xff]  }
  0xd0   : > { %952 = vmatpush1.bf16.msra.mxu1 %v5721_v48  ;;  %v5729_v48 = vcombine.low %v455_v37, %v463_v39  ;;  %v6564_v26 = vld [vmem:[#allocation6 + $0x28] ss:$16 sps:$4 sm:$0xff]   ;;  %v6572_v27 = vld [vmem:[#allocation6 + $0x4c] ss:$16 sps:$4 sm:$0xff]   ;;  %v6627_v45 = vld [vmem:[#allocation6 + $0x180] ss:$16 sps:$4 sm:$0xff]  }
  0xd1   : > { %953 = vmatprep.subr.bf16.mxu1 %v5738_v51  ;;  %1081 = vmatpush1.bf16.msra.mxu0 %v5727_v62  ;;  %v495_v51 = vld [vmem:[#allocation2 + $0x1e8] sm:$0xff]  ;;  %v465_v62 = vld [vmem:[#allocation2 + $0xf8] sm:$0xff] }
  0xd2   : > { %1082 = vmatprep.subr.bf16.mxu0 %v5744_v63  ;;  %v5762_v55 = vcombine.high %v487_v50, %v495_v51  ;;  %v5761_v60 = vcombine.low %v487_v50, %v495_v51  ;;  %v6567_v63 = vld [vmem:[#allocation6 + $0x40] ss:$16 sps:$4 sm:$0xff]   ;;  %v6570_v30 = vld [vmem:[#allocation6 + $0x48] ss:$16 sps:$4 sm:$0xff]   ;;  %v6584_v35 = vld [vmem:[#allocation6 + $0x8c] ss:$16 sps:$4 sm:$0xff]  }
  0xd3   : > { %v6576_v34 = vld [vmem:[#allocation6 + $0x68] ss:$16 sps:$4 sm:$0xff]   ;;  %v6590_v39 = vld [vmem:[#allocation6 + $0xac] ss:$16 sps:$4 sm:$0xff]   ;;  %v6641_v51 = vld [vmem:[#allocation6 + $0x1c4] ss:$16 sps:$4 sm:$0xff]  }
  0xd4   : > { %954 = vmatpush1.bf16.msra.mxu1 %v5737_v56  ;;  %v441_v56 = vld [vmem:[#allocation2 + $0x38] sm:$0xff] }
  0xd5   : > { %955 = vmatprep.subr.bf16.mxu1 %v5754_v59  ;;  %1083 = vmatpush1.bf16.msra.mxu0 %v5743_v7  ;;  %v6569_v59 = vld [vmem:[#allocation6 + $0x44] ss:$16 sps:$4 sm:$0xff]   ;;  %v5717_v3 = vcombine.low %v441_v56, %v449_v57  ;;  %v5734_v7 = vcombine.high %v457_v61, %v465_v62  ;;  %v6582_v37 = vld [vmem:[#allocation6 + $0x88] ss:$16 sps:$4 sm:$0xff]   ;;  %v6608_v50 = vld [vmem:[#allocation6 + $0x10c] ss:$16 sps:$4 sm:$0xff]  }
  0xd6   : > { %1084 = vmatprep.subr.bf16.mxu0 %v5760_v8  ;;  %v6581_v8 = vld [vmem:[#allocation6 + $0x84] ss:$16 sps:$4 sm:$0xff]   ;;  %v6594_v44 = vld [vmem:[#allocation6 + $0xc8] ss:$16 sps:$4 sm:$0xff]  }
  0xd8   : > { %956 = vmatpush1.bf16.msra.mxu1 %v5753_v1  ;;  %v5718_v1 = vcombine.high %v441_v56, %v449_v57  ;;  %v6612_v56 = vld [vmem:[#allocation6 + $0x128] ss:$16 sps:$4 sm:$0xff]   ;;  %v6645_v57 = vld [vmem:[#allocation6 + $0x1e0] ss:$16 sps:$4 sm:$0xff]  }
  0xd9   : > { %1035 = vmatprep.subr.bf16.mxu1 %v5710_v4  ;;  %1085 = vmatpush1.bf16.msra.mxu0 %v5759_v15  ;;  %v473_v4 = vld [vmem:[#allocation2 + $0x138] sm:$0xff] }
  0xda   : > { %1164 = vmatprep.subr.bf16.mxu0 %v5716_v16  ;;  %v5750_v13 = vcombine.high %v473_v4, %v481_v5  ;;  %v5749_v15 = vcombine.low %v473_v4, %v481_v5  ;;  %v6585_v16 = vld [vmem:[#allocation6 + $0xa0] ss:$16 sps:$4 sm:$0xff]   ;;  %v6644_v4 = vld [vmem:[#allocation6 + $0x1cc] ss:$16 sps:$4 sm:$0xff]   ;;  %v6642_v5 = vld [vmem:[#allocation6 + $0x1c8] ss:$16 sps:$4 sm:$0xff]  }
  0xdb   : > { %5768 = vmatmul.mubr.msk.bf16.vlgmr.msra.gmra.mrb[4].mxu1 %vm902_vm0, %v7868_v38 }
  0xdc   : > { %1036 = vmatpush1.bf16.msra.mxu1 %v5709_v9  ;;  %1067 = vmatprep.mubr.bf16.mxu1 %v7595_v0  ;;  %v5733_v9 = vcombine.low %v457_v61, %v465_v62  ;;  %v6626_v61 = vld [vmem:[#allocation6 + $0x16c] ss:$16 sps:$4 sm:$0xff]   ;;  %v6624_v62 = vld [vmem:[#allocation6 + $0x168] ss:$16 sps:$4 sm:$0xff]  }
  0xdd   : > { %1037 = vmatprep.subr.bf16.mxu1 %v5726_v12  ;;  %5771 = vmatmul.mubr.msk.bf16.vlgmr.msra.gmra.mrb[4].mxu0 %vm902_vm0, %v7868_v38  ;;  %v6579_v12 = vld [vmem:[#allocation6 + $0x80] ss:$16 sps:$4 sm:$0xff]  }
  0xde   : > { %1165 = vmatpush1.bf16.msra.mxu0 %v5715_v23  ;;  %1196 = vmatprep.mubr.bf16.mxu0 %v7595_v0  ;;  %v6566_v23 = vld [vmem:[#allocation6 + $0x2c] ss:$16 sps:$4 sm:$0xff]  }
  0xdf   : > { %1166 = vmatprep.subr.bf16.mxu0 %v5732_v24  ;;  %v6597_v24 = vld [vmem:[#allocation6 + $0xe0] ss:$16 sps:$4 sm:$0xff]  }
  0xe0   : > { %1038 = vmatpush1.bf16.msra.mxu1 %v5725_v17  ;;  %v5766_v17 = vcombine.high %v489_v10, %v497_v11 }
  0xe1   : > { %1039 = vmatprep.subr.bf16.mxu1 %v5742_v20  ;;  %v5765_v20 = vcombine.low %v489_v10, %v497_v11  ;;  %v7894_v11 = vld [vmem:[#allocation4] sm:$0xff] }
  0xe2   : > { %1167 = vmatpush1.bf16.msra.mxu0 %v5731_v31  ;;  %v6578_v31 = vld [vmem:[#allocation6 + $0x6c] ss:$16 sps:$4 sm:$0xff]  }
  0xe3   : > { %1168 = vmatprep.subr.bf16.mxu0 %v5748_v32  ;;  %v6609_v32 = vld [vmem:[#allocation6 + $0x120] ss:$16 sps:$4 sm:$0xff]  }
  0xe4   : > { %1040 = vmatpush1.bf16.msra.mxu1 %v5741_v25  ;;  %v6605_v25 = vld [vmem:[#allocation6 + $0x104] ss:$16 sps:$4 sm:$0xff]  }
  0xe5   : > { %1041 = vmatprep.subr.bf16.mxu1 %v5758_v28  ;;  %v6603_v28 = vld [vmem:[#allocation6 + $0x100] ss:$16 sps:$4 sm:$0xff]  }
  0xe6   : > { %1169 = vmatpush1.bf16.msra.mxu0 %v5747_v40  ;;  %v6621_v40 = vld [vmem:[#allocation6 + $0x160] ss:$16 sps:$4 sm:$0xff]  }
  0xe7   : > { %1170 = vmatprep.subr.bf16.mxu0 %v5764_v41  ;;  %v6629_v41 = vld [vmem:[#allocation6 + $0x184] ss:$16 sps:$4 sm:$0xff]  }
  0xe8   : > { %1042 = vmatpush1.bf16.msra.mxu1 %v5757_v33  ;;  %v6617_v33 = vld [vmem:[#allocation6 + $0x144] ss:$16 sps:$4 sm:$0xff]  }
  0xe9   : > { %1121 = vmatprep.subr.bf16.mxu1 %v5714_v36  ;;  %v6623_v36 = vld [vmem:[#allocation6 + $0x164] ss:$16 sps:$4 sm:$0xff]  }
  0xea   : > { %1171 = vmatpush1.bf16.msra.mxu0 %v5763_v46  ;;  %v6602_v46 = vld [vmem:[#allocation6 + $0xec] ss:$16 sps:$4 sm:$0xff]  }
  0xeb   : > { %5770 = vmatmul.mubr.msk.bf16.vlgmr.msra.gmra.mrb[8].mxu1 %vm902_vm0, %v7868_v38  ;;  %4392 = vmatprep.subr.bf16.mxu0 %v6557_v47  ;;  %v6635_v47 = vld [vmem:[#allocation6 + $0x1a4] ss:$16 sps:$4 sm:$0xff]  }
  0xec   : > { %1122 = vmatpush1.bf16.msra.mxu1 %v5713_v42  ;;  %1153 = vmatprep.mubr.bf16.mxu1 %v7595_v0  ;;  %v6588_v42 = vld [vmem:[#allocation6 + $0xa8] ss:$16 sps:$4 sm:$0xff]  }
  0xed   : > { %1123 = vmatprep.subr.bf16.mxu1 %v5730_v43  ;;  %5773 = vmatmul.mubr.msk.bf16.vlgmr.msra.gmra.mrb[8].mxu0 %vm902_vm0, %v7868_v38  ;;  %v6596_v43 = vld [vmem:[#allocation6 + $0xcc] ss:$16 sps:$4 sm:$0xff]  }
  0xee   : > { %4393 = vmatpush1.bf16.msra.mxu0 %v6555_v52  ;;  %v6606_v52 = vld [vmem:[#allocation6 + $0x108] ss:$16 sps:$4 sm:$0xff]  }
  0xef   : > { %4394 = vmatprep.subr.bf16.mxu0 %v6563_v53  ;;  %v6639_v53 = vld [vmem:[#allocation6 + $0x1c0] ss:$16 sps:$4 sm:$0xff]  }
  0xf0   : > { %1124 = vmatpush1.bf16.msra.mxu1 %v5729_v48  ;;  %v6600_v48 = vld [vmem:[#allocation6 + $0xe8] ss:$16 sps:$4 sm:$0xff]  }
  0xf1   : > { %1125 = vmatprep.subr.bf16.mxu1 %v5746_v49  ;;  %v6633_v49 = vld [vmem:[#allocation6 + $0x1a0] ss:$16 sps:$4 sm:$0xff]  }
  0xf2   : > { %4395 = vmatpush1.bf16.msra.mxu0 %v6561_v58  ;;  %v6620_v58 = vld [vmem:[#allocation6 + $0x14c] ss:$16 sps:$4 sm:$0xff]  }
  0xf3   : > { %4396 = vmatprep.subr.bf16.mxu0 %v6569_v59  ;;  %v6653_v59 = vld [vmem:[#allocation6 + $0x204] ss:$16 sps:$4 sm:$0xff]  }
  0xf4   : > { %1126 = vmatpush1.bf16.msra.mxu1 %v5745_v54  ;;  %v6614_v54 = vld [vmem:[#allocation6 + $0x12c] ss:$16 sps:$4 sm:$0xff]  }
  0xf5   : > { %1127 = vmatprep.subr.bf16.mxu1 %v5762_v55  ;;  %v6647_v55 = vld [vmem:[#allocation6 + $0x1e4] ss:$16 sps:$4 sm:$0xff]  }
  0xf6   : > { %4397 = vmatpush1.bf16.msra.mxu0 %v6567_v63  ;;  %v6632_v63 = vld [vmem:[#allocation6 + $0x18c] ss:$16 sps:$4 sm:$0xff]  }
  0xf7   : > { %4398 = vmatprep.subr.bf16.mxu0 %v6575_v2  ;;  %v6638_v2 = vld [vmem:[#allocation6 + $0x1ac] ss:$16 sps:$4 sm:$0xff]  }
  0xf8   : > { %1128 = vmatpush1.bf16.msra.mxu1 %v5761_v60  ;;  %v6618_v60 = vld [vmem:[#allocation6 + $0x148] ss:$16 sps:$4 sm:$0xff]  }
  0xf9   : > { %1207 = vmatprep.subr.bf16.mxu1 %v5718_v1  ;;  %v6630_v1 = vld [vmem:[#allocation6 + $0x188] ss:$16 sps:$4 sm:$0xff]  }
  0xfa   : > { %4399 = vmatpush1.bf16.msra.mxu0 %v6573_v6  ;;  %v6650_v6 = vld [vmem:[#allocation6 + $0x1ec] ss:$16 sps:$4 sm:$0xff]  }
  0xfb   : > { %5772 = vmatmul.mubr.msk.bf16.vlgmr.msra.gmra.mrb[12].mxu1 %vm902_vm0, %v7868_v38  ;;  %4400 = vmatprep.subr.bf16.mxu0 %v6581_v8  ;;  %v6656_v8 = vld [vmem:[#allocation6 + $0x20c] ss:$16 sps:$4 sm:$0xff]  }
  0xfc   : > { %1208 = vmatpush1.bf16.msra.mxu1 %v5717_v3  ;;  %1239 = vmatprep.mubr.bf16.mxu1 %v7595_v0  ;;  %v6599_v0 = vld [vmem:[#allocation6 + $0xe4] ss:$16 sps:$4 sm:$0xff]   ;;  %v6636_v3 = vld [vmem:[#allocation6 + $0x1a8] ss:$16 sps:$4 sm:$0xff]  }
  0xfd   : > { %1209 = vmatprep.subr.bf16.mxu1 %v5734_v7  ;;  %v6648_v7 = vld [vmem:[#allocation6 + $0x1e8] ss:$16 sps:$4 sm:$0xff]  }
  0xfe   : > { %4401 = vmatpush1.bf16.msra.mxu0 %v6579_v12 }
  0xff   : > { %4402 = vmatprep.subr.bf16.mxu0 %v6587_v14 }
 0x100   : > { %1210 = vmatpush1.bf16.msra.mxu1 %v5733_v9  ;;  %v502_v9 = vlaneseq }
 0x101   : > { %1211 = vmatprep.subr.bf16.mxu1 %v5750_v13 }
 0x102   : > { %4403 = vmatpush1.bf16.msra.mxu0 %v6585_v16  ;;  %v7892_v10 = vshrl.u32 %v502_v9, 7 }
 0x103   : > { %4404 = vmatprep.subr.bf16.mxu0 %v6593_v18 }
 0x104   : > { %1212 = vmatpush1.bf16.msra.mxu1 %v5749_v15  ;;  %v7897_v12 = vsub.s32 0, %v7892_v10  ;;  %v7900_v13 = vsub.s32 1, %v7892_v10  ;;  %v520_v16 = vsub.s32 4, %v7892_v10  ;;  %v524_v18 = vsub.s32 5, %v7892_v10 }
 0x105   : > { %1213 = vmatprep.subr.bf16.mxu1 %v5766_v17 }
 0x106   : > { %4405 = vmatpush1.bf16.msra.mxu0 %v6591_v21  ;;  %v505_v14 = vrot.slane %v7894_v11, %v7897_v12  ;;  %v509_v15 = vrot.slane %v7894_v11, %v7900_v13 }
 0x107   : > { %4406 = vmatprep.subr.bf16.mxu0 %v6599_v0 }
 0x108   : > { %1214 = vmatpush1.bf16.msra.mxu1 %v5765_v20 }
 0x109   : > { %4736 = vmatprep.subr.bf16.mxu1 %v6560_v19 }
 0x10a   : > { %4407 = vmatpush1.bf16.msra.mxu0 %v6597_v24  ;;  %v521_v24 = vrot.slane %v7894_v11, %v520_v16 }
 0x10b   : > { %5774 = vmatmul.mubr.msk.bf16.vlgmr.msra.gmra.mrb[16].mxu1 %vm902_vm0, %v7868_v38  ;;  %4408 = vmatprep.subr.bf16.mxu0 %v6605_v25  ;;  %v6615_v38 = vld [vmem:[#allocation6 + $0x140] ss:$16 sps:$4 sm:$0xff]  }
 0x10c   : > { %4737 = vmatpush1.bf16.msra.mxu1 %v6558_v22 }
 0x10d   : > { %4738 = vmatprep.subr.bf16.mxu1 %v6566_v23 }
 0x10e   : > { %4409 = vmatpush1.bf16.msra.mxu0 %v6603_v28 }
 0x10f   : > { %4410 = vmatprep.subr.bf16.mxu0 %v6611_v29 }
 0x110   : > { %4739 = vmatpush1.bf16.msra.mxu1 %v6564_v26  ;;  %v525_v26 = vrot.slane %v7894_v11, %v524_v18 }
 0x111   : > { %4740 = vmatprep.subr.bf16.mxu1 %v6572_v27 }
 0x112   : > { %4411 = vmatpush1.bf16.msra.mxu0 %v6609_v32  ;;  %v6654_v32 = vld [vmem:[#allocation6 + $0x208] ss:$16 sps:$4 sm:$0xff]  }
 0x113   : > { %4412 = vmatprep.subr.bf16.mxu0 %v6617_v33 }
 0x114   : > { %4741 = vmatpush1.bf16.msra.mxu1 %v6570_v30 }
 0x115   : > { %4742 = vmatprep.subr.bf16.mxu1 %v6578_v31  ;;  %v6651_v31 = vld [vmem:[#allocation6 + $0x200] ss:$16 sps:$4 sm:$0xff]  }
 0x116   : > { %4413 = vmatpush1.bf16.msra.mxu0 %v6615_v38 }
 0x117   : > { %4414 = vmatprep.subr.bf16.mxu0 %v6623_v36 }
 0x118   : > { %4743 = vmatpush1.bf16.msra.mxu1 %v6576_v34 }
 0x119   : > { %4744 = vmatprep.subr.bf16.mxu1 %v6584_v35  ;;  %v6659_v35 = vld [vmem:[#allocation6 + $0x224] ss:$16 sps:$4 sm:$0xff]  }
 0x11a   : > { %4415 = vmatpush1.bf16.msra.mxu0 %v6621_v40 }
 0x11b   : > { %4416 = vmatprep.subr.bf16.mxu0 %v6629_v41  ;;  %v6662_v41 = vld [vmem:[#allocation6 + $0x22c] ss:$16 sps:$4 sm:$0xff]  }
 0x11c   : > { %4745 = vmatpush1.bf16.msra.mxu1 %v6582_v37 }
 0x11d   : > { %4746 = vmatprep.subr.bf16.mxu1 %v6590_v39 }
 0x11e   : > { %4417 = vmatpush1.bf16.msra.mxu0 %v6627_v45 }
 0x11f   : > { %4418 = vmatprep.subr.bf16.mxu0 %v6635_v47  ;;  %v7918_v47 = vsub.s32 3, %v7892_v10 }
 0x120   : > { %4747 = vmatpush1.bf16.msra.mxu1 %v6588_v42  ;;  %v7915_v42 = vsub.s32 2, %v7892_v10 }
 0x121   : > { %4748 = vmatprep.subr.bf16.mxu1 %v6596_v43 }
 0x122   : > { %4419 = vmatpush1.bf16.msra.mxu0 %v6633_v49 }
 0x123   : > { %4420 = vmatprep.subr.bf16.mxu0 %v6641_v51 }
 0x124   : > { %4749 = vmatpush1.bf16.msra.mxu1 %v6594_v44 }
 0x125   : > { %4750 = vmatprep.subr.bf16.mxu1 %v6602_v46  ;;  %v6657_v46 = vld [vmem:[#allocation6 + $0x220] ss:$16 sps:$4 sm:$0xff]  }
 0x126   : > { %4421 = vmatpush1.bf16.msra.mxu0 %v6639_v53  ;;  %v6665_v53 = vld [vmem:[#allocation6 + $0x244] ss:$16 sps:$4 sm:$0xff]  }
 0x127   : > { %4422 = vmatprep.subr.bf16.mxu0 %v6647_v55  ;;  %v513_v55 = vrot.slane %v7894_v11, %v7915_v42 }
 0x128   : > { %4751 = vmatpush1.bf16.msra.mxu1 %v6600_v48 }
 0x129   : > { %4752 = vmatprep.subr.bf16.mxu1 %v6608_v50  ;;  %v6660_v50 = vld [vmem:[#allocation6 + $0x228] ss:$16 sps:$4 sm:$0xff]  }
 0x12a   : > { %4423 = vmatpush1.bf16.msra.mxu0 %v6645_v57  ;;  %v6663_v57 = vld [vmem:[#allocation6 + $0x240] ss:$16 sps:$4 sm:$0xff]  }
 0x12b   : > { %4435 = vmatprep.subr.bf16.mxu0 %v6653_v59  ;;  %v517_v59 = vrot.slane %v7894_v11, %v7918_v47 }
 0x12c   : > { %4753 = vmatpush1.bf16.msra.mxu1 %v6606_v52 }
 0x12d   : > { %4754 = vmatprep.subr.bf16.mxu1 %v6614_v54  ;;  %v6668_v54 = vld [vmem:[#allocation6 + $0x24c] ss:$16 sps:$4 sm:$0xff]  }
 0x130   : > { %4755 = vmatpush1.bf16.msra.mxu1 %v6612_v56 }
 0x131   : > { %4756 = vmatprep.subr.bf16.mxu1 %v6620_v58  ;;  %v6666_v58 = vld [vmem:[#allocation6 + $0x248] ss:$16 sps:$4 sm:$0xff]  }
 0x134   : > { %4757 = vmatpush1.bf16.msra.mxu1 %v6618_v60 }
 0x135   : > { %4758 = vmatprep.subr.bf16.mxu1 %v6626_v61  ;;  %v7928_v61 = vld [vmem:[#allocation4 + $0x8] sm:$0xff] }
 0x138   : > { %4759 = vmatpush1.bf16.msra.mxu1 %v6624_v62 }
 0x139   : > { %4760 = vmatprep.subr.bf16.mxu1 %v6632_v63  ;;  %v6671_v63 = vld [vmem:[#allocation6 + $0x264] ss:$16 sps:$4 sm:$0xff]  }
 0x13c   : > { %4761 = vmatpush1.bf16.msra.mxu1 %v6630_v1  ;;  %v6674_v1 = vld [vmem:[#allocation6 + $0x26c] ss:$16 sps:$4 sm:$0xff]  }
 0x13d   : > { %4762 = vmatprep.subr.bf16.mxu1 %v6638_v2 }
 0x140   : > { %4763 = vmatpush1.bf16.msra.mxu1 %v6636_v3 }
 0x141   : > { %4764 = vmatprep.subr.bf16.mxu1 %v6644_v4  ;;  %v6669_v4 = vld [vmem:[#allocation6 + $0x260] ss:$16 sps:$4 sm:$0xff]  }
 0x144   : > { %4765 = vmatpush1.bf16.msra.mxu1 %v6642_v5  ;;  %v6672_v5 = vld [vmem:[#allocation6 + $0x268] ss:$16 sps:$4 sm:$0xff]  }
 0x145   : > { %4766 = vmatprep.subr.bf16.mxu1 %v6650_v6 }
 0x148   : > { %4767 = vmatpush1.bf16.msra.mxu1 %v6648_v7 }
 0x149   : > { %4779 = vmatprep.subr.bf16.mxu1 %v6656_v8 }
 0x19e   : > { %v940_v17 = vpop.f32.mrb[0].mxu1  ;;  %v1026_v33 = vpop.f32.mrb[0].mxu0 }
 0x19f   : > { %v941_v19 = vadd.f32 %v940_v17, %v505_v14  ;;  %v942_v20 = vpop.f32.mrb[1].mxu1  ;;  %v1027_v38 = vadd.f32 %v1026_v33, %v521_v24  ;;  %v1028_v36 = vpop.f32.mrb[1].mxu0 }
 0x1a0   : > { %v943_v21 = vadd.f32 %v942_v20, %v509_v15  ;;  %v944_v0 = vpop.f32.mrb[2].mxu1  ;;  %v1029_v39 = vadd.f32 %v1028_v36, %v525_v26  ;;  %v1030_v40 = vpop.f32.mrb[2].mxu0  ;;  %v541_v20 = vrot.slane %v7928_v61, %v7900_v13 }
 0x1a1   : > { %v945_v22 = vadd.f32 %v944_v0, %v505_v14  ;;  %v946_v23 = vpop.f32.mrb[3].mxu1  ;;  %v1250_v27 = vmax.f32 %v941_v19, 0.0  ;;  %v1254_v43 = vmax.f32 %v1027_v38, 0.0  ;;  %v1031_v44 = vadd.f32 %v1030_v40, %v521_v24  ;;  %v1032_v45 = vpop.f32.mrb[3].mxu0  ;;  %v6680_v0 = vld [vmem:[#allocation6 + $0x28c] ss:$16 sps:$4 sm:$0xff]  }
 0x1a2   : > { %v947_v25 = vadd.f32 %v946_v23, %v509_v15  ;;  %v1251_v29 = vmax.f32 %v943_v21, 0.0  ;;  %v1255_v48 = vmax.f32 %v1029_v39, 0.0  ;;  %v1033_v49 = vadd.f32 %v1032_v45, %v525_v26  ;;  %v6677_v21 = vld [vmem:[#allocation6 + $0x284] ss:$16 sps:$4 sm:$0xff]   ;;  %v6675_v23 = vld [vmem:[#allocation6 + $0x280] ss:$16 sps:$4 sm:$0xff]  }
 0x1a3   : > { %v1266_v28 = vmax.f32 %v945_v22, 0.0  ;;  %v1270_v51 = vmax.f32 %v1031_v44, 0.0  ;;  %v537_v15 = vrot.slane %v7928_v61, %v7897_v12  ;;  %v6678_v24 = vld [vmem:[#allocation6 + $0x288] ss:$16 sps:$4 sm:$0xff]   ;;  %v6681_v39 = vld [vmem:[#allocation6 + $0x2a0] ss:$16 sps:$4 sm:$0xff]   ;;  %v553_v45 = vrot.slane %v7928_v61, %v520_v16 }
 0x1a4   : > { %v1267_v30 = vmax.f32 %v947_v25, 0.0  ;;  %v1271_v52 = vmax.f32 %v1033_v49, 0.0  ;;  %v6684_v40 = vld [vmem:[#allocation6 + $0x2a8] ss:$16 sps:$4 sm:$0xff]   ;;  %v6687_v16 = vld [vmem:[#allocation6 + $0x2c0] ss:$16 sps:$4 sm:$0xff]  }
 0x1a5   : > { %v1282_v34 = vpack.c.bf16 %v1266_v28, %v1250_v27  ;;  %v7922_v56 = vpack.c.bf16 %v1270_v51, %v1254_v43  ;;  %v6692_v51 = vld [vmem:[#allocation6 + $0x2cc] ss:$16 sps:$4 sm:$0xff]  }
 0x1a6   : > { %v1283_v37 = vpack.c.bf16 %v1267_v30, %v1251_v29  ;;  %v7926_v60 = vpack.c.bf16 %v1271_v52, %v1255_v48 }
 0x1a8   : > { %4424 = vmatprep.mubr.bf16.mxu0 %v1283_v37  ;;  %4768 = vmatprep.mubr.bf16.mxu1 %v1283_v37 }
 0x1a9   : > { %4425 = vmatmul.mubr.bf16.vlgmr.msra.gmra.mrb[12].mxu0 %v1282_v34  ;;  %4769 = vmatmul.mubr.bf16.vlgmr.msra.gmra.mrb[20].mxu1 %v1282_v34  ;;  %v6683_v34 = vld [vmem:[#allocation6 + $0x2a4] ss:$16 sps:$4 sm:$0xff]  }
 0x1aa   : > { %4436 = vmatpush1.bf16.msra.mxu0 %v6651_v31  ;;  %4780 = vmatpush1.bf16.msra.mxu1 %v6654_v32  ;;  %v528_v31 = vsub.s32 6, %v7892_v10 }
 0x1ab   : > { %4437 = vmatprep.subr.bf16.mxu0 %v6659_v35  ;;  %4781 = vmatprep.subr.bf16.mxu1 %v6662_v41  ;;  %v6686_v35 = vld [vmem:[#allocation6 + $0x2ac] ss:$16 sps:$4 sm:$0xff]   ;;  %v532_v41 = vsub.s32 7, %v7892_v10  ;;  %v6695_v10 = vld [vmem:[#allocation6 + $0x2e4] ss:$16 sps:$4 sm:$0xff]  }
 0x1ac   : > { %v529_v48 = vrot.slane %v7894_v11, %v528_v31 }
 0x1ae   : > { %4438 = vmatpush1.bf16.msra.mxu0 %v6657_v46  ;;  %4782 = vmatpush1.bf16.msra.mxu1 %v6660_v50  ;;  %v983_v62 = vpop.f32.mrb[4].mxu1  ;;  %v6689_v50 = vld [vmem:[#allocation6 + $0x2c4] ss:$16 sps:$4 sm:$0xff]  }
 0x1af   : > { %4439 = vmatprep.subr.bf16.mxu0 %v6665_v53  ;;  %4783 = vmatprep.subr.bf16.mxu1 %v6668_v54  ;;  %v984_v2 = vadd.f32 %v983_v62, %v513_v55  ;;  %v985_v3 = vpop.f32.mrb[5].mxu1  ;;  %v557_v53 = vrot.slane %v7928_v61, %v524_v18  ;;  %v7948_v54 = vrot.slane %v7928_v61, %v528_v31 }
 0x1b0   : > { %v986_v6 = vadd.f32 %v985_v3, %v517_v59  ;;  %v987_v7 = vpop.f32.mrb[6].mxu1  ;;  %v1112_v26 = vpop.f32.mrb[4].mxu0  ;;  %v6696_v3 = vld [vmem:[#allocation6 + $0x2e8] ss:$16 sps:$4 sm:$0xff]  }
 0x1b1   : > { %v1252_v8 = vmax.f32 %v984_v2, 0.0  ;;  %v988_v9 = vadd.f32 %v987_v7, %v513_v55  ;;  %v989_v14 = vpop.f32.mrb[7].mxu1  ;;  %v1113_v28 = vadd.f32 %v1112_v26, %v537_v15  ;;  %v1114_v29 = vpop.f32.mrb[5].mxu0  ;;  %v6690_v55 = vld [vmem:[#allocation6 + $0x2c8] ss:$16 sps:$4 sm:$0xff]  }
 0x1b2   : > { %4440 = vmatpush1.bf16.msra.mxu0 %v6663_v57  ;;  %4784 = vmatpush1.bf16.msra.mxu1 %v6666_v58  ;;  %v1253_v17 = vmax.f32 %v986_v6, 0.0  ;;  %v990_v19 = vadd.f32 %v989_v14, %v517_v59  ;;  %v1115_v32 = vadd.f32 %v1114_v29, %v541_v20  ;;  %v1116_v33 = vpop.f32.mrb[6].mxu0  ;;  %v533_v57 = vrot.slane %v7894_v11, %v532_v41  ;;  %v6693_v2 = vld [vmem:[#allocation6 + $0x2e0] ss:$16 sps:$4 sm:$0xff]   ;;  %v6701_v14 = vld [vmem:[#allocation6 + $0x304] ss:$16 sps:$4 sm:$0xff]  }
 0x1b3   : > { %4441 = vmatprep.subr.bf16.mxu0 %v6671_v63  ;;  %4785 = vmatprep.subr.bf16.mxu1 %v6674_v1  ;;  %v1268_v22 = vmax.f32 %v988_v9, 0.0  ;;  %v1258_v38 = vmax.f32 %v1113_v28, 0.0  ;;  %v1117_v36 = vadd.f32 %v1116_v33, %v537_v15  ;;  %v1118_v37 = vpop.f32.mrb[7].mxu0  ;;  %v7954_v59 = vrot.slane %v7928_v61, %v532_v41  ;;  %v6698_v63 = vld [vmem:[#allocation6 + $0x2ec] ss:$16 sps:$4 sm:$0xff]  }
 0x1b4   : > { %v1269_v25 = vmax.f32 %v990_v19, 0.0  ;;  %v1259_v43 = vmax.f32 %v1115_v32, 0.0  ;;  %v1119_v44 = vadd.f32 %v1118_v37, %v541_v20  ;;  %v6704_v15 = vld [vmem:[#allocation6 + $0x30c] ss:$16 sps:$4 sm:$0xff]   ;;  %v6699_v19 = vld [vmem:[#allocation6 + $0x300] ss:$16 sps:$4 sm:$0xff]  }
 0x1b5   : > { %v7934_v27 = vpack.c.bf16 %v1268_v22, %v1252_v8  ;;  %v1274_v46 = vmax.f32 %v1117_v36, 0.0  ;;  %v6702_v20 = vld [vmem:[#allocation6 + $0x308] ss:$16 sps:$4 sm:$0xff]   ;;  %v6707_v29 = vld [vmem:[#allocation6 + $0x324] ss:$16 sps:$4 sm:$0xff]  }
 0x1b6   : > { %4442 = vmatpush1.bf16.msra.mxu0 %v6669_v4  ;;  %4786 = vmatpush1.bf16.msra.mxu1 %v6672_v5  ;;  %v1285_v30 = vpack.c.bf16 %v1269_v25, %v1253_v17  ;;  %v1275_v49 = vmax.f32 %v1119_v44, 0.0  ;;  %v6716_v41 = vld [vmem:[#allocation6 + $0x34c] ss:$16 sps:$4 sm:$0xff]  }
 0x1b7   : > { %4443 = vmatprep.subr.bf16.mxu0 %v6677_v21  ;;  %4787 = vmatprep.subr.bf16.mxu1 %v6680_v0  ;;  %v7942_v52 = vpack.c.bf16 %v1274_v46, %v1258_v38  ;;  %v6711_v46 = vld [vmem:[#allocation6 + $0x340] ss:$16 sps:$4 sm:$0xff]  }
 0x1b8   : > { %4467 = vmatprep.mubr.bf16.mxu0 %v1285_v30  ;;  %4811 = vmatprep.mubr.bf16.mxu1 %v1285_v30  ;;  %v7951_v58 = vpack.c.bf16 %v1275_v49, %v1259_v43  ;;  %v6710_v30 = vld [vmem:[#allocation6 + $0x32c] ss:$16 sps:$4 sm:$0xff]   ;;  %v545_v43 = vrot.slane %v7928_v61, %v7915_v42 }
 0x1ba   : > { %4444 = vmatpush1.bf16.msra.mxu0 %v6675_v23  ;;  %4788 = vmatpush1.bf16.msra.mxu1 %v6678_v24 }
 0x1bb   : > { %4445 = vmatprep.subr.bf16.mxu0 %v6683_v34  ;;  %4789 = vmatprep.subr.bf16.mxu1 %v6686_v35  ;;  %v6705_v34 = vld [vmem:[#allocation6 + $0x320] ss:$16 sps:$4 sm:$0xff]   ;;  %v6708_v35 = vld [vmem:[#allocation6 + $0x328] ss:$16 sps:$4 sm:$0xff]  }
 0x1be   : > { %4446 = vmatpush1.bf16.msra.mxu0 %v6681_v39  ;;  %4790 = vmatpush1.bf16.msra.mxu1 %v6684_v40  ;;  %v1069_v62 = vpop.f32.mrb[8].mxu1  ;;  %v6713_v40 = vld [vmem:[#allocation6 + $0x344] ss:$16 sps:$4 sm:$0xff]  }
 0x1bf   : > { %4447 = vmatprep.subr.bf16.mxu0 %v6689_v50  ;;  %4791 = vmatprep.subr.bf16.mxu1 %v6692_v51  ;;  %v1070_v18 = vadd.f32 %v1069_v62, %v529_v48  ;;  %v1071_v1 = vpop.f32.mrb[9].mxu1  ;;  %v6719_v51 = vld [vmem:[#allocation6 + $0x364] ss:$16 sps:$4 sm:$0xff]   ;;  %v6720_v62 = vld [vmem:[#allocation6 + $0x368] ss:$16 sps:$4 sm:$0xff]  }
 0x1c0   : > { %v1072_v4 = vadd.f32 %v1071_v1, %v533_v57  ;;  %v1073_v5 = vpop.f32.mrb[10].mxu1  ;;  %v1198_v0 = vpop.f32.mrb[8].mxu0 }
 0x1c1   : > { %v1256_v6 = vmax.f32 %v1070_v18, 0.0  ;;  %v1074_v11 = vadd.f32 %v1073_v5, %v529_v48  ;;  %v1075_v7 = vpop.f32.mrb[11].mxu1  ;;  %v1199_v23 = vadd.f32 %v1198_v0, %v553_v45  ;;  %v1200_v24 = vpop.f32.mrb[9].mxu0  ;;  %v549_v48 = vrot.slane %v7928_v61, %v7918_v47  ;;  %v6728_v5 = vld [vmem:[#allocation6 + $0x38c] ss:$16 sps:$4 sm:$0xff]  }
 0x1c2   : > { %4448 = vmatpush1.bf16.msra.mxu0 %v6687_v16  ;;  %4792 = vmatpush1.bf16.msra.mxu1 %v6690_v55  ;;  %v1257_v8 = vmax.f32 %v1072_v4, 0.0  ;;  %v1076_v9 = vadd.f32 %v1075_v7, %v533_v57  ;;  %v1201_v26 = vadd.f32 %v1200_v24, %v557_v53  ;;  %v1202_v28 = vpop.f32.mrb[10].mxu0  ;;  %v6717_v57 = vld [vmem:[#allocation6 + $0x360] ss:$16 sps:$4 sm:$0xff]   ;;  %v6725_v4 = vld [vmem:[#allocation6 + $0x384] ss:$16 sps:$4 sm:$0xff]  }
 0x1c3   : > { %4449 = vmatprep.subr.bf16.mxu0 %v6695_v10  ;;  %4793 = vmatprep.subr.bf16.mxu1 %v6698_v63  ;;  %v1272_v17 = vmax.f32 %v1074_v11, 0.0  ;;  %v1262_v31 = vmax.f32 %v1199_v23, 0.0  ;;  %v1203_v32 = vadd.f32 %v1202_v28, %v553_v45  ;;  %v1204_v33 = vpop.f32.mrb[11].mxu0  ;;  %v6714_v45 = vld [vmem:[#allocation6 + $0x348] ss:$16 sps:$4 sm:$0xff]  }
 0x1c4   : > { %v1273_v21 = vmax.f32 %v1076_v9, 0.0  ;;  %v1263_v38 = vmax.f32 %v1201_v26, 0.0  ;;  %v1205_v36 = vadd.f32 %v1204_v33, %v557_v53  ;;  %v6722_v53 = vld [vmem:[#allocation6 + $0x36c] ss:$16 sps:$4 sm:$0xff]   ;;  %v6723_v11 = vld [vmem:[#allocation6 + $0x380] ss:$16 sps:$4 sm:$0xff]  }
 0x1c5   : > { %v7956_v22 = vpack.c.bf16 %v1272_v17, %v1256_v6  ;;  %v1278_v37 = vmax.f32 %v1203_v32, 0.0  ;;  %v6726_v7 = vld [vmem:[#allocation6 + $0x388] ss:$16 sps:$4 sm:$0xff]   ;;  %v6734_v17 = vld [vmem:[#allocation6 + $0x3ac] ss:$16 sps:$4 sm:$0xff]  }
 0x1c6   : > { %4450 = vmatpush1.bf16.msra.mxu0 %v6693_v2  ;;  %4794 = vmatpush1.bf16.msra.mxu1 %v6696_v3  ;;  %v7958_v25 = vpack.c.bf16 %v1273_v21, %v1257_v8  ;;  %v1279_v39 = vmax.f32 %v1205_v36, 0.0  ;;  %v6737_v21 = vld [vmem:[#allocation6 + $0x3c4] ss:$16 sps:$4 sm:$0xff]   ;;  %v6740_v0 = vld [vmem:[#allocation6 + $0x3cc] ss:$16 sps:$4 sm:$0xff]  }
 0x1c7   : > { %4451 = vmatprep.subr.bf16.mxu0 %v6701_v14  ;;  %4795 = vmatprep.subr.bf16.mxu1 %v6704_v15  ;;  %v7962_v44 = vpack.c.bf16 %v1278_v37, %v1262_v31  ;;  %v6731_v15 = vld [vmem:[#allocation6 + $0x3a4] ss:$16 sps:$4 sm:$0xff]   ;;  %v6735_v23 = vld [vmem:[#allocation6 + $0x3c0] ss:$16 sps:$4 sm:$0xff]   ;;  %v6738_v24 = vld [vmem:[#allocation6 + $0x3c8] ss:$16 sps:$4 sm:$0xff]  }
 0x1c8   : > { %v7966_v49 = vpack.c.bf16 %v1279_v39, %v1263_v38  ;;  %v6743_v28 = vld [vmem:[#allocation6 + $0x3e4] ss:$16 sps:$4 sm:$0xff]   ;;  %v6741_v32 = vld [vmem:[#allocation6 + $0x3e0] ss:$16 sps:$4 sm:$0xff]   ;;  %v6744_v33 = vld [vmem:[#allocation6 + $0x3e8] ss:$16 sps:$4 sm:$0xff]  }
 0x1ca   : > { %4452 = vmatpush1.bf16.msra.mxu0 %v6699_v19  ;;  %4796 = vmatpush1.bf16.msra.mxu1 %v6702_v20  ;;  %v6729_v19 = vld [vmem:[#allocation6 + $0x3a0] ss:$16 sps:$4 sm:$0xff]   ;;  %v6732_v20 = vld [vmem:[#allocation6 + $0x3a8] ss:$16 sps:$4 sm:$0xff]  }
 0x1cb   : > { %4453 = vmatprep.subr.bf16.mxu0 %v6707_v29  ;;  %4797 = vmatprep.subr.bf16.mxu1 %v6710_v30  ;;  %v6746_v29 = vld [vmem:[#allocation6 + $0x3ec] ss:$16 sps:$4 sm:$0xff]  }
 0x1ce   : > { %4454 = vmatpush1.bf16.msra.mxu0 %v6705_v34  ;;  %4798 = vmatpush1.bf16.msra.mxu1 %v6708_v35  ;;  %v1155_v50 = vpop.f32.mrb[12].mxu1 }
 0x1cf   : > { %4455 = vmatprep.subr.bf16.mxu0 %v6713_v40  ;;  %4799 = vmatprep.subr.bf16.mxu1 %v6716_v41  ;;  %v1156_v16 = vadd.f32 %v1155_v50, %v545_v43  ;;  %v1157_v55 = vpop.f32.mrb[13].mxu1  ;;  %v6749_v41 = vld [vmem:[#allocation6 + $0x404] ss:$16 sps:$4 sm:$0xff]  }
 0x1d0   : > { %v1158_v10 = vadd.f32 %v1157_v55, %v549_v48  ;;  %v1159_v63 = vpop.f32.mrb[14].mxu1  ;;  %v6753_v55 = vld [vmem:[#allocation6 + $0x420] ss:$16 sps:$4 sm:$0xff]  }
 0x1d1   : > { %v1260_v18 = vmax.f32 %v1156_v16, 0.0  ;;  %v1160_v1 = vadd.f32 %v1159_v63, %v545_v43  ;;  %v1161_v2 = vpop.f32.mrb[15].mxu1  ;;  %v6752_v43 = vld [vmem:[#allocation6 + $0x40c] ss:$16 sps:$4 sm:$0xff]   ;;  %v6762_v63 = vld [vmem:[#allocation6 + $0x448] ss:$16 sps:$4 sm:$0xff]  }
 0x1d2   : > { %4456 = vmatpush1.bf16.msra.mxu0 %v6711_v46  ;;  %4800 = vmatpush1.bf16.msra.mxu1 %v6714_v45  ;;  %v1261_v61 = vmax.f32 %v1158_v10, 0.0  ;;  %v1162_v3 = vadd.f32 %v1161_v2, %v549_v48  ;;  %v6747_v45 = vld [vmem:[#allocation6 + $0x400] ss:$16 sps:$4 sm:$0xff]   ;;  %v6750_v48 = vld [vmem:[#allocation6 + $0x408] ss:$16 sps:$4 sm:$0xff]  }
 0x1d3   : > { %4457 = vmatprep.subr.bf16.mxu0 %v6719_v51  ;;  %4801 = vmatprep.subr.bf16.mxu1 %v6722_v53  ;;  %v1276_v6 = vmax.f32 %v1160_v1, 0.0  ;;  %v6755_v51 = vld [vmem:[#allocation6 + $0x424] ss:$16 sps:$4 sm:$0xff]   ;;  %v6758_v53 = vld [vmem:[#allocation6 + $0x42c] ss:$16 sps:$4 sm:$0xff]  }
 0x1d4   : > { %v1277_v8 = vmax.f32 %v1162_v3, 0.0  ;;  %v6759_v10 = vld [vmem:[#allocation6 + $0x440] ss:$16 sps:$4 sm:$0xff]   ;;  %v6770_v1 = vld [vmem:[#allocation6 + $0x46c] ss:$16 sps:$4 sm:$0xff]  }
 0x1d5   : > { %v7968_v9 = vpack.c.bf16 %v1276_v6, %v1260_v18  ;;  %v6767_v18 = vld [vmem:[#allocation6 + $0x464] ss:$16 sps:$4 sm:$0xff]   ;;  %v6765_v2 = vld [vmem:[#allocation6 + $0x460] ss:$16 sps:$4 sm:$0xff]   ;;  %v6776_v3 = vld [vmem:[#allocation6 + $0x48c] ss:$16 sps:$4 sm:$0xff]  }
 0x1d6   : > { %4458 = vmatpush1.bf16.msra.mxu0 %v6717_v57  ;;  %4802 = vmatpush1.bf16.msra.mxu1 %v6720_v62  ;;  %v7970_v14 = vpack.c.bf16 %v1277_v8, %v1261_v61  ;;  %v6761_v57 = vld [vmem:[#allocation6 + $0x444] ss:$16 sps:$4 sm:$0xff]   ;;  %v6764_v62 = vld [vmem:[#allocation6 + $0x44c] ss:$16 sps:$4 sm:$0xff]  }
 0x1d7   : > { %4459 = vmatprep.subr.bf16.mxu0 %v6725_v4  ;;  %4803 = vmatprep.subr.bf16.mxu1 %v6728_v5  ;;  %v6773_v61 = vld [vmem:[#allocation6 + $0x484] ss:$16 sps:$4 sm:$0xff]   ;;  %v6771_v4 = vld [vmem:[#allocation6 + $0x480] ss:$16 sps:$4 sm:$0xff]   ;;  %v6774_v5 = vld [vmem:[#allocation6 + $0x488] ss:$16 sps:$4 sm:$0xff]  }
 0x1d8   : > { %v6782_v6 = vld [vmem:[#allocation6 + $0x4ac] ss:$16 sps:$4 sm:$0xff]   ;;  %v6785_v8 = vld [vmem:[#allocation6 + $0x4c4] ss:$16 sps:$4 sm:$0xff]  }
 0x1da   : > { %4460 = vmatpush1.bf16.msra.mxu0 %v6723_v11  ;;  %4804 = vmatpush1.bf16.msra.mxu1 %v6726_v7  ;;  %v6777_v11 = vld [vmem:[#allocation6 + $0x4a0] ss:$16 sps:$4 sm:$0xff]   ;;  %v6780_v7 = vld [vmem:[#allocation6 + $0x4a8] ss:$16 sps:$4 sm:$0xff]  }
 0x1db   : > { %4461 = vmatprep.subr.bf16.mxu0 %v6731_v15  ;;  %4805 = vmatprep.subr.bf16.mxu1 %v6734_v17  ;;  %v6788_v15 = vld [vmem:[#allocation6 + $0x4cc] ss:$16 sps:$4 sm:$0xff]   ;;  %v6783_v17 = vld [vmem:[#allocation6 + $0x4c0] ss:$16 sps:$4 sm:$0xff]  }
 0x1de   : > { %4462 = vmatpush1.bf16.msra.mxu0 %v6729_v19  ;;  %4806 = vmatpush1.bf16.msra.mxu1 %v6732_v20  ;;  %v1241_v26 = vpop.f32.mrb[16].mxu1  ;;  %v6786_v19 = vld [vmem:[#allocation6 + $0x4c8] ss:$16 sps:$4 sm:$0xff]   ;;  %v6791_v20 = vld [vmem:[#allocation6 + $0x4e4] ss:$16 sps:$4 sm:$0xff]  }
 0x1df   : > { %4463 = vmatprep.subr.bf16.mxu0 %v6737_v21  ;;  %4807 = vmatprep.subr.bf16.mxu1 %v6740_v0  ;;  %v1242_v30 = vadd.f32 %v1241_v26, %v7948_v54  ;;  %v1243_v31 = vpop.f32.mrb[17].mxu1  ;;  %v6794_v21 = vld [vmem:[#allocation6 + $0x4ec] ss:$16 sps:$4 sm:$0xff]   ;;  %v6789_v0 = vld [vmem:[#allocation6 + $0x4e0] ss:$16 sps:$4 sm:$0xff]  }
 0x1e0   : > { %v1244_v34 = vadd.f32 %v1243_v31, %v7954_v59  ;;  %v1245_v35 = vpop.f32.mrb[18].mxu1  ;;  %v6800_v26 = vld [vmem:[#allocation6 + $0x50c] ss:$16 sps:$4 sm:$0xff]  }
 0x1e1   : > { %v1264_v38 = vmax.f32 %v1242_v30, 0.0  ;;  %v1246_v36 = vadd.f32 %v1245_v35, %v7948_v54  ;;  %v1247_v37 = vpop.f32.mrb[19].mxu1  ;;  %v6803_v30 = vld [vmem:[#allocation6 + $0x524] ss:$16 sps:$4 sm:$0xff]   ;;  %v6806_v31 = vld [vmem:[#allocation6 + $0x52c] ss:$16 sps:$4 sm:$0xff]  }
 0x1e2   : > { %4464 = vmatpush1.bf16.msra.mxu0 %v6735_v23  ;;  %4808 = vmatpush1.bf16.msra.mxu1 %v6738_v24  ;;  %v1265_v39 = vmax.f32 %v1244_v34, 0.0  ;;  %v1248_v40 = vadd.f32 %v1247_v37, %v7954_v59  ;;  %v6756_v59 = vld [vmem:[#allocation6 + $0x428] ss:$16 sps:$4 sm:$0xff]   ;;  %v6797_v24 = vld [vmem:[#allocation6 + $0x504] ss:$16 sps:$4 sm:$0xff]  }
 0x1e3   : > { %4465 = vmatprep.subr.bf16.mxu0 %v6743_v28  ;;  %4809 = vmatprep.subr.bf16.mxu1 %v6746_v29  ;;  %v1280_v46 = vmax.f32 %v1246_v36, 0.0  ;;  %v6792_v23 = vld [vmem:[#allocation6 + $0x4e8] ss:$16 sps:$4 sm:$0xff]   ;;  %v6795_v28 = vld [vmem:[#allocation6 + $0x500] ss:$16 sps:$4 sm:$0xff]  }
 0x1e4   : > { %v1281_v50 = vmax.f32 %v1248_v40, 0.0  ;;  %v6798_v29 = vld [vmem:[#allocation6 + $0x508] ss:$16 sps:$4 sm:$0xff]   ;;  %v6809_v34 = vld [vmem:[#allocation6 + $0x544] ss:$16 sps:$4 sm:$0xff]  }
 0x1e5   : > { %v7976_v16 = vpack.c.bf16 %v1280_v46, %v1264_v38  ;;  %v6812_v35 = vld [vmem:[#allocation6 + $0x54c] ss:$16 sps:$4 sm:$0xff]   ;;  %v6807_v38 = vld [vmem:[#allocation6 + $0x540] ss:$16 sps:$4 sm:$0xff]   ;;  %v6810_v36 = vld [vmem:[#allocation6 + $0x548] ss:$16 sps:$4 sm:$0xff]  }
 0x1e6   : > { %4466 = vmatpush1.bf16.msra.mxu0 %v6741_v32  ;;  %4810 = vmatpush1.bf16.msra.mxu1 %v6744_v33  ;;  %v7978_v54 = vpack.c.bf16 %v1281_v50, %v1265_v39  ;;  %v6801_v32 = vld [vmem:[#allocation6 + $0x520] ss:$16 sps:$4 sm:$0xff]   ;;  %v6804_v33 = vld [vmem:[#allocation6 + $0x528] ss:$16 sps:$4 sm:$0xff]   ;;  %v6815_v37 = vld [vmem:[#allocation6 + $0x564] ss:$16 sps:$4 sm:$0xff]  }
 0x1e7   : > { %4478 = vmatprep.subr.bf16.mxu0 %v6749_v41  ;;  %4822 = vmatprep.subr.bf16.mxu1 %v6752_v43  ;;  %v6818_v39 = vld [vmem:[#allocation6 + $0x56c] ss:$16 sps:$4 sm:$0xff]   ;;  %v6813_v40 = vld [vmem:[#allocation6 + $0x560] ss:$16 sps:$4 sm:$0xff]   ;;  %v6816_v41 = vld [vmem:[#allocation6 + $0x568] ss:$16 sps:$4 sm:$0xff]  }
 0x1e8   : > { %v6821_v43 = vld [vmem:[#allocation6 + $0x584] ss:$16 sps:$4 sm:$0xff]   ;;  %v6824_v46 = vld [vmem:[#allocation6 + $0x58c] ss:$16 sps:$4 sm:$0xff]  }
 0x1e9   : > { %4468 = vmatmul.mubr.bf16.vlgmr.msra.gmra.mrb[12].mxu0 %v7934_v27  ;;  %4812 = vmatmul.mubr.bf16.vlgmr.msra.gmra.mrb[20].mxu1 %v7934_v27  ;;  %v6768_v27 = vld [vmem:[#allocation6 + $0x468] ss:$16 sps:$4 sm:$0xff]   ;;  %v6827_v50 = vld [vmem:[#allocation6 + $0x5a4] ss:$16 sps:$4 sm:$0xff]  }
 0x1ea   : > { %4479 = vmatpush1.bf16.msra.mxu0 %v6747_v45  ;;  %4823 = vmatpush1.bf16.msra.mxu1 %v6750_v48  ;;  %v6819_v45 = vld [vmem:[#allocation6 + $0x580] ss:$16 sps:$4 sm:$0xff]   ;;  %v6822_v48 = vld [vmem:[#allocation6 + $0x588] ss:$16 sps:$4 sm:$0xff]  }
 0x1eb   : > { %4480 = vmatprep.subr.bf16.mxu0 %v6755_v51  ;;  %4824 = vmatprep.subr.bf16.mxu1 %v6758_v53  ;;  %v6830_v51 = vld [vmem:[#allocation6 + $0x5ac] ss:$16 sps:$4 sm:$0xff]   ;;  %v6825_v53 = vld [vmem:[#allocation6 + $0x5a0] ss:$16 sps:$4 sm:$0xff]  }
 0x1ec   : > { %4510 = vmatprep.mubr.bf16.mxu0 %v7926_v60  ;;  %4854 = vmatprep.mubr.bf16.mxu1 %v7926_v60  ;;  %v6779_v60 = vld [vmem:[#allocation6 + $0x4a4] ss:$16 sps:$4 sm:$0xff]  }
 0x1ee   : > { %4481 = vmatpush1.bf16.msra.mxu0 %v6753_v55  ;;  %4825 = vmatpush1.bf16.msra.mxu1 %v6756_v59  ;;  %v6828_v55 = vld [vmem:[#allocation6 + $0x5a8] ss:$16 sps:$4 sm:$0xff]   ;;  %v6833_v59 = vld [vmem:[#allocation6 + $0x5c4] ss:$16 sps:$4 sm:$0xff]  }
 0x1ef   : > { %4482 = vmatprep.subr.bf16.mxu0 %v6761_v57  ;;  %4826 = vmatprep.subr.bf16.mxu1 %v6764_v62  ;;  %v6836_v57 = vld [vmem:[#allocation6 + $0x5cc] ss:$16 sps:$4 sm:$0xff]   ;;  %v6831_v62 = vld [vmem:[#allocation6 + $0x5c0] ss:$16 sps:$4 sm:$0xff]  }
 0x1f2   : > { %4483 = vmatpush1.bf16.msra.mxu0 %v6759_v10  ;;  %4827 = vmatpush1.bf16.msra.mxu1 %v6762_v63  ;;  %v6834_v10 = vld [vmem:[#allocation6 + $0x5c8] ss:$16 sps:$4 sm:$0xff]   ;;  %v6839_v63 = vld [vmem:[#allocation6 + $0x5e4] ss:$16 sps:$4 sm:$0xff]  }
 0x1f3   : > { %4484 = vmatprep.subr.bf16.mxu0 %v6767_v18  ;;  %4828 = vmatprep.subr.bf16.mxu1 %v6770_v1  ;;  %v6842_v18 = vld [vmem:[#allocation6 + $0x5ec] ss:$16 sps:$4 sm:$0xff]   ;;  %v6837_v1 = vld [vmem:[#allocation6 + $0x5e0] ss:$16 sps:$4 sm:$0xff]  }
 0x1f6   : > { %4485 = vmatpush1.bf16.msra.mxu0 %v6765_v2  ;;  %4829 = vmatpush1.bf16.msra.mxu1 %v6768_v27  ;;  %v6840_v2 = vld [vmem:[#allocation6 + $0x5e8] ss:$16 sps:$4 sm:$0xff]   ;;  %v6845_v27 = vld [vmem:[#allocation6 + $0x604] ss:$16 sps:$4 sm:$0xff]  }
 0x1f7   : > { %4486 = vmatprep.subr.bf16.mxu0 %v6773_v61  ;;  %4830 = vmatprep.subr.bf16.mxu1 %v6776_v3  ;;  %v6848_v61 = vld [vmem:[#allocation6 + $0x60c] ss:$16 sps:$4 sm:$0xff]   ;;  %v6843_v3 = vld [vmem:[#allocation6 + $0x600] ss:$16 sps:$4 sm:$0xff]  }
 0x1fa   : > { %4487 = vmatpush1.bf16.msra.mxu0 %v6771_v4  ;;  %4831 = vmatpush1.bf16.msra.mxu1 %v6774_v5  ;;  %v6846_v4 = vld [vmem:[#allocation6 + $0x608] ss:$16 sps:$4 sm:$0xff]   ;;  %v6851_v5 = vld [vmem:[#allocation6 + $0x624] ss:$16 sps:$4 sm:$0xff]  }
 0x1fb   : > { %4488 = vmatprep.subr.bf16.mxu0 %v6779_v60  ;;  %4832 = vmatprep.subr.bf16.mxu1 %v6782_v6  ;;  %v6854_v60 = vld [vmem:[#allocation6 + $0x62c] ss:$16 sps:$4 sm:$0xff]   ;;  %v6849_v6 = vld [vmem:[#allocation6 + $0x620] ss:$16 sps:$4 sm:$0xff]  }
 0x1fe   : > { %4489 = vmatpush1.bf16.msra.mxu0 %v6777_v11  ;;  %4833 = vmatpush1.bf16.msra.mxu1 %v6780_v7  ;;  %v6852_v11 = vld [vmem:[#allocation6 + $0x628] ss:$16 sps:$4 sm:$0xff]   ;;  %v6857_v7 = vld [vmem:[#allocation6 + $0x644] ss:$16 sps:$4 sm:$0xff]  }
 0x1ff   : > { %4490 = vmatprep.subr.bf16.mxu0 %v6785_v8  ;;  %4834 = vmatprep.subr.bf16.mxu1 %v6788_v15  ;;  %v6860_v8 = vld [vmem:[#allocation6 + $0x64c] ss:$16 sps:$4 sm:$0xff]   ;;  %v6855_v15 = vld [vmem:[#allocation6 + $0x640] ss:$16 sps:$4 sm:$0xff]  }
 0x202   : > { %4491 = vmatpush1.bf16.msra.mxu0 %v6783_v17  ;;  %4835 = vmatpush1.bf16.msra.mxu1 %v6786_v19  ;;  %v6858_v17 = vld [vmem:[#allocation6 + $0x648] ss:$16 sps:$4 sm:$0xff]   ;;  %v6863_v19 = vld [vmem:[#allocation6 + $0x664] ss:$16 sps:$4 sm:$0xff]  }
 0x203   : > { %4492 = vmatprep.subr.bf16.mxu0 %v6791_v20  ;;  %4836 = vmatprep.subr.bf16.mxu1 %v6794_v21  ;;  %v6861_v20 = vld [vmem:[#allocation6 + $0x660] ss:$16 sps:$4 sm:$0xff]   ;;  %v6864_v21 = vld [vmem:[#allocation6 + $0x668] ss:$16 sps:$4 sm:$0xff]  }
 0x206   : > { %4493 = vmatpush1.bf16.msra.mxu0 %v6789_v0  ;;  %4837 = vmatpush1.bf16.msra.mxu1 %v6792_v23  ;;  %v6869_v0 = vld [vmem:[#allocation6 + $0x684] ss:$16 sps:$4 sm:$0xff]   ;;  %v6867_v23 = vld [vmem:[#allocation6 + $0x680] ss:$16 sps:$4 sm:$0xff]  }
 0x207   : > { %4494 = vmatprep.subr.bf16.mxu0 %v6797_v24  ;;  %4838 = vmatprep.subr.bf16.mxu1 %v6800_v26  ;;  %v6870_v24 = vld [vmem:[#allocation6 + $0x688] ss:$16 sps:$4 sm:$0xff]   ;;  %v6875_v26 = vld [vmem:[#allocation6 + $0x6a4] ss:$16 sps:$4 sm:$0xff]  }
 0x20a   : > { %4495 = vmatpush1.bf16.msra.mxu0 %v6795_v28  ;;  %4839 = vmatpush1.bf16.msra.mxu1 %v6798_v29  ;;  %v6878_v28 = vld [vmem:[#allocation6 + $0x6ac] ss:$16 sps:$4 sm:$0xff]   ;;  %v6873_v29 = vld [vmem:[#allocation6 + $0x6a0] ss:$16 sps:$4 sm:$0xff]  }
 0x20b   : > { %4496 = vmatprep.subr.bf16.mxu0 %v6803_v30  ;;  %4840 = vmatprep.subr.bf16.mxu1 %v6806_v31  ;;  %v6876_v30 = vld [vmem:[#allocation6 + $0x6a8] ss:$16 sps:$4 sm:$0xff]   ;;  %v6881_v31 = vld [vmem:[#allocation6 + $0x6c4] ss:$16 sps:$4 sm:$0xff]  }
 0x20e   : > { %4497 = vmatpush1.bf16.msra.mxu0 %v6801_v32  ;;  %4841 = vmatpush1.bf16.msra.mxu1 %v6804_v33  ;;  %v6884_v32 = vld [vmem:[#allocation6 + $0x6cc] ss:$16 sps:$4 sm:$0xff]   ;;  %v6879_v33 = vld [vmem:[#allocation6 + $0x6c0] ss:$16 sps:$4 sm:$0xff]  }
 0x20f   : > { %4498 = vmatprep.subr.bf16.mxu0 %v6809_v34  ;;  %4842 = vmatprep.subr.bf16.mxu1 %v6812_v35  ;;  %v6882_v34 = vld [vmem:[#allocation6 + $0x6c8] ss:$16 sps:$4 sm:$0xff]   ;;  %v6887_v35 = vld [vmem:[#allocation6 + $0x6e4] ss:$16 sps:$4 sm:$0xff]  }
 0x212   : > { %4499 = vmatpush1.bf16.msra.mxu0 %v6807_v38  ;;  %4843 = vmatpush1.bf16.msra.mxu1 %v6810_v36  ;;  %v6890_v38 = vld [vmem:[#allocation6 + $0x6ec] ss:$16 sps:$4 sm:$0xff]   ;;  %v6885_v36 = vld [vmem:[#allocation6 + $0x6e0] ss:$16 sps:$4 sm:$0xff]  }
 0x213   : > { %4500 = vmatprep.subr.bf16.mxu0 %v6815_v37  ;;  %4844 = vmatprep.subr.bf16.mxu1 %v6818_v39  ;;  %v6888_v37 = vld [vmem:[#allocation6 + $0x6e8] ss:$16 sps:$4 sm:$0xff]   ;;  %v6893_v39 = vld [vmem:[#allocation6 + $0x704] ss:$16 sps:$4 sm:$0xff]  }
 0x216   : > { %4501 = vmatpush1.bf16.msra.mxu0 %v6813_v40  ;;  %4845 = vmatpush1.bf16.msra.mxu1 %v6816_v41  ;;  %v6896_v40 = vld [vmem:[#allocation6 + $0x70c] ss:$16 sps:$4 sm:$0xff]   ;;  %v6891_v41 = vld [vmem:[#allocation6 + $0x700] ss:$16 sps:$4 sm:$0xff]  }
 0x217   : > { %4502 = vmatprep.subr.bf16.mxu0 %v6821_v43  ;;  %4846 = vmatprep.subr.bf16.mxu1 %v6824_v46  ;;  %v6894_v43 = vld [vmem:[#allocation6 + $0x708] ss:$16 sps:$4 sm:$0xff]   ;;  %v6899_v46 = vld [vmem:[#allocation6 + $0x724] ss:$16 sps:$4 sm:$0xff]  }
 0x21a   : > { %4503 = vmatpush1.bf16.msra.mxu0 %v6819_v45  ;;  %4847 = vmatpush1.bf16.msra.mxu1 %v6822_v48  ;;  %v6902_v45 = vld [vmem:[#allocation6 + $0x72c] ss:$16 sps:$4 sm:$0xff]   ;;  %v6897_v48 = vld [vmem:[#allocation6 + $0x720] ss:$16 sps:$4 sm:$0xff]  }
 0x21b   : > { %4504 = vmatprep.subr.bf16.mxu0 %v6827_v50  ;;  %4848 = vmatprep.subr.bf16.mxu1 %v6830_v51  ;;  %v6900_v50 = vld [vmem:[#allocation6 + $0x728] ss:$16 sps:$4 sm:$0xff]   ;;  %v6905_v51 = vld [vmem:[#allocation6 + $0x744] ss:$16 sps:$4 sm:$0xff]  }
 0x21e   : > { %4505 = vmatpush1.bf16.msra.mxu0 %v6825_v53  ;;  %4849 = vmatpush1.bf16.msra.mxu1 %v6828_v55  ;;  %v6908_v53 = vld [vmem:[#allocation6 + $0x74c] ss:$16 sps:$4 sm:$0xff]   ;;  %v6903_v55 = vld [vmem:[#allocation6 + $0x740] ss:$16 sps:$4 sm:$0xff]  }
 0x21f   : > { %4506 = vmatprep.subr.bf16.mxu0 %v6833_v59  ;;  %4850 = vmatprep.subr.bf16.mxu1 %v6836_v57  ;;  %v6906_v59 = vld [vmem:[#allocation6 + $0x748] ss:$16 sps:$4 sm:$0xff]   ;;  %v6911_v57 = vld [vmem:[#allocation6 + $0x764] ss:$16 sps:$4 sm:$0xff]  }
 0x222   : > { %4507 = vmatpush1.bf16.msra.mxu0 %v6831_v62  ;;  %4851 = vmatpush1.bf16.msra.mxu1 %v6834_v10  ;;  %v6914_v62 = vld [vmem:[#allocation6 + $0x76c] ss:$16 sps:$4 sm:$0xff]   ;;  %v6909_v10 = vld [vmem:[#allocation6 + $0x760] ss:$16 sps:$4 sm:$0xff]  }
 0x223   : > { %4508 = vmatprep.subr.bf16.mxu0 %v6839_v63  ;;  %4852 = vmatprep.subr.bf16.mxu1 %v6842_v18  ;;  %v6912_v63 = vld [vmem:[#allocation6 + $0x768] ss:$16 sps:$4 sm:$0xff]   ;;  %v6917_v18 = vld [vmem:[#allocation6 + $0x784] ss:$16 sps:$4 sm:$0xff]  }
 0x226   : > { %4509 = vmatpush1.bf16.msra.mxu0 %v6837_v1  ;;  %4853 = vmatpush1.bf16.msra.mxu1 %v6840_v2  ;;  %v6920_v1 = vld [vmem:[#allocation6 + $0x78c] ss:$16 sps:$4 sm:$0xff]   ;;  %v6915_v2 = vld [vmem:[#allocation6 + $0x780] ss:$16 sps:$4 sm:$0xff]  }
 0x227   : > { %4521 = vmatprep.subr.bf16.mxu0 %v6845_v27  ;;  %4865 = vmatprep.subr.bf16.mxu1 %v6848_v61  ;;  %v6918_v27 = vld [vmem:[#allocation6 + $0x788] ss:$16 sps:$4 sm:$0xff]   ;;  %v6923_v61 = vld [vmem:[#allocation6 + $0x7a4] ss:$16 sps:$4 sm:$0xff]  }
 0x229   : > { %4511 = vmatmul.mubr.bf16.vlgmr.msra.gmra.mrb[12].mxu0 %v7922_v56  ;;  %4855 = vmatmul.mubr.bf16.vlgmr.msra.gmra.mrb[20].mxu1 %v7922_v56  ;;  %v6866_v56 = vld [vmem:[#allocation6 + $0x66c] ss:$16 sps:$4 sm:$0xff]  }
 0x22a   : > { %4522 = vmatpush1.bf16.msra.mxu0 %v6843_v3  ;;  %4553 = vmatprep.mubr.bf16.mxu0 %v7958_v25  ;;  %v6926_v3 = vld [vmem:[#allocation6 + $0x7ac] ss:$16 sps:$4 sm:$0xff]  }
 0x22b   : > { %4866 = vmatpush1.bf16.msra.mxu1 %v6846_v4  ;;  %4897 = vmatprep.mubr.bf16.mxu1 %v7958_v25  ;;  %v6872_v25 = vld [vmem:[#allocation6 + $0x68c] ss:$16 sps:$4 sm:$0xff]   ;;  %v6921_v4 = vld [vmem:[#allocation6 + $0x7a0] ss:$16 sps:$4 sm:$0xff]  }
 0x22c   : > { %4523 = vmatprep.subr.bf16.mxu0 %v6851_v5  ;;  %4867 = vmatprep.subr.bf16.mxu1 %v6854_v60  ;;  %v6924_v5 = vld [vmem:[#allocation6 + $0x7a8] ss:$16 sps:$4 sm:$0xff]   ;;  %v6929_v60 = vld [vmem:[#allocation6 + $0x7c4] ss:$16 sps:$4 sm:$0xff]  }
 0x22e   : > { %4524 = vmatpush1.bf16.msra.mxu0 %v6849_v6  ;;  %v6932_v6 = vld [vmem:[#allocation6 + $0x7cc] ss:$16 sps:$4 sm:$0xff]  }
 0x22f   : > { %4868 = vmatpush1.bf16.msra.mxu1 %v6852_v11  ;;  %4525 = vmatprep.subr.bf16.mxu0 %v6857_v7  ;;  %v6927_v11 = vld [vmem:[#allocation6 + $0x7c0] ss:$16 sps:$4 sm:$0xff]   ;;  %v6930_v7 = vld [vmem:[#allocation6 + $0x7c8] ss:$16 sps:$4 sm:$0xff]  }
 0x230   : > { %4869 = vmatprep.subr.bf16.mxu1 %v6860_v8  ;;  %v6935_v8 = vld [vmem:[#allocation6 + $0x7e4] ss:$16 sps:$4 sm:$0xff]  }
 0x232   : > { %4526 = vmatpush1.bf16.msra.mxu0 %v6855_v15  ;;  %v6938_v15 = vld [vmem:[#allocation6 + $0x7ec] ss:$16 sps:$4 sm:$0xff]  }
 0x233   : > { %4870 = vmatpush1.bf16.msra.mxu1 %v6858_v17  ;;  %4527 = vmatprep.subr.bf16.mxu0 %v6863_v19  ;;  %v6933_v17 = vld [vmem:[#allocation6 + $0x7e0] ss:$16 sps:$4 sm:$0xff]   ;;  %v6936_v19 = vld [vmem:[#allocation6 + $0x7e8] ss:$16 sps:$4 sm:$0xff]  }
 0x234   : > { %4871 = vmatprep.subr.bf16.mxu1 %v6866_v56  ;;  %v6941_v56 = vld [vmem:[#allocation6 + $0x804] ss:$16 sps:$4 sm:$0xff]  }
 0x236   : > { %4528 = vmatpush1.bf16.msra.mxu0 %v6861_v20  ;;  %v6944_v20 = vld [vmem:[#allocation6 + $0x80c] ss:$16 sps:$4 sm:$0xff]  }
 0x237   : > { %4872 = vmatpush1.bf16.msra.mxu1 %v6864_v21  ;;  %4529 = vmatprep.subr.bf16.mxu0 %v6869_v0  ;;  %v6939_v21 = vld [vmem:[#allocation6 + $0x800] ss:$16 sps:$4 sm:$0xff]   ;;  %v6942_v0 = vld [vmem:[#allocation6 + $0x808] ss:$16 sps:$4 sm:$0xff]  }
 0x238   : > { %4873 = vmatprep.subr.bf16.mxu1 %v6872_v25  ;;  %v6947_v25 = vld [vmem:[#allocation6 + $0x824] ss:$16 sps:$4 sm:$0xff]  }
 0x23a   : > { %4530 = vmatpush1.bf16.msra.mxu0 %v6867_v23  ;;  %v6950_v23 = vld [vmem:[#allocation6 + $0x82c] ss:$16 sps:$4 sm:$0xff]  }
 0x23b   : > { %4874 = vmatpush1.bf16.msra.mxu1 %v6870_v24  ;;  %4531 = vmatprep.subr.bf16.mxu0 %v6875_v26  ;;  %v6945_v24 = vld [vmem:[#allocation6 + $0x820] ss:$16 sps:$4 sm:$0xff]   ;;  %v6948_v26 = vld [vmem:[#allocation6 + $0x828] ss:$16 sps:$4 sm:$0xff]  }
 0x23c   : > { %4875 = vmatprep.subr.bf16.mxu1 %v6878_v28  ;;  %v6953_v28 = vld [vmem:[#allocation6 + $0x844] ss:$16 sps:$4 sm:$0xff]  }
 0x23e   : > { %4532 = vmatpush1.bf16.msra.mxu0 %v6873_v29  ;;  %v6956_v29 = vld [vmem:[#allocation6 + $0x84c] ss:$16 sps:$4 sm:$0xff]  }
 0x23f   : > { %4876 = vmatpush1.bf16.msra.mxu1 %v6876_v30  ;;  %4533 = vmatprep.subr.bf16.mxu0 %v6881_v31  ;;  %v6951_v30 = vld [vmem:[#allocation6 + $0x840] ss:$16 sps:$4 sm:$0xff]   ;;  %v6954_v31 = vld [vmem:[#allocation6 + $0x848] ss:$16 sps:$4 sm:$0xff]  }
 0x240   : > { %4877 = vmatprep.subr.bf16.mxu1 %v6884_v32  ;;  %v6959_v32 = vld [vmem:[#allocation6 + $0x864] ss:$16 sps:$4 sm:$0xff]  }
 0x242   : > { %4534 = vmatpush1.bf16.msra.mxu0 %v6879_v33  ;;  %v6957_v33 = vld [vmem:[#allocation6 + $0x860] ss:$16 sps:$4 sm:$0xff]  }
 0x243   : > { %4878 = vmatpush1.bf16.msra.mxu1 %v6882_v34  ;;  %4535 = vmatprep.subr.bf16.mxu0 %v6887_v35  ;;  %v6960_v34 = vld [vmem:[#allocation6 + $0x868] ss:$16 sps:$4 sm:$0xff]   ;;  %v6965_v35 = vld [vmem:[#allocation6 + $0x884] ss:$16 sps:$4 sm:$0xff]  }
 0x244   : > { %4879 = vmatprep.subr.bf16.mxu1 %v6890_v38  ;;  %v6968_v38 = vld [vmem:[#allocation6 + $0x88c] ss:$16 sps:$4 sm:$0xff]  }
 0x246   : > { %4536 = vmatpush1.bf16.msra.mxu0 %v6885_v36  ;;  %v6966_v36 = vld [vmem:[#allocation6 + $0x888] ss:$16 sps:$4 sm:$0xff]  }
 0x247   : > { %4880 = vmatpush1.bf16.msra.mxu1 %v6888_v37  ;;  %4537 = vmatprep.subr.bf16.mxu0 %v6893_v39  ;;  %v6971_v37 = vld [vmem:[#allocation6 + $0x8a4] ss:$16 sps:$4 sm:$0xff]   ;;  %v6974_v39 = vld [vmem:[#allocation6 + $0x8ac] ss:$16 sps:$4 sm:$0xff]  }
 0x248   : > { %4881 = vmatprep.subr.bf16.mxu1 %v6896_v40  ;;  %v6969_v40 = vld [vmem:[#allocation6 + $0x8a0] ss:$16 sps:$4 sm:$0xff]  }
 0x24a   : > { %4538 = vmatpush1.bf16.msra.mxu0 %v6891_v41  ;;  %v6972_v41 = vld [vmem:[#allocation6 + $0x8a8] ss:$16 sps:$4 sm:$0xff]  }
 0x24b   : > { %4882 = vmatpush1.bf16.msra.mxu1 %v6894_v43  ;;  %4539 = vmatprep.subr.bf16.mxu0 %v6899_v46  ;;  %v6977_v43 = vld [vmem:[#allocation6 + $0x8c4] ss:$16 sps:$4 sm:$0xff]   ;;  %v6980_v46 = vld [vmem:[#allocation6 + $0x8cc] ss:$16 sps:$4 sm:$0xff]  }
 0x24c   : > { %4883 = vmatprep.subr.bf16.mxu1 %v6902_v45  ;;  %v6975_v45 = vld [vmem:[#allocation6 + $0x8c0] ss:$16 sps:$4 sm:$0xff]  }
 0x24e   : > { %4540 = vmatpush1.bf16.msra.mxu0 %v6897_v48  ;;  %v6978_v48 = vld [vmem:[#allocation6 + $0x8c8] ss:$16 sps:$4 sm:$0xff]  }
 0x24f   : > { %4884 = vmatpush1.bf16.msra.mxu1 %v6900_v50  ;;  %4541 = vmatprep.subr.bf16.mxu0 %v6905_v51  ;;  %v6983_v50 = vld [vmem:[#allocation6 + $0x8e4] ss:$16 sps:$4 sm:$0xff]   ;;  %v6986_v51 = vld [vmem:[#allocation6 + $0x8ec] ss:$16 sps:$4 sm:$0xff]  }
 0x250   : > { %4885 = vmatprep.subr.bf16.mxu1 %v6908_v53  ;;  %v6981_v53 = vld [vmem:[#allocation6 + $0x8e0] ss:$16 sps:$4 sm:$0xff]  }
 0x252   : > { %4542 = vmatpush1.bf16.msra.mxu0 %v6903_v55  ;;  %v6984_v55 = vld [vmem:[#allocation6 + $0x8e8] ss:$16 sps:$4 sm:$0xff]  }
 0x253   : > { %4886 = vmatpush1.bf16.msra.mxu1 %v6906_v59  ;;  %4543 = vmatprep.subr.bf16.mxu0 %v6911_v57  ;;  %v6989_v59 = vld [vmem:[#allocation6 + $0x904] ss:$16 sps:$4 sm:$0xff]   ;;  %v6992_v57 = vld [vmem:[#allocation6 + $0x90c] ss:$16 sps:$4 sm:$0xff]  }
 0x254   : > { %4887 = vmatprep.subr.bf16.mxu1 %v6914_v62  ;;  %v6987_v62 = vld [vmem:[#allocation6 + $0x900] ss:$16 sps:$4 sm:$0xff]  }
 0x256   : > { %4544 = vmatpush1.bf16.msra.mxu0 %v6909_v10  ;;  %v6990_v10 = vld [vmem:[#allocation6 + $0x908] ss:$16 sps:$4 sm:$0xff]  }
 0x257   : > { %4888 = vmatpush1.bf16.msra.mxu1 %v6912_v63  ;;  %4545 = vmatprep.subr.bf16.mxu0 %v6917_v18  ;;  %v6995_v63 = vld [vmem:[#allocation6 + $0x924] ss:$16 sps:$4 sm:$0xff]   ;;  %v6998_v18 = vld [vmem:[#allocation6 + $0x92c] ss:$16 sps:$4 sm:$0xff]  }
 0x258   : > { %4889 = vmatprep.subr.bf16.mxu1 %v6920_v1  ;;  %v6993_v1 = vld [vmem:[#allocation6 + $0x920] ss:$16 sps:$4 sm:$0xff]  }
 0x25a   : > { %4546 = vmatpush1.bf16.msra.mxu0 %v6915_v2  ;;  %v6996_v2 = vld [vmem:[#allocation6 + $0x928] ss:$16 sps:$4 sm:$0xff]  }
 0x25b   : > { %4890 = vmatpush1.bf16.msra.mxu1 %v6918_v27  ;;  %4547 = vmatprep.subr.bf16.mxu0 %v6923_v61  ;;  %v7001_v27 = vld [vmem:[#allocation6 + $0x944] ss:$16 sps:$4 sm:$0xff]   ;;  %v7004_v61 = vld [vmem:[#allocation6 + $0x94c] ss:$16 sps:$4 sm:$0xff]  }
 0x25c   : > { %4891 = vmatprep.subr.bf16.mxu1 %v6926_v3  ;;  %v6999_v3 = vld [vmem:[#allocation6 + $0x940] ss:$16 sps:$4 sm:$0xff]  }
 0x25e   : > { %4548 = vmatpush1.bf16.msra.mxu0 %v6921_v4  ;;  %v7002_v4 = vld [vmem:[#allocation6 + $0x948] ss:$16 sps:$4 sm:$0xff]  }
 0x25f   : > { %4892 = vmatpush1.bf16.msra.mxu1 %v6924_v5  ;;  %4549 = vmatprep.subr.bf16.mxu0 %v6929_v60  ;;  %v7007_v5 = vld [vmem:[#allocation6 + $0x964] ss:$16 sps:$4 sm:$0xff]   ;;  %v7010_v60 = vld [vmem:[#allocation6 + $0x96c] ss:$16 sps:$4 sm:$0xff]  }
 0x260   : > { %4893 = vmatprep.subr.bf16.mxu1 %v6932_v6  ;;  %v7005_v6 = vld [vmem:[#allocation6 + $0x960] ss:$16 sps:$4 sm:$0xff]  }
 0x262   : > { %4550 = vmatpush1.bf16.msra.mxu0 %v6927_v11  ;;  %v7008_v11 = vld [vmem:[#allocation6 + $0x968] ss:$16 sps:$4 sm:$0xff]  }
 0x263   : > { %4894 = vmatpush1.bf16.msra.mxu1 %v6930_v7  ;;  %4551 = vmatprep.subr.bf16.mxu0 %v6935_v8  ;;  %v7013_v7 = vld [vmem:[#allocation6 + $0x984] ss:$16 sps:$4 sm:$0xff]   ;;  %v7016_v8 = vld [vmem:[#allocation6 + $0x98c] ss:$16 sps:$4 sm:$0xff]  }
 0x264   : > { %4895 = vmatprep.subr.bf16.mxu1 %v6938_v15  ;;  %v7011_v15 = vld [vmem:[#allocation6 + $0x980] ss:$16 sps:$4 sm:$0xff]  }
 0x266   : > { %4552 = vmatpush1.bf16.msra.mxu0 %v6933_v17  ;;  %v7014_v17 = vld [vmem:[#allocation6 + $0x988] ss:$16 sps:$4 sm:$0xff]  }
 0x267   : > { %4896 = vmatpush1.bf16.msra.mxu1 %v6936_v19  ;;  %4564 = vmatprep.subr.bf16.mxu0 %v6941_v56  ;;  %v7019_v19 = vld [vmem:[#allocation6 + $0x9a4] ss:$16 sps:$4 sm:$0xff]   ;;  %v7022_v56 = vld [vmem:[#allocation6 + $0x9ac] ss:$16 sps:$4 sm:$0xff]  }
 0x268   : > { %4908 = vmatprep.subr.bf16.mxu1 %v6944_v20  ;;  %v7017_v20 = vld [vmem:[#allocation6 + $0x9a0] ss:$16 sps:$4 sm:$0xff]  }
 0x269   : > { %4554 = vmatmul.mubr.bf16.vlgmr.msra.gmra.mrb[12].mxu0 %v7956_v22 }
 0x26a   : > { %4898 = vmatmul.mubr.bf16.vlgmr.msra.gmra.mrb[20].mxu1 %v7956_v22  ;;  %4565 = vmatpush1.bf16.msra.mxu0 %v6939_v21  ;;  %v6962_v22 = vld [vmem:[#allocation6 + $0x86c] ss:$16 sps:$4 sm:$0xff]   ;;  %v7020_v21 = vld [vmem:[#allocation6 + $0x9a8] ss:$16 sps:$4 sm:$0xff]  }
 0x26b   : > { %4596 = vmatprep.mubr.bf16.mxu0 %v7951_v58  ;;  %4909 = vmatpush1.bf16.msra.mxu1 %v6942_v0  ;;  %v7025_v0 = vld [vmem:[#allocation6 + $0x9c4] ss:$16 sps:$4 sm:$0xff]  }
 0x26c   : > { %4940 = vmatprep.mubr.bf16.mxu1 %v7951_v58  ;;  %4566 = vmatprep.subr.bf16.mxu0 %v6947_v25  ;;  %v6963_v58 = vld [vmem:[#allocation6 + $0x880] ss:$16 sps:$4 sm:$0xff]   ;;  %v7028_v25 = vld [vmem:[#allocation6 + $0x9cc] ss:$16 sps:$4 sm:$0xff]  }
 0x26d   : > { %4910 = vmatprep.subr.bf16.mxu1 %v6950_v23  ;;  %v7023_v23 = vld [vmem:[#allocation6 + $0x9c0] ss:$16 sps:$4 sm:$0xff]  }
 0x26e   : > { %4567 = vmatpush1.bf16.msra.mxu0 %v6945_v24  ;;  %v7026_v24 = vld [vmem:[#allocation6 + $0x9c8] ss:$16 sps:$4 sm:$0xff]  }
 0x26f   : > { %4911 = vmatpush1.bf16.msra.mxu1 %v6948_v26  ;;  %4568 = vmatprep.subr.bf16.mxu0 %v6953_v28  ;;  %v7031_v26 = vld [vmem:[#allocation6 + $0x9e4] ss:$16 sps:$4 sm:$0xff]   ;;  %v7034_v28 = vld [vmem:[#allocation6 + $0x9ec] ss:$16 sps:$4 sm:$0xff]  }
 0x270   : > { %4912 = vmatprep.subr.bf16.mxu1 %v6956_v29  ;;  %v7029_v29 = vld [vmem:[#allocation6 + $0x9e0] ss:$16 sps:$4 sm:$0xff]  }
 0x272   : > { %4569 = vmatpush1.bf16.msra.mxu0 %v6951_v30  ;;  %v7032_v30 = vld [vmem:[#allocation6 + $0x9e8] ss:$16 sps:$4 sm:$0xff]  }
 0x273   : > { %4913 = vmatpush1.bf16.msra.mxu1 %v6954_v31  ;;  %4570 = vmatprep.subr.bf16.mxu0 %v6959_v32  ;;  %v7037_v31 = vld [vmem:[#allocation6 + $0xa04] ss:$16 sps:$4 sm:$0xff]   ;;  %v7040_v32 = vld [vmem:[#allocation6 + $0xa0c] ss:$16 sps:$4 sm:$0xff]  }
 0x274   : > { %4914 = vmatprep.subr.bf16.mxu1 %v6962_v22  ;;  %v7035_v22 = vld [vmem:[#allocation6 + $0xa00] ss:$16 sps:$4 sm:$0xff]  }
 0x276   : > { %4571 = vmatpush1.bf16.msra.mxu0 %v6957_v33  ;;  %v7038_v33 = vld [vmem:[#allocation6 + $0xa08] ss:$16 sps:$4 sm:$0xff]  }
 0x277   : > { %4915 = vmatpush1.bf16.msra.mxu1 %v6960_v34  ;;  %4572 = vmatprep.subr.bf16.mxu0 %v6965_v35  ;;  %v7043_v34 = vld [vmem:[#allocation6 + $0xa24] ss:$16 sps:$4 sm:$0xff]   ;;  %v7046_v35 = vld [vmem:[#allocation6 + $0xa2c] ss:$16 sps:$4 sm:$0xff]  }
 0x278   : > { %4916 = vmatprep.subr.bf16.mxu1 %v6968_v38  ;;  %v7041_v38 = vld [vmem:[#allocation6 + $0xa20] ss:$16 sps:$4 sm:$0xff]  }
 0x27a   : > { %4573 = vmatpush1.bf16.msra.mxu0 %v6963_v58  ;;  %v7044_v58 = vld [vmem:[#allocation6 + $0xa28] ss:$16 sps:$4 sm:$0xff]  }
 0x27b   : > { %4917 = vmatpush1.bf16.msra.mxu1 %v6966_v36  ;;  %4574 = vmatprep.subr.bf16.mxu0 %v6971_v37  ;;  %v7049_v36 = vld [vmem:[#allocation6 + $0xa44] ss:$16 sps:$4 sm:$0xff]   ;;  %v7052_v37 = vld [vmem:[#allocation6 + $0xa4c] ss:$16 sps:$4 sm:$0xff]  }
 0x27c   : > { %4918 = vmatprep.subr.bf16.mxu1 %v6974_v39  ;;  %v7047_v39 = vld [vmem:[#allocation6 + $0xa40] ss:$16 sps:$4 sm:$0xff]  }
 0x27e   : > { %4575 = vmatpush1.bf16.msra.mxu0 %v6969_v40  ;;  %v7050_v40 = vld [vmem:[#allocation6 + $0xa48] ss:$16 sps:$4 sm:$0xff]  }
 0x27f   : > { %4919 = vmatpush1.bf16.msra.mxu1 %v6972_v41  ;;  %4576 = vmatprep.subr.bf16.mxu0 %v6977_v43  ;;  %v7055_v41 = vld [vmem:[#allocation6 + $0xa64] ss:$16 sps:$4 sm:$0xff]   ;;  %v7053_v43 = vld [vmem:[#allocation6 + $0xa60] ss:$16 sps:$4 sm:$0xff]  }
 0x280   : > { %4920 = vmatprep.subr.bf16.mxu1 %v6980_v46  ;;  %v7056_v46 = vld [vmem:[#allocation6 + $0xa68] ss:$16 sps:$4 sm:$0xff]  }
 0x282   : > { %4577 = vmatpush1.bf16.msra.mxu0 %v6975_v45  ;;  %v7061_v45 = vld [vmem:[#allocation6 + $0xa84] ss:$16 sps:$4 sm:$0xff]  }
 0x283   : > { %4921 = vmatpush1.bf16.msra.mxu1 %v6978_v48  ;;  %4578 = vmatprep.subr.bf16.mxu0 %v6983_v50  ;;  %v7064_v48 = vld [vmem:[#allocation6 + $0xa8c] ss:$16 sps:$4 sm:$0xff]   ;;  %v7062_v50 = vld [vmem:[#allocation6 + $0xa88] ss:$16 sps:$4 sm:$0xff]  }
 0x284   : > { %4922 = vmatprep.subr.bf16.mxu1 %v6986_v51  ;;  %v7067_v51 = vld [vmem:[#allocation6 + $0xaa4] ss:$16 sps:$4 sm:$0xff]  }
 0x286   : > { %4579 = vmatpush1.bf16.msra.mxu0 %v6981_v53  ;;  %v7070_v53 = vld [vmem:[#allocation6 + $0xaac] ss:$16 sps:$4 sm:$0xff]  }
 0x287   : > { %4923 = vmatpush1.bf16.msra.mxu1 %v6984_v55  ;;  %4580 = vmatprep.subr.bf16.mxu0 %v6989_v59  ;;  %v7065_v55 = vld [vmem:[#allocation6 + $0xaa0] ss:$16 sps:$4 sm:$0xff]   ;;  %v7068_v59 = vld [vmem:[#allocation6 + $0xaa8] ss:$16 sps:$4 sm:$0xff]  }
 0x288   : > { %4924 = vmatprep.subr.bf16.mxu1 %v6992_v57  ;;  %v7073_v57 = vld [vmem:[#allocation6 + $0xac4] ss:$16 sps:$4 sm:$0xff]  }
 0x28a   : > { %4581 = vmatpush1.bf16.msra.mxu0 %v6987_v62  ;;  %v7076_v62 = vld [vmem:[#allocation6 + $0xacc] ss:$16 sps:$4 sm:$0xff]  }
 0x28b   : > { %4925 = vmatpush1.bf16.msra.mxu1 %v6990_v10  ;;  %4582 = vmatprep.subr.bf16.mxu0 %v6995_v63  ;;  %v7071_v10 = vld [vmem:[#allocation6 + $0xac0] ss:$16 sps:$4 sm:$0xff]   ;;  %v7074_v63 = vld [vmem:[#allocation6 + $0xac8] ss:$16 sps:$4 sm:$0xff]  }
 0x28c   : > { %4926 = vmatprep.subr.bf16.mxu1 %v6998_v18  ;;  %v7079_v18 = vld [vmem:[#allocation6 + $0xae4] ss:$16 sps:$4 sm:$0xff]  }
 0x28e   : > { %4583 = vmatpush1.bf16.msra.mxu0 %v6993_v1  ;;  %v7082_v1 = vld [vmem:[#allocation6 + $0xaec] ss:$16 sps:$4 sm:$0xff]  }
 0x28f   : > { %4927 = vmatpush1.bf16.msra.mxu1 %v6996_v2  ;;  %4584 = vmatprep.subr.bf16.mxu0 %v7001_v27  ;;  %v7077_v2 = vld [vmem:[#allocation6 + $0xae0] ss:$16 sps:$4 sm:$0xff]   ;;  %v7080_v27 = vld [vmem:[#allocation6 + $0xae8] ss:$16 sps:$4 sm:$0xff]  }
 0x290   : > { %4928 = vmatprep.subr.bf16.mxu1 %v7004_v61  ;;  %v7085_v61 = vld [vmem:[#allocation6 + $0xb04] ss:$16 sps:$4 sm:$0xff]  }
 0x292   : > { %4585 = vmatpush1.bf16.msra.mxu0 %v6999_v3  ;;  %v7088_v3 = vld [vmem:[#allocation6 + $0xb0c] ss:$16 sps:$4 sm:$0xff]  }
 0x293   : > { %4929 = vmatpush1.bf16.msra.mxu1 %v7002_v4  ;;  %4586 = vmatprep.subr.bf16.mxu0 %v7007_v5  ;;  %v7083_v4 = vld [vmem:[#allocation6 + $0xb00] ss:$16 sps:$4 sm:$0xff]   ;;  %v7086_v5 = vld [vmem:[#allocation6 + $0xb08] ss:$16 sps:$4 sm:$0xff]  }
 0x294   : > { %4930 = vmatprep.subr.bf16.mxu1 %v7010_v60  ;;  %v7091_v60 = vld [vmem:[#allocation6 + $0xb24] ss:$16 sps:$4 sm:$0xff]  }
 0x296   : > { %4587 = vmatpush1.bf16.msra.mxu0 %v7005_v6  ;;  %v7094_v6 = vld [vmem:[#allocation6 + $0xb2c] ss:$16 sps:$4 sm:$0xff]  }
 0x297   : > { %4931 = vmatpush1.bf16.msra.mxu1 %v7008_v11  ;;  %4588 = vmatprep.subr.bf16.mxu0 %v7013_v7  ;;  %v7089_v11 = vld [vmem:[#allocation6 + $0xb20] ss:$16 sps:$4 sm:$0xff]   ;;  %v7092_v7 = vld [vmem:[#allocation6 + $0xb28] ss:$16 sps:$4 sm:$0xff]  }
 0x298   : > { %4932 = vmatprep.subr.bf16.mxu1 %v7016_v8  ;;  %v7097_v8 = vld [vmem:[#allocation6 + $0xb44] ss:$16 sps:$4 sm:$0xff]  }
 0x29a   : > { %4589 = vmatpush1.bf16.msra.mxu0 %v7011_v15  ;;  %v7100_v15 = vld [vmem:[#allocation6 + $0xb4c] ss:$16 sps:$4 sm:$0xff]  }
 0x29b   : > { %4933 = vmatpush1.bf16.msra.mxu1 %v7014_v17  ;;  %4590 = vmatprep.subr.bf16.mxu0 %v7019_v19  ;;  %v7095_v17 = vld [vmem:[#allocation6 + $0xb40] ss:$16 sps:$4 sm:$0xff]   ;;  %v7098_v19 = vld [vmem:[#allocation6 + $0xb48] ss:$16 sps:$4 sm:$0xff]  }
 0x29c   : > { %4934 = vmatprep.subr.bf16.mxu1 %v7022_v56  ;;  %v7103_v56 = vld [vmem:[#allocation6 + $0xb64] ss:$16 sps:$4 sm:$0xff]  }
 0x29e   : > { %4591 = vmatpush1.bf16.msra.mxu0 %v7017_v20  ;;  %v7106_v20 = vld [vmem:[#allocation6 + $0xb6c] ss:$16 sps:$4 sm:$0xff]  }
 0x29f   : > { %4935 = vmatpush1.bf16.msra.mxu1 %v7020_v21  ;;  %4592 = vmatprep.subr.bf16.mxu0 %v7025_v0  ;;  %v7101_v21 = vld [vmem:[#allocation6 + $0xb60] ss:$16 sps:$4 sm:$0xff]   ;;  %v7104_v0 = vld [vmem:[#allocation6 + $0xb68] ss:$16 sps:$4 sm:$0xff]  }
 0x2a0   : > { %4936 = vmatprep.subr.bf16.mxu1 %v7028_v25  ;;  %v7109_v25 = vld [vmem:[#allocation6 + $0xb84] ss:$16 sps:$4 sm:$0xff]  }
 0x2a2   : > { %4593 = vmatpush1.bf16.msra.mxu0 %v7023_v23  ;;  %v7112_v23 = vld [vmem:[#allocation6 + $0xb8c] ss:$16 sps:$4 sm:$0xff]  }
 0x2a3   : > { %4937 = vmatpush1.bf16.msra.mxu1 %v7026_v24  ;;  %4594 = vmatprep.subr.bf16.mxu0 %v7031_v26  ;;  %v7107_v24 = vld [vmem:[#allocation6 + $0xb80] ss:$16 sps:$4 sm:$0xff]   ;;  %v7110_v26 = vld [vmem:[#allocation6 + $0xb88] ss:$16 sps:$4 sm:$0xff]  }
 0x2a4   : > { %4938 = vmatprep.subr.bf16.mxu1 %v7034_v28  ;;  %v7115_v28 = vld [vmem:[#allocation6 + $0xba4] ss:$16 sps:$4 sm:$0xff]  }
 0x2a6   : > { %4595 = vmatpush1.bf16.msra.mxu0 %v7029_v29  ;;  %v7118_v29 = vld [vmem:[#allocation6 + $0xbac] ss:$16 sps:$4 sm:$0xff]  }
 0x2a7   : > { %4939 = vmatpush1.bf16.msra.mxu1 %v7032_v30  ;;  %4607 = vmatprep.subr.bf16.mxu0 %v7037_v31  ;;  %v7113_v30 = vld [vmem:[#allocation6 + $0xba0] ss:$16 sps:$4 sm:$0xff]   ;;  %v7116_v31 = vld [vmem:[#allocation6 + $0xba8] ss:$16 sps:$4 sm:$0xff]  }
 0x2a8   : > { %4951 = vmatprep.subr.bf16.mxu1 %v7040_v32  ;;  %v7121_v32 = vld [vmem:[#allocation6 + $0xbc4] ss:$16 sps:$4 sm:$0xff]  }
 0x2a9   : > { %4597 = vmatmul.mubr.bf16.vlgmr.msra.gmra.mrb[12].mxu0 %v7942_v52 }
 0x2aa   : > { %4941 = vmatmul.mubr.bf16.vlgmr.msra.gmra.mrb[20].mxu1 %v7942_v52  ;;  %4608 = vmatpush1.bf16.msra.mxu0 %v7035_v22  ;;  %v7058_v52 = vld [vmem:[#allocation6 + $0xa6c] ss:$16 sps:$4 sm:$0xff]  }
 0x2ab   : > { %4639 = vmatprep.mubr.bf16.mxu0 %v7970_v14  ;;  %4952 = vmatpush1.bf16.msra.mxu1 %v7038_v33  ;;  %v7124_v22 = vld [vmem:[#allocation6 + $0xbcc] ss:$16 sps:$4 sm:$0xff]   ;;  %v7119_v33 = vld [vmem:[#allocation6 + $0xbc0] ss:$16 sps:$4 sm:$0xff]  }
 0x2ac   : > { %4983 = vmatprep.mubr.bf16.mxu1 %v7970_v14  ;;  %4609 = vmatprep.subr.bf16.mxu0 %v7043_v34  ;;  %v7059_v14 = vld [vmem:[#allocation6 + $0xa80] ss:$16 sps:$4 sm:$0xff]   ;;  %v7122_v34 = vld [vmem:[#allocation6 + $0xbc8] ss:$16 sps:$4 sm:$0xff]  }
 0x2ad   : > { %4953 = vmatprep.subr.bf16.mxu1 %v7046_v35  ;;  %v7127_v35 = vld [vmem:[#allocation6 + $0xbe4] ss:$16 sps:$4 sm:$0xff]  }
 0x2ae   : > { %4610 = vmatpush1.bf16.msra.mxu0 %v7041_v38  ;;  %v7130_v38 = vld [vmem:[#allocation6 + $0xbec] ss:$16 sps:$4 sm:$0xff]  }
 0x2af   : > { %4954 = vmatpush1.bf16.msra.mxu1 %v7044_v58  ;;  %4611 = vmatprep.subr.bf16.mxu0 %v7049_v36  ;;  %v7125_v58 = vld [vmem:[#allocation6 + $0xbe0] ss:$16 sps:$4 sm:$0xff]   ;;  %v7128_v36 = vld [vmem:[#allocation6 + $0xbe8] ss:$16 sps:$4 sm:$0xff]  }
 0x2b0   : > { %4955 = vmatprep.subr.bf16.mxu1 %v7052_v37  ;;  %v7133_v37 = vld [vmem:[#allocation6 + $0xc04] ss:$16 sps:$4 sm:$0xff]  }
 0x2b2   : > { %4612 = vmatpush1.bf16.msra.mxu0 %v7047_v39  ;;  %v7136_v39 = vld [vmem:[#allocation6 + $0xc0c] ss:$16 sps:$4 sm:$0xff]  }
 0x2b3   : > { %4956 = vmatpush1.bf16.msra.mxu1 %v7050_v40  ;;  %4613 = vmatprep.subr.bf16.mxu0 %v7055_v41  ;;  %v7131_v40 = vld [vmem:[#allocation6 + $0xc00] ss:$16 sps:$4 sm:$0xff]   ;;  %v7134_v41 = vld [vmem:[#allocation6 + $0xc08] ss:$16 sps:$4 sm:$0xff]  }
 0x2b4   : > { %4957 = vmatprep.subr.bf16.mxu1 %v7058_v52  ;;  %v7139_v52 = vld [vmem:[#allocation6 + $0xc24] ss:$16 sps:$4 sm:$0xff]  }
 0x2b6   : > { %4614 = vmatpush1.bf16.msra.mxu0 %v7053_v43  ;;  %v7142_v43 = vld [vmem:[#allocation6 + $0xc2c] ss:$16 sps:$4 sm:$0xff]  }
 0x2b7   : > { %4958 = vmatpush1.bf16.msra.mxu1 %v7056_v46  ;;  %4615 = vmatprep.subr.bf16.mxu0 %v7061_v45  ;;  %v7137_v46 = vld [vmem:[#allocation6 + $0xc20] ss:$16 sps:$4 sm:$0xff]   ;;  %v7140_v45 = vld [vmem:[#allocation6 + $0xc28] ss:$16 sps:$4 sm:$0xff]  }
 0x2b8   : > { %4959 = vmatprep.subr.bf16.mxu1 %v7064_v48  ;;  %v7145_v48 = vld [vmem:[#allocation6 + $0xc44] ss:$16 sps:$4 sm:$0xff]  }
 0x2ba   : > { %4616 = vmatpush1.bf16.msra.mxu0 %v7059_v14  ;;  %v7148_v14 = vld [vmem:[#allocation6 + $0xc4c] ss:$16 sps:$4 sm:$0xff]  }
 0x2bb   : > { %4960 = vmatpush1.bf16.msra.mxu1 %v7062_v50  ;;  %4617 = vmatprep.subr.bf16.mxu0 %v7067_v51  ;;  %v7143_v50 = vld [vmem:[#allocation6 + $0xc40] ss:$16 sps:$4 sm:$0xff]   ;;  %v7146_v51 = vld [vmem:[#allocation6 + $0xc48] ss:$16 sps:$4 sm:$0xff]  }
 0x2bc   : > { %4961 = vmatprep.subr.bf16.mxu1 %v7070_v53  ;;  %v7151_v53 = vld [vmem:[#allocation6 + $0xc64] ss:$16 sps:$4 sm:$0xff]  }
 0x2be   : > { %4618 = vmatpush1.bf16.msra.mxu0 %v7065_v55  ;;  %v7149_v55 = vld [vmem:[#allocation6 + $0xc60] ss:$16 sps:$4 sm:$0xff]  }
 0x2bf   : > { %4962 = vmatpush1.bf16.msra.mxu1 %v7068_v59  ;;  %4619 = vmatprep.subr.bf16.mxu0 %v7073_v57  ;;  %v7152_v59 = vld [vmem:[#allocation6 + $0xc68] ss:$16 sps:$4 sm:$0xff]   ;;  %v7157_v57 = vld [vmem:[#allocation6 + $0xc84] ss:$16 sps:$4 sm:$0xff]  }
 0x2c0   : > { %4963 = vmatprep.subr.bf16.mxu1 %v7076_v62  ;;  %v7160_v62 = vld [vmem:[#allocation6 + $0xc8c] ss:$16 sps:$4 sm:$0xff]  }
 0x2c2   : > { %4620 = vmatpush1.bf16.msra.mxu0 %v7071_v10  ;;  %v7158_v10 = vld [vmem:[#allocation6 + $0xc88] ss:$16 sps:$4 sm:$0xff]  }
 0x2c3   : > { %4964 = vmatpush1.bf16.msra.mxu1 %v7074_v63  ;;  %4621 = vmatprep.subr.bf16.mxu0 %v7079_v18  ;;  %v7163_v63 = vld [vmem:[#allocation6 + $0xca4] ss:$16 sps:$4 sm:$0xff]   ;;  %v7166_v18 = vld [vmem:[#allocation6 + $0xcac] ss:$16 sps:$4 sm:$0xff]  }
 0x2c4   : > { %4965 = vmatprep.subr.bf16.mxu1 %v7082_v1  ;;  %v7161_v1 = vld [vmem:[#allocation6 + $0xca0] ss:$16 sps:$4 sm:$0xff]  }
 0x2c6   : > { %4622 = vmatpush1.bf16.msra.mxu0 %v7077_v2  ;;  %v7164_v2 = vld [vmem:[#allocation6 + $0xca8] ss:$16 sps:$4 sm:$0xff]  }
 0x2c7   : > { %4966 = vmatpush1.bf16.msra.mxu1 %v7080_v27  ;;  %4623 = vmatprep.subr.bf16.mxu0 %v7085_v61  ;;  %v7169_v27 = vld [vmem:[#allocation6 + $0xcc4] ss:$16 sps:$4 sm:$0xff]   ;;  %v7172_v61 = vld [vmem:[#allocation6 + $0xccc] ss:$16 sps:$4 sm:$0xff]  }
 0x2c8   : > { %4967 = vmatprep.subr.bf16.mxu1 %v7088_v3  ;;  %v7167_v3 = vld [vmem:[#allocation6 + $0xcc0] ss:$16 sps:$4 sm:$0xff]  }
 0x2ca   : > { %4624 = vmatpush1.bf16.msra.mxu0 %v7083_v4  ;;  %v7170_v4 = vld [vmem:[#allocation6 + $0xcc8] ss:$16 sps:$4 sm:$0xff]  }
 0x2cb   : > { %4968 = vmatpush1.bf16.msra.mxu1 %v7086_v5  ;;  %4625 = vmatprep.subr.bf16.mxu0 %v7091_v60  ;;  %v7175_v5 = vld [vmem:[#allocation6 + $0xce4] ss:$16 sps:$4 sm:$0xff]   ;;  %v7178_v60 = vld [vmem:[#allocation6 + $0xcec] ss:$16 sps:$4 sm:$0xff]  }
 0x2cc   : > { %4969 = vmatprep.subr.bf16.mxu1 %v7094_v6  ;;  %v7173_v6 = vld [vmem:[#allocation6 + $0xce0] ss:$16 sps:$4 sm:$0xff]  }
 0x2ce   : > { %4626 = vmatpush1.bf16.msra.mxu0 %v7089_v11  ;;  %v7176_v11 = vld [vmem:[#allocation6 + $0xce8] ss:$16 sps:$4 sm:$0xff]  }
 0x2cf   : > { %4970 = vmatpush1.bf16.msra.mxu1 %v7092_v7  ;;  %4627 = vmatprep.subr.bf16.mxu0 %v7097_v8  ;;  %v7181_v7 = vld [vmem:[#allocation6 + $0xd04] ss:$16 sps:$4 sm:$0xff]   ;;  %v7184_v8 = vld [vmem:[#allocation6 + $0xd0c] ss:$16 sps:$4 sm:$0xff]  }
 0x2d0   : > { %4971 = vmatprep.subr.bf16.mxu1 %v7100_v15  ;;  %v7179_v15 = vld [vmem:[#allocation6 + $0xd00] ss:$16 sps:$4 sm:$0xff]  }
 0x2d2   : > { %4628 = vmatpush1.bf16.msra.mxu0 %v7095_v17  ;;  %v7182_v17 = vld [vmem:[#allocation6 + $0xd08] ss:$16 sps:$4 sm:$0xff]  }
 0x2d3   : > { %4972 = vmatpush1.bf16.msra.mxu1 %v7098_v19  ;;  %4629 = vmatprep.subr.bf16.mxu0 %v7103_v56  ;;  %v7187_v19 = vld [vmem:[#allocation6 + $0xd24] ss:$16 sps:$4 sm:$0xff]   ;;  %v7190_v56 = vld [vmem:[#allocation6 + $0xd2c] ss:$16 sps:$4 sm:$0xff]  }
 0x2d4   : > { %4973 = vmatprep.subr.bf16.mxu1 %v7106_v20  ;;  %v7185_v20 = vld [vmem:[#allocation6 + $0xd20] ss:$16 sps:$4 sm:$0xff]  }
 0x2d6   : > { %4630 = vmatpush1.bf16.msra.mxu0 %v7101_v21  ;;  %v7188_v21 = vld [vmem:[#allocation6 + $0xd28] ss:$16 sps:$4 sm:$0xff]  }
 0x2d7   : > { %4974 = vmatpush1.bf16.msra.mxu1 %v7104_v0  ;;  %4631 = vmatprep.subr.bf16.mxu0 %v7109_v25  ;;  %v7193_v0 = vld [vmem:[#allocation6 + $0xd44] ss:$16 sps:$4 sm:$0xff]   ;;  %v7196_v25 = vld [vmem:[#allocation6 + $0xd4c] ss:$16 sps:$4 sm:$0xff]  }
 0x2d8   : > { %4975 = vmatprep.subr.bf16.mxu1 %v7112_v23  ;;  %v7191_v23 = vld [vmem:[#allocation6 + $0xd40] ss:$16 sps:$4 sm:$0xff]  }
 0x2da   : > { %4632 = vmatpush1.bf16.msra.mxu0 %v7107_v24  ;;  %v7194_v24 = vld [vmem:[#allocation6 + $0xd48] ss:$16 sps:$4 sm:$0xff]  }
 0x2db   : > { %4976 = vmatpush1.bf16.msra.mxu1 %v7110_v26  ;;  %4633 = vmatprep.subr.bf16.mxu0 %v7115_v28  ;;  %v7199_v26 = vld [vmem:[#allocation6 + $0xd64] ss:$16 sps:$4 sm:$0xff]   ;;  %v7202_v28 = vld [vmem:[#allocation6 + $0xd6c] ss:$16 sps:$4 sm:$0xff]  }
 0x2dc   : > { %4977 = vmatprep.subr.bf16.mxu1 %v7118_v29  ;;  %v7197_v29 = vld [vmem:[#allocation6 + $0xd60] ss:$16 sps:$4 sm:$0xff]  }
 0x2de   : > { %4634 = vmatpush1.bf16.msra.mxu0 %v7113_v30  ;;  %v7200_v30 = vld [vmem:[#allocation6 + $0xd68] ss:$16 sps:$4 sm:$0xff]  }
 0x2df   : > { %4978 = vmatpush1.bf16.msra.mxu1 %v7116_v31  ;;  %4635 = vmatprep.subr.bf16.mxu0 %v7121_v32  ;;  %v7205_v31 = vld [vmem:[#allocation6 + $0xd84] ss:$16 sps:$4 sm:$0xff]   ;;  %v7208_v32 = vld [vmem:[#allocation6 + $0xd8c] ss:$16 sps:$4 sm:$0xff]  }
 0x2e0   : > { %4979 = vmatprep.subr.bf16.mxu1 %v7124_v22  ;;  %v7203_v22 = vld [vmem:[#allocation6 + $0xd80] ss:$16 sps:$4 sm:$0xff]  }
 0x2e2   : > { %4636 = vmatpush1.bf16.msra.mxu0 %v7119_v33  ;;  %v7206_v33 = vld [vmem:[#allocation6 + $0xd88] ss:$16 sps:$4 sm:$0xff]  }
 0x2e3   : > { %4980 = vmatpush1.bf16.msra.mxu1 %v7122_v34  ;;  %4637 = vmatprep.subr.bf16.mxu0 %v7127_v35  ;;  %v7211_v34 = vld [vmem:[#allocation6 + $0xda4] ss:$16 sps:$4 sm:$0xff]   ;;  %v7214_v35 = vld [vmem:[#allocation6 + $0xdac] ss:$16 sps:$4 sm:$0xff]  }
 0x2e4   : > { %4981 = vmatprep.subr.bf16.mxu1 %v7130_v38  ;;  %v7209_v38 = vld [vmem:[#allocation6 + $0xda0] ss:$16 sps:$4 sm:$0xff]  }
 0x2e6   : > { %4638 = vmatpush1.bf16.msra.mxu0 %v7125_v58  ;;  %v7212_v58 = vld [vmem:[#allocation6 + $0xda8] ss:$16 sps:$4 sm:$0xff]  }
 0x2e7   : > { %4982 = vmatpush1.bf16.msra.mxu1 %v7128_v36  ;;  %4650 = vmatprep.subr.bf16.mxu0 %v7133_v37  ;;  %v7217_v36 = vld [vmem:[#allocation6 + $0xdc4] ss:$16 sps:$4 sm:$0xff]   ;;  %v7220_v37 = vld [vmem:[#allocation6 + $0xdcc] ss:$16 sps:$4 sm:$0xff]  }
 0x2e8   : > { %4994 = vmatprep.subr.bf16.mxu1 %v7136_v39  ;;  %v7215_v39 = vld [vmem:[#allocation6 + $0xdc0] ss:$16 sps:$4 sm:$0xff]  }
 0x2e9   : > { %4640 = vmatmul.mubr.bf16.vlgmr.msra.gmra.mrb[12].mxu0 %v7968_v9 }
 0x2ea   : > { %4984 = vmatmul.mubr.bf16.vlgmr.msra.gmra.mrb[20].mxu1 %v7968_v9  ;;  %4651 = vmatpush1.bf16.msra.mxu0 %v7131_v40  ;;  %v7154_v9 = vld [vmem:[#allocation6 + $0xc6c] ss:$16 sps:$4 sm:$0xff]   ;;  %v7218_v40 = vld [vmem:[#allocation6 + $0xdc8] ss:$16 sps:$4 sm:$0xff]  }
 0x2eb   : > { %4682 = vmatprep.mubr.bf16.mxu0 %v7966_v49  ;;  %4995 = vmatpush1.bf16.msra.mxu1 %v7134_v41  ;;  %v7223_v41 = vld [vmem:[#allocation6 + $0xde4] ss:$16 sps:$4 sm:$0xff]  }
 0x2ec   : > { %5026 = vmatprep.mubr.bf16.mxu1 %v7966_v49  ;;  %4652 = vmatprep.subr.bf16.mxu0 %v7139_v52  ;;  %v7155_v49 = vld [vmem:[#allocation6 + $0xc80] ss:$16 sps:$4 sm:$0xff]   ;;  %v7226_v52 = vld [vmem:[#allocation6 + $0xdec] ss:$16 sps:$4 sm:$0xff]  }
 0x2ed   : > { %4996 = vmatprep.subr.bf16.mxu1 %v7142_v43  ;;  %v7221_v43 = vld [vmem:[#allocation6 + $0xde0] ss:$16 sps:$4 sm:$0xff]  }
 0x2ee   : > { %4653 = vmatpush1.bf16.msra.mxu0 %v7137_v46  ;;  %v7224_v46 = vld [vmem:[#allocation6 + $0xde8] ss:$16 sps:$4 sm:$0xff]  }
 0x2ef   : > { %4997 = vmatpush1.bf16.msra.mxu1 %v7140_v45  ;;  %4654 = vmatprep.subr.bf16.mxu0 %v7145_v48  ;;  %v7229_v45 = vld [vmem:[#allocation6 + $0xe04] ss:$16 sps:$4 sm:$0xff]   ;;  %v7232_v48 = vld [vmem:[#allocation6 + $0xe0c] ss:$16 sps:$4 sm:$0xff]  }
 0x2f0   : > { %4998 = vmatprep.subr.bf16.mxu1 %v7148_v14  ;;  %v7227_v14 = vld [vmem:[#allocation6 + $0xe00] ss:$16 sps:$4 sm:$0xff]  }
 0x2f2   : > { %4655 = vmatpush1.bf16.msra.mxu0 %v7143_v50  ;;  %v7230_v50 = vld [vmem:[#allocation6 + $0xe08] ss:$16 sps:$4 sm:$0xff]  }
 0x2f3   : > { %4999 = vmatpush1.bf16.msra.mxu1 %v7146_v51  ;;  %4656 = vmatprep.subr.bf16.mxu0 %v7151_v53  ;;  %v7235_v51 = vld [vmem:[#allocation6 + $0xe24] ss:$16 sps:$4 sm:$0xff]   ;;  %v7238_v53 = vld [vmem:[#allocation6 + $0xe2c] ss:$16 sps:$4 sm:$0xff]  }
 0x2f4   : > { %5000 = vmatprep.subr.bf16.mxu1 %v7154_v9  ;;  %v7233_v9 = vld [vmem:[#allocation6 + $0xe20] ss:$16 sps:$4 sm:$0xff]  }
 0x2f6   : > { %4657 = vmatpush1.bf16.msra.mxu0 %v7149_v55  ;;  %v7236_v55 = vld [vmem:[#allocation6 + $0xe28] ss:$16 sps:$4 sm:$0xff]  }
 0x2f7   : > { %5001 = vmatpush1.bf16.msra.mxu1 %v7152_v59  ;;  %4658 = vmatprep.subr.bf16.mxu0 %v7157_v57  ;;  %v7241_v59 = vld [vmem:[#allocation6 + $0xe44] ss:$16 sps:$4 sm:$0xff]   ;;  %v7244_v57 = vld [vmem:[#allocation6 + $0xe4c] ss:$16 sps:$4 sm:$0xff]  }
 0x2f8   : > { %5002 = vmatprep.subr.bf16.mxu1 %v7160_v62  ;;  %v7239_v62 = vld [vmem:[#allocation6 + $0xe40] ss:$16 sps:$4 sm:$0xff]  }
 0x2fa   : > { %4659 = vmatpush1.bf16.msra.mxu0 %v7155_v49  ;;  %v7242_v49 = vld [vmem:[#allocation6 + $0xe48] ss:$16 sps:$4 sm:$0xff]  }
 0x2fb   : > { %5003 = vmatpush1.bf16.msra.mxu1 %v7158_v10  ;;  %4660 = vmatprep.subr.bf16.mxu0 %v7163_v63  ;;  %v7247_v10 = vld [vmem:[#allocation6 + $0xe64] ss:$16 sps:$4 sm:$0xff]   ;;  %v7245_v63 = vld [vmem:[#allocation6 + $0xe60] ss:$16 sps:$4 sm:$0xff]  }
 0x2fc   : > { %5004 = vmatprep.subr.bf16.mxu1 %v7166_v18  ;;  %v7248_v18 = vld [vmem:[#allocation6 + $0xe68] ss:$16 sps:$4 sm:$0xff]  }
 0x2fe   : > { %4661 = vmatpush1.bf16.msra.mxu0 %v7161_v1  ;;  %v7253_v1 = vld [vmem:[#allocation6 + $0xe84] ss:$16 sps:$4 sm:$0xff]  }
 0x2ff   : > { %5005 = vmatpush1.bf16.msra.mxu1 %v7164_v2  ;;  %4662 = vmatprep.subr.bf16.mxu0 %v7169_v27  ;;  %v7256_v2 = vld [vmem:[#allocation6 + $0xe8c] ss:$16 sps:$4 sm:$0xff]   ;;  %v7254_v27 = vld [vmem:[#allocation6 + $0xe88] ss:$16 sps:$4 sm:$0xff]  }
 0x300   : > { %5006 = vmatprep.subr.bf16.mxu1 %v7172_v61  ;;  %v7259_v61 = vld [vmem:[#allocation6 + $0xea4] ss:$16 sps:$4 sm:$0xff]  }
 0x302   : > { %4663 = vmatpush1.bf16.msra.mxu0 %v7167_v3  ;;  %v7262_v3 = vld [vmem:[#allocation6 + $0xeac] ss:$16 sps:$4 sm:$0xff]  }
 0x303   : > { %5007 = vmatpush1.bf16.msra.mxu1 %v7170_v4  ;;  %4664 = vmatprep.subr.bf16.mxu0 %v7175_v5  ;;  %v7257_v4 = vld [vmem:[#allocation6 + $0xea0] ss:$16 sps:$4 sm:$0xff]   ;;  %v7260_v5 = vld [vmem:[#allocation6 + $0xea8] ss:$16 sps:$4 sm:$0xff]  }
 0x304   : > { %5008 = vmatprep.subr.bf16.mxu1 %v7178_v60  ;;  %v7265_v60 = vld [vmem:[#allocation6 + $0xec4] ss:$16 sps:$4 sm:$0xff]  }
 0x306   : > { %4665 = vmatpush1.bf16.msra.mxu0 %v7173_v6  ;;  %v7268_v6 = vld [vmem:[#allocation6 + $0xecc] ss:$16 sps:$4 sm:$0xff]  }
 0x307   : > { %5009 = vmatpush1.bf16.msra.mxu1 %v7176_v11  ;;  %4666 = vmatprep.subr.bf16.mxu0 %v7181_v7  ;;  %v7263_v11 = vld [vmem:[#allocation6 + $0xec0] ss:$16 sps:$4 sm:$0xff]   ;;  %v7266_v7 = vld [vmem:[#allocation6 + $0xec8] ss:$16 sps:$4 sm:$0xff]  }
 0x308   : > { %5010 = vmatprep.subr.bf16.mxu1 %v7184_v8  ;;  %v7271_v8 = vld [vmem:[#allocation6 + $0xee4] ss:$16 sps:$4 sm:$0xff]  }
 0x30a   : > { %4667 = vmatpush1.bf16.msra.mxu0 %v7179_v15  ;;  %v7274_v15 = vld [vmem:[#allocation6 + $0xeec] ss:$16 sps:$4 sm:$0xff]  }
 0x30b   : > { %5011 = vmatpush1.bf16.msra.mxu1 %v7182_v17  ;;  %4668 = vmatprep.subr.bf16.mxu0 %v7187_v19  ;;  %v7269_v17 = vld [vmem:[#allocation6 + $0xee0] ss:$16 sps:$4 sm:$0xff]   ;;  %v7272_v19 = vld [vmem:[#allocation6 + $0xee8] ss:$16 sps:$4 sm:$0xff]  }
 0x30c   : > { %5012 = vmatprep.subr.bf16.mxu1 %v7190_v56  ;;  %v7277_v56 = vld [vmem:[#allocation6 + $0xf04] ss:$16 sps:$4 sm:$0xff]  }
 0x30e   : > { %4669 = vmatpush1.bf16.msra.mxu0 %v7185_v20  ;;  %v7280_v20 = vld [vmem:[#allocation6 + $0xf0c] ss:$16 sps:$4 sm:$0xff]  }
 0x30f   : > { %5013 = vmatpush1.bf16.msra.mxu1 %v7188_v21  ;;  %4670 = vmatprep.subr.bf16.mxu0 %v7193_v0  ;;  %v7275_v21 = vld [vmem:[#allocation6 + $0xf00] ss:$16 sps:$4 sm:$0xff]   ;;  %v7278_v0 = vld [vmem:[#allocation6 + $0xf08] ss:$16 sps:$4 sm:$0xff]  }
 0x310   : > { %5014 = vmatprep.subr.bf16.mxu1 %v7196_v25  ;;  %v7283_v25 = vld [vmem:[#allocation6 + $0xf24] ss:$16 sps:$4 sm:$0xff]  }
 0x312   : > { %4671 = vmatpush1.bf16.msra.mxu0 %v7191_v23  ;;  %v7286_v23 = vld [vmem:[#allocation6 + $0xf2c] ss:$16 sps:$4 sm:$0xff]  }
 0x313   : > { %5015 = vmatpush1.bf16.msra.mxu1 %v7194_v24  ;;  %4672 = vmatprep.subr.bf16.mxu0 %v7199_v26  ;;  %v7281_v24 = vld [vmem:[#allocation6 + $0xf20] ss:$16 sps:$4 sm:$0xff]   ;;  %v7284_v26 = vld [vmem:[#allocation6 + $0xf28] ss:$16 sps:$4 sm:$0xff]  }
 0x314   : > { %5016 = vmatprep.subr.bf16.mxu1 %v7202_v28  ;;  %v7289_v28 = vld [vmem:[#allocation6 + $0xf44] ss:$16 sps:$4 sm:$0xff]  }
 0x316   : > { %4673 = vmatpush1.bf16.msra.mxu0 %v7197_v29  ;;  %v7292_v29 = vld [vmem:[#allocation6 + $0xf4c] ss:$16 sps:$4 sm:$0xff]  }
 0x317   : > { %5017 = vmatpush1.bf16.msra.mxu1 %v7200_v30  ;;  %4674 = vmatprep.subr.bf16.mxu0 %v7205_v31  ;;  %v7287_v30 = vld [vmem:[#allocation6 + $0xf40] ss:$16 sps:$4 sm:$0xff]   ;;  %v7290_v31 = vld [vmem:[#allocation6 + $0xf48] ss:$16 sps:$4 sm:$0xff]  }
 0x318   : > { %5018 = vmatprep.subr.bf16.mxu1 %v7208_v32  ;;  %v7295_v32 = vld [vmem:[#allocation6 + $0xf64] ss:$16 sps:$4 sm:$0xff]  }
 0x31a   : > { %4675 = vmatpush1.bf16.msra.mxu0 %v7203_v22  ;;  %v7298_v22 = vld [vmem:[#allocation6 + $0xf6c] ss:$16 sps:$4 sm:$0xff]  }
 0x31b   : > { %5019 = vmatpush1.bf16.msra.mxu1 %v7206_v33  ;;  %4676 = vmatprep.subr.bf16.mxu0 %v7211_v34  ;;  %v7293_v33 = vld [vmem:[#allocation6 + $0xf60] ss:$16 sps:$4 sm:$0xff]   ;;  %v7296_v34 = vld [vmem:[#allocation6 + $0xf68] ss:$16 sps:$4 sm:$0xff]  }
 0x31c   : > { %5020 = vmatprep.subr.bf16.mxu1 %v7214_v35  ;;  %v7301_v35 = vld [vmem:[#allocation6 + $0xf84] ss:$16 sps:$4 sm:$0xff]  }
 0x31e   : > { %4677 = vmatpush1.bf16.msra.mxu0 %v7209_v38  ;;  %v7304_v38 = vld [vmem:[#allocation6 + $0xf8c] ss:$16 sps:$4 sm:$0xff]  }
 0x31f   : > { %5021 = vmatpush1.bf16.msra.mxu1 %v7212_v58  ;;  %4678 = vmatprep.subr.bf16.mxu0 %v7217_v36  ;;  %v7299_v58 = vld [vmem:[#allocation6 + $0xf80] ss:$16 sps:$4 sm:$0xff]   ;;  %v7302_v36 = vld [vmem:[#allocation6 + $0xf88] ss:$16 sps:$4 sm:$0xff]  }
 0x320   : > { %5022 = vmatprep.subr.bf16.mxu1 %v7220_v37  ;;  %v7307_v37 = vld [vmem:[#allocation6 + $0xfa4] ss:$16 sps:$4 sm:$0xff]  }
 0x322   : > { %4679 = vmatpush1.bf16.msra.mxu0 %v7215_v39  ;;  %v7310_v39 = vld [vmem:[#allocation6 + $0xfac] ss:$16 sps:$4 sm:$0xff]  }
 0x323   : > { %5023 = vmatpush1.bf16.msra.mxu1 %v7218_v40  ;;  %4680 = vmatprep.subr.bf16.mxu0 %v7223_v41  ;;  %v7305_v40 = vld [vmem:[#allocation6 + $0xfa0] ss:$16 sps:$4 sm:$0xff]   ;;  %v7308_v41 = vld [vmem:[#allocation6 + $0xfa8] ss:$16 sps:$4 sm:$0xff]  }
 0x324   : > { %5024 = vmatprep.subr.bf16.mxu1 %v7226_v52  ;;  %v7313_v52 = vld [vmem:[#allocation6 + $0xfc4] ss:$16 sps:$4 sm:$0xff]  }
 0x326   : > { %4681 = vmatpush1.bf16.msra.mxu0 %v7221_v43  ;;  %v7316_v43 = vld [vmem:[#allocation6 + $0xfcc] ss:$16 sps:$4 sm:$0xff]  }
 0x327   : > { %5025 = vmatpush1.bf16.msra.mxu1 %v7224_v46  ;;  %4693 = vmatprep.subr.bf16.mxu0 %v7229_v45  ;;  %v7311_v46 = vld [vmem:[#allocation6 + $0xfc0] ss:$16 sps:$4 sm:$0xff]   ;;  %v7314_v45 = vld [vmem:[#allocation6 + $0xfc8] ss:$16 sps:$4 sm:$0xff]  }
 0x328   : > { %5037 = vmatprep.subr.bf16.mxu1 %v7232_v48  ;;  %v7319_v48 = vld [vmem:[#allocation6 + $0xfe4] ss:$16 sps:$4 sm:$0xff]  }
 0x329   : > { %4683 = vmatmul.mubr.bf16.vlgmr.msra.gmra.mrb[12].mxu0 %v7962_v44 }
 0x32a   : > { %5027 = vmatmul.mubr.bf16.vlgmr.msra.gmra.mrb[20].mxu1 %v7962_v44  ;;  %4694 = vmatpush1.bf16.msra.mxu0 %v7227_v14  ;;  %v7250_v44 = vld [vmem:[#allocation6 + $0xe6c] ss:$16 sps:$4 sm:$0xff]  }
 0x32b   : > { %4725 = vmatprep.mubr.bf16.mxu0 %v7978_v54  ;;  %5038 = vmatpush1.bf16.msra.mxu1 %v7230_v50  ;;  %v7322_v14 = vld [vmem:[#allocation6 + $0xfec] ss:$16 sps:$4 sm:$0xff]   ;;  %v7317_v50 = vld [vmem:[#allocation6 + $0xfe0] ss:$16 sps:$4 sm:$0xff]  }
 0x32c   : > { %5069 = vmatprep.mubr.bf16.mxu1 %v7978_v54  ;;  %4695 = vmatprep.subr.bf16.mxu0 %v7235_v51  ;;  %v7251_v54 = vld [vmem:[#allocation6 + $0xe80] ss:$16 sps:$4 sm:$0xff]   ;;  %v7320_v51 = vld [vmem:[#allocation6 + $0xfe8] ss:$16 sps:$4 sm:$0xff]  }
 0x32d   : > { %5039 = vmatprep.subr.bf16.mxu1 %v7238_v53  ;;  %v7323_v53 = vld [vmem:[#allocation9 + $0x40] sm:$0xff]  }
 0x32e   : > { %4696 = vmatpush1.bf16.msra.mxu0 %v7233_v9  ;;  %v7324_v9 = vld [vmem:[#allocation9 + $0xc0] sm:$0xff]  }
 0x32f   : > { %5040 = vmatpush1.bf16.msra.mxu1 %v7236_v55  ;;  %4697 = vmatprep.subr.bf16.mxu0 %v7241_v59  ;;  %v7325_v55 = vld [vmem:[#allocation9] sm:$0xff]  }
 0x330   : > { %5041 = vmatprep.subr.bf16.mxu1 %v7244_v57  ;;  %v7326_v59 = vld [vmem:[#allocation9 + $0x80] sm:$0xff]   ;;  %v7327_v57 = vld [vmem:[#allocation9 + $0x48] sm:$0xff]  }
 0x332   : > { %4698 = vmatpush1.bf16.msra.mxu0 %v7239_v62  ;;  %v7328_v62 = vld [vmem:[#allocation9 + $0xc8] sm:$0xff]  }
 0x333   : > { %5042 = vmatpush1.bf16.msra.mxu1 %v7242_v49  ;;  %4699 = vmatprep.subr.bf16.mxu0 %v7247_v10  ;;  %v7329_v49 = vld [vmem:[#allocation9 + $0x8] sm:$0xff]  }
 0x334   : > { %5043 = vmatprep.subr.bf16.mxu1 %v7250_v44  ;;  %v7330_v10 = vld [vmem:[#allocation9 + $0x88] sm:$0xff]   ;;  %v7331_v44 = vld [vmem:[#allocation9 + $0x50] sm:$0xff]  }
 0x336   : > { %4700 = vmatpush1.bf16.msra.mxu0 %v7245_v63  ;;  %v7332_v63 = vld [vmem:[#allocation9 + $0xd0] sm:$0xff]  }
 0x337   : > { %5044 = vmatpush1.bf16.msra.mxu1 %v7248_v18  ;;  %4701 = vmatprep.subr.bf16.mxu0 %v7253_v1  ;;  %v7333_v18 = vld [vmem:[#allocation9 + $0x10] sm:$0xff]  }
 0x338   : > { %5045 = vmatprep.subr.bf16.mxu1 %v7256_v2  ;;  %v7334_v1 = vld [vmem:[#allocation9 + $0x90] sm:$0xff]   ;;  %v7335_v2 = vld [vmem:[#allocation9 + $0x58] sm:$0xff]  }
 0x33a   : > { %4702 = vmatpush1.bf16.msra.mxu0 %v7251_v54  ;;  %v7336_v54 = vld [vmem:[#allocation9 + $0xd8] sm:$0xff]  }
 0x33b   : > { %5046 = vmatpush1.bf16.msra.mxu1 %v7254_v27  ;;  %4703 = vmatprep.subr.bf16.mxu0 %v7259_v61  ;;  %v7337_v27 = vld [vmem:[#allocation9 + $0x18] sm:$0xff]   ;;  %v7339_v61 = vld [vmem:[#allocation9 + $0x60] sm:$0xff]  }
 0x33c   : > { %5047 = vmatprep.subr.bf16.mxu1 %v7262_v3  ;;  %v7340_v3 = vld [vmem:[#allocation9 + $0xe0] sm:$0xff]  }
 0x33e   : > { %4704 = vmatpush1.bf16.msra.mxu0 %v7257_v4  ;;  %v7341_v4 = vld [vmem:[#allocation9 + $0x20] sm:$0xff]  }
 0x33f   : > { %5048 = vmatpush1.bf16.msra.mxu1 %v7260_v5  ;;  %4705 = vmatprep.subr.bf16.mxu0 %v7265_v60  ;;  %v7342_v5 = vld [vmem:[#allocation9 + $0xa0] sm:$0xff]   ;;  %v7343_v60 = vld [vmem:[#allocation9 + $0x68] sm:$0xff]  }
 0x340   : > { %5049 = vmatprep.subr.bf16.mxu1 %v7268_v6  ;;  %v7344_v6 = vld [vmem:[#allocation9 + $0xe8] sm:$0xff]  }
 0x342   : > { %4706 = vmatpush1.bf16.msra.mxu0 %v7263_v11  ;;  %v7345_v11 = vld [vmem:[#allocation9 + $0x28] sm:$0xff]  }
 0x343   : > { %5050 = vmatpush1.bf16.msra.mxu1 %v7266_v7  ;;  %4707 = vmatprep.subr.bf16.mxu0 %v7271_v8  ;;  %v7346_v7 = vld [vmem:[#allocation9 + $0xa8] sm:$0xff]   ;;  %v7347_v8 = vld [vmem:[#allocation9 + $0x70] sm:$0xff]  }
 0x344   : > { %5051 = vmatprep.subr.bf16.mxu1 %v7274_v15  ;;  %v7348_v15 = vld [vmem:[#allocation9 + $0xf0] sm:$0xff]  }
 0x346   : > { %4708 = vmatpush1.bf16.msra.mxu0 %v7269_v17  ;;  %v7349_v17 = vld [vmem:[#allocation9 + $0x30] sm:$0xff]  }
 0x347   : > { %5052 = vmatpush1.bf16.msra.mxu1 %v7272_v19  ;;  %4709 = vmatprep.subr.bf16.mxu0 %v7277_v56  ;;  %v7350_v19 = vld [vmem:[#allocation9 + $0xb0] sm:$0xff]   ;;  %v7351_v56 = vld [vmem:[#allocation9 + $0x78] sm:$0xff]  }
 0x348   : > { %5053 = vmatprep.subr.bf16.mxu1 %v7280_v20  ;;  %v7352_v20 = vld [vmem:[#allocation9 + $0xf8] sm:$0xff]  }
 0x34a   : > { %4710 = vmatpush1.bf16.msra.mxu0 %v7275_v21  ;;  %v7353_v21 = vld [vmem:[#allocation9 + $0x38] sm:$0xff]  }
 0x34b   : > { %5054 = vmatpush1.bf16.msra.mxu1 %v7278_v0  ;;  %4711 = vmatprep.subr.bf16.mxu0 %v7283_v25  ;;  %v7354_v0 = vld [vmem:[#allocation9 + $0xb8] sm:$0xff]   ;;  %v7596_v25 = vmov 0.0  }
 0x34c   : > { %5055 = vmatprep.subr.bf16.mxu1 %v7286_v23  ;;  %v1810_v23 = vld [vmem:[#allocation7] sm:$0xf] }
 0x34e   : > { %4712 = vmatpush1.bf16.msra.mxu0 %v7281_v24  ;;  %v1815_v24 = vrot.slane %v1810_v23, %v7897_v12 }
 0x34f   : > { %5056 = vmatpush1.bf16.msra.mxu1 %v7284_v26  ;;  %4713 = vmatprep.subr.bf16.mxu0 %v7289_v28  ;;  %v1823_v26 = vrot.slane %v1810_v23, %v7915_v42  ;;  %v1819_v28 = vrot.slane %v1810_v23, %v7900_v13 }
 0x350   : > { %5057 = vmatprep.subr.bf16.mxu1 %v7292_v29  ;;  %v1827_v29 = vrot.slane %v1810_v23, %v7918_v47 }
 0x352   : > { %4714 = vmatpush1.bf16.msra.mxu0 %v7287_v30 }
 0x353   : > { %5058 = vmatpush1.bf16.msra.mxu1 %v7290_v31  ;;  %4715 = vmatprep.subr.bf16.mxu0 %v7295_v32 }
 0x354   : > { %5059 = vmatprep.subr.bf16.mxu1 %v7298_v22 }
 0x356   : > { %4716 = vmatpush1.bf16.msra.mxu0 %v7293_v33 }
 0x357   : > { %5060 = vmatpush1.bf16.msra.mxu1 %v7296_v34  ;;  %4717 = vmatprep.subr.bf16.mxu0 %v7301_v35 }
 0x358   : > { %5061 = vmatprep.subr.bf16.mxu1 %v7304_v38 }
 0x35a   : > { %4718 = vmatpush1.bf16.msra.mxu0 %v7299_v58 }
 0x35b   : > { %5062 = vmatpush1.bf16.msra.mxu1 %v7302_v36  ;;  %4719 = vmatprep.subr.bf16.mxu0 %v7307_v37 }
 0x35c   : > { %5063 = vmatprep.subr.bf16.mxu1 %v7310_v39 }
 0x35e   : > { %4720 = vmatpush1.bf16.msra.mxu0 %v7305_v40 }
 0x35f   : > { %5064 = vmatpush1.bf16.msra.mxu1 %v7308_v41  ;;  %4721 = vmatprep.subr.bf16.mxu0 %v7313_v52 }
 0x360   : > { %5065 = vmatprep.subr.bf16.mxu1 %v7316_v43 }
 0x362   : > { %4722 = vmatpush1.bf16.msra.mxu0 %v7311_v46 }
 0x363   : > { %5066 = vmatpush1.bf16.msra.mxu1 %v7314_v45  ;;  %4723 = vmatprep.subr.bf16.mxu0 %v7319_v48 }
 0x364   : > { %5067 = vmatprep.subr.bf16.mxu1 %v7322_v14 }
 0x366   : > { %4724 = vmatpush1.bf16.msra.mxu0 %v7317_v50 }
 0x367   : > { %5068 = vmatpush1.bf16.msra.mxu1 %v7320_v51  ;;  %6331 = vmatprep.subr.bf16.mxu0 %v7323_v53 }
 0x368   : > { %6353 = vmatprep.subr.bf16.mxu1 %v7324_v9  ;;  %v7355_v9 = vld [vmem:[%s8058_s7] sm:$0xff]  }
 0x369   : > { %4726 = vmatmul.mubr.bf16.vlgmr.msra.gmra.mrb[12].mxu0 %v7976_v16 }
 0x36a   : > { %5070 = vmatmul.mubr.bf16.vlgmr.msra.gmra.mrb[20].mxu1 %v7976_v16  ;;  %6332 = vmatpush3.bf16.msra.mxu0 %v7325_v55  ;;  %v7338_v16 = vld [vmem:[#allocation9 + $0x98] sm:$0xff]  }
 0x36b   : > { %6354 = vmatpush3.bf16.msra.mxu1 %v7326_v59  ;;  %6333 = vmatprep.subr.bf16.mxu0 %v7327_v57  ;;  %v7356_v59 = vld [vmem:[%s8058_s7 + $0x8] sm:$0xff]   ;;  %v7357_v57 = vld [vmem:[%s8058_s7 + $0x10] sm:$0xff]  }
 0x36c   : > { %6355 = vmatprep.subr.bf16.mxu1 %v7328_v62  ;;  %v7358_v62 = vld [vmem:[%s8058_s7 + $0x18] sm:$0xff]  }
 0x36e   : > { %6334 = vmatpush3.bf16.msra.mxu0 %v7329_v49  ;;  %v7359_v49 = vld [vmem:[%s8058_s7 + $0x20] sm:$0xff]  }
 0x36f   : > { %6356 = vmatpush3.bf16.msra.mxu1 %v7330_v10  ;;  %6335 = vmatprep.subr.bf16.mxu0 %v7331_v44  ;;  %v7360_v10 = vld [vmem:[%s8058_s7 + $0x28] sm:$0xff]   ;;  %v7361_v44 = vld [vmem:[%s8058_s7 + $0x30] sm:$0xff]  }
 0x370   : > { %6357 = vmatprep.subr.bf16.mxu1 %v7332_v63  ;;  %v7362_v63 = vld [vmem:[%s8058_s7 + $0x38] sm:$0xff]  }
 0x372   : > { %6336 = vmatpush3.bf16.msra.mxu0 %v7333_v18 }
 0x373   : > { %6358 = vmatpush3.bf16.msra.mxu1 %v7334_v1  ;;  %6337 = vmatprep.subr.bf16.mxu0 %v7335_v2  ;;  %v6287_v2 = vld [vmem:[#allocation10] ss:$0 sm:$0xff] }
 0x374   : > { %6359 = vmatprep.subr.bf16.mxu1 %v7336_v54 }
 0x376   : > { %6338 = vmatpush3.bf16.msra.mxu0 %v7337_v27 }
 0x377   : > { %6360 = vmatpush3.bf16.msra.mxu1 %v7338_v16  ;;  %6339 = vmatprep.subr.bf16.mxu0 %v7339_v61 }
 0x378   : > { %6361 = vmatprep.subr.bf16.mxu1 %v7340_v3 }
 0x37a   : > { %6340 = vmatpush3.bf16.msra.mxu0 %v7341_v4 }
 0x37b   : > { %6362 = vmatpush3.bf16.msra.mxu1 %v7342_v5  ;;  %6341 = vmatprep.subr.bf16.mxu0 %v7343_v60 }
 0x37c   : > { %6363 = vmatprep.subr.bf16.mxu1 %v7344_v6 }
 0x37e   : > { %6342 = vmatpush3.bf16.msra.mxu0 %v7345_v11 }
 0x37f   : > { %6364 = vmatpush3.bf16.msra.mxu1 %v7346_v7  ;;  %6343 = vmatprep.subr.bf16.mxu0 %v7347_v8 }
 0x380   : > { %6365 = vmatprep.subr.bf16.mxu1 %v7348_v15 }
 0x382   : > { %6344 = vmatpush3.bf16.msra.mxu0 %v7349_v17 }
 0x383   : > { %6366 = vmatpush3.bf16.msra.mxu1 %v7350_v19  ;;  %6345 = vmatprep.subr.bf16.mxu0 %v7351_v56 }
 0x384   : > { %6367 = vmatprep.subr.bf16.mxu1 %v7352_v20 }
 0x386   : > { %6346 = vmatpush3.bf16.msra.mxu0 %v7353_v21  ;;  %v6320_v21 = vld [vmem:[#allocation12] ss:$0 sm:$0xff] }
 0x387   : > { %6368 = vmatpush3.bf16.msra.mxu1 %v7354_v0  ;;  %6384 = vmatprep.subr.bf16.mxu0 %v7596_v25 }
 0x43c   : > { %v4727_v30 = vpop.f32.mrb[12].mxu0 }
 0x43d   : > { %v6404_v31 = vadd.f32 %v4727_v30, %v1815_v24  ;;  %v5071_v32 = vpop.f32.mrb[20].mxu1  ;;  %v4729_v22 = vpop.f32.mrb[13].mxu0 }
 0x43e   : > { %v6408_v33 = vadd.f32 %v5071_v32, %v1823_v26  ;;  %v6405_v34 = vadd.f32 %v4729_v22, %v1819_v28  ;;  %v5073_v35 = vpop.f32.mrb[21].mxu1  ;;  %v4731_v38 = vpop.f32.mrb[14].mxu0 }
 0x43f   : > { %v6409_v58 = vadd.f32 %v5073_v35, %v1827_v29  ;;  %v6406_v36 = vadd.f32 %v4731_v38, %v1815_v24  ;;  %v5075_v37 = vpop.f32.mrb[22].mxu1  ;;  %v4733_v39 = vpop.f32.mrb[15].mxu0  ;;  %v5080_v42 = vmax.f32 %v6404_v31, 0.0 }
 0x440   : > { %v6410_v40 = vadd.f32 %v5075_v37, %v1823_v26  ;;  %v6407_v12 = vadd.f32 %v4733_v39, %v1819_v28  ;;  %v5077_v41 = vpop.f32.mrb[23].mxu1  ;;  %v5082_v43 = vmax.f32 %v6408_v33, 0.0  ;;  %v5081_v47 = vmax.f32 %v6405_v34, 0.0 }
 0x441   : > { %v5084_v52 = vmax.f32 %v6406_v36, 0.0  ;;  %v6411_v13 = vadd.f32 %v5077_v41, %v1827_v29  ;;  %v5083_v48 = vmax.f32 %v6409_v58, 0.0 }
 0x442   : > { %v5086_v46 = vmax.f32 %v6410_v40, 0.0  ;;  %v5085_v45 = vmax.f32 %v6407_v12, 0.0 }
 0x443   : > { %v5088_v14 = vpack.c.bf16 %v5084_v52, %v5080_v42  ;;  %v5087_v50 = vmax.f32 %v6411_v13, 0.0 }
 0x444   : > { %v5090_v51 = vpack.c.bf16 %v5086_v46, %v5082_v43  ;;  %v5089_v53 = vpack.c.bf16 %v5085_v45, %v5081_v47 }
 0x445   : > { %v5091_v55 = vpack.c.bf16 %v5087_v50, %v5083_v48 }
 0x446   : > { %5387 = vmatprep.mubr.bf16.mxu0 %v5089_v53 }
 0x447   : > { %5428 = vmatprep.mubr.bf16.mxu1 %v5091_v55  ;;  %5388 = vmatmul.mubr.bf16.vlgmr.msra.gmra.mrb[16].mxu0 %v5088_v14 }
 0x448   : > { %5429 = vmatmul.mubr.bf16.vlgmr.msra.gmra.mrb[24].mxu1 %v5090_v51  ;;  %6385 = vmatpush3.bf16.msra.mxu0 %v7355_v9 }
 0x449   : > { %6386 = vmatprep.subr.bf16.mxu0 %v7596_v25  ;;  %6400 = vmatprep.mubr.msk.bf16.mxu0 %vm7597_vm1, %v7596_v25 }
 0x44c   : > { %6387 = vmatpush3.bf16.msra.mxu0 %v7356_v59 }
 0x44d   : > { %6388 = vmatprep.subr.bf16.mxu0 %v7596_v25 }
 0x450   : > { %6389 = vmatpush3.bf16.msra.mxu0 %v7357_v57 }
 0x451   : > { %6390 = vmatprep.subr.bf16.mxu0 %v7596_v25 }
 0x454   : > { %6391 = vmatpush3.bf16.msra.mxu0 %v7358_v62 }
 0x455   : > { %6392 = vmatprep.subr.bf16.mxu0 %v7596_v25 }
 0x458   : > { %6393 = vmatpush3.bf16.msra.mxu0 %v7359_v49 }
 0x459   : > { %6394 = vmatprep.subr.bf16.mxu0 %v7596_v25 }
 0x45c   : > { %6395 = vmatpush3.bf16.msra.mxu0 %v7360_v10 }
 0x45d   : > { %6396 = vmatprep.subr.bf16.mxu0 %v7596_v25 }
 0x460   : > { %6397 = vmatpush3.bf16.msra.mxu0 %v7361_v44 }
 0x461   : > { %6398 = vmatprep.subr.bf16.mxu0 %v7596_v25 }
 0x464   : > { %6399 = vmatpush3.bf16.msra.mxu0 %v7362_v63 }
 0x51a   : > { %v6347_v18 = vpop.f32.mrb[16].mxu0 }
 0x51b   : > { %v6369_v1 = vpop.f32.mrb[24].mxu1  ;;  %v6348_v54 = vpop.f32.mrb[17].mxu0 }
 0x51c   : > { %v6349_v27 = vadd.f32 %v6348_v54, %v6347_v18  ;;  %v6370_v16 = vpop.f32.mrb[25].mxu1  ;;  %v6350_v61 = vpop.f32.mrb[18].mxu0 }
 0x51d   : > { %v6371_v3 = vadd.f32 %v6370_v16, %v6369_v1  ;;  %v6372_v4 = vpop.f32.mrb[26].mxu1  ;;  %v6351_v5 = vpop.f32.mrb[19].mxu0 }
 0x51e   : > { %v5390_v60 = vadd.f32 %v6349_v27, %v6287_v2  ;;  %v6352_v6 = vadd.f32 %v6351_v5, %v6350_v61  ;;  %v6373_v11 = vpop.f32.mrb[27].mxu1 }
 0x51f   : > { %v6374_v7 = vadd.f32 %v6373_v11, %v6372_v4 }
 0x520   : > { %v5431_v8 = vadd.f32 %v6371_v3, %v5390_v60  ;;  %v5393_v15 = vadd.f32 %v6352_v6, %v6287_v2 }
 0x522   : > { %v5434_v17 = vadd.f32 %v6374_v7, %v5393_v15  ;;  %v5437_v19 = vmax.f32 %v5431_v8, 0.0 }
 0x524   : > { %v5438_v56 = vmax.f32 %v5434_v17, 0.0 }
 0x526   : > { %v5439_v20 = vpack.c.bf16 %v5438_v56, %v5437_v19 }
 0x528   : > { %6401 = vmatmul.mubr.bf16.vlgmr.msra.gmra.mrb[20].mxu0 %v5439_v20 }
 0x5fb   : > { %v5545_v0 = vpop.f32.mrb[20].mxu0 }
 0x5fc   : > { %v5546_v25 = vadd.f32 %v6320_v21, %v5545_v0  ;;  %v6402_v23 = vpop.f32.mrb[21].mxu0 }
 0x5fd   : > { %v5548_v24 = vpop.f32.mrb[22].mxu0 }
 0x5fe   : > { %5553 = vst.msk [vmem:[%s428_s24] sm:$0xff] %vm5552_vm2, %v5546_v25  ;;  %v5549_v26 = vadd.f32 %v6320_v21, %v5548_v24  ;;  %v6403_v28 = vpop.f32.mrb[23].mxu0 }
 0x600   : > { %5554 = vst.msk [vmem:[%s428_s24 + $0x8] sm:$0xff] %vm5552_vm2, %v5549_v26 }
 0x601 PF: > { %s23_s30 = sadd.s32 1, %s7581_s30  }
 0x602   : > { %p20_p7 = scmp.ge.s32.totalorder %s23_s30, 4  }
 0x604   :  { %22 = sbr.rel (!%p20_p7) target bundleno = 4 (0x4), region = 115 }
 0x60b   :  { %5577 = vsyncpa [#allocation3], 1 }
 0x60c   :  { %5579 = vsyncpa [#allocation3 + $0x1], 1 }
 0x60d   :  { %5580 = vsyncpa [#allocation5], 1 }
 0x60e   :  { %5581 = vsyncpa [#allocation8], 1 }
 0x60f   :  { %5582 = vsyncpa [#allocation11], 1 }

</bundles_post_ra>
